<compile_context>
chip_gen: v6e
topology: v6e:2x2x1
jax: 0.10.0
libtpu: 0.0.40
codegen_flags: <defaults>
</compile_context>

<pallas_src>
import functools

import jax
import jax.numpy as jnp
from jax.experimental import pallas as pl
from jax.experimental.pallas import tpu as pltpu

EPS = 1e-5
_LANES = 128


def _round_up(x, m):
    return (x + m - 1) // m * m


def _vmem_limit_bytes():
    """~3/4 of physical VMEM: ~48 MiB on v7x (64 MiB), ~96 MiB on v5e/v6e (128 MiB)."""
    cap = 64 * 1024 * 1024                      # conservative fallback (v7x-sized)
    try:
        info = pltpu.get_tpu_info()
        cap = int(getattr(info, "vmem_capacity_bytes", cap) or cap)
    except Exception:
        pass
    return (cap // 4) * 3


def _pick_band_rows(H0, W0, Cin, Cpad, C4, budget_bytes):
    """Largest divisor of H0 whose per-step VMEM working set fits the budget."""
    K9 = 9 * Cpad
    for T in range(H0, 0, -1):
        if H0 % T:
            continue
        M = T * W0
        if H0 // T > 1 and M % 8:
            continue
        need = (2 * (T + 2) * (W0 + 2) * Cin * 2      # input band, double-buffered bf16
                + 2 * K9 * C4 * 2                     # weights, double-buffered bf16
                + M * K9 * 2                          # im2col scratch (bf16)
                + M * C4 * 4                          # live f32 matmul result (worst case)
                + 2 * M * C4 * 2                      # y band, double-buffered bf16
                + 16 * C4 * 4)                        # stats blocks
        if need <= budget_bytes:
            return T
    for T in range(1, H0 + 1):                        # nothing fits: smallest legal band
        if H0 % T == 0 and (H0 // T == 1 or (T * W0) % 8 == 0):
            return T
    return H0


@functools.partial(jax.jit, static_argnames=("eps", "band_rows"))
def upblock_forward(x_nchw, w_oihw, gamma, beta, eps=EPS, band_rows=None):
    N, Cin, H0, W0 = x_nchw.shape
    Cout = w_oihw.shape[0]
    H, W = 2 * H0, 2 * W0
    C4 = 4 * Cout

    # Lane-aligned K slots only when inflation stays <= 2x (perf review: lane-dense
    # stores; avoid blowing MXU K for tiny Cin).
    Cpad = _round_up(Cin, _LANES)
    if Cpad > 2 * Cin:
        Cpad = Cin
    K9 = 9 * Cpad

    vmem_limit = _vmem_limit_bytes()
    if band_rows is None:
        band_rows = _pick_band_rows(
            H0, W0, Cin, Cpad, C4,
            budget_bytes=max(vmem_limit - 8 * 1024 * 1024, 8 * 1024 * 1024))
    T = band_rows
    assert H0 % T == 0, (H0, T)
    n_bands = H0 // T
    M = T * W0
    assert n_bands == 1 or M % 8 == 0, (T, W0)

    # In-band sub-chunks: overlap im2col stores with the MXU and cap the f32 result.
    n_sub = 1
    for cand in (4, 2):
        if T % cand == 0 and ((T // cand) * W0) % 8 == 0 and (T // cand) * W0 >= 128:
            n_sub = cand
            break
    Tc = T // n_sub
    Mc = Tc * W0

    # ---- host-side phase-folded weights: (9*Cpad, 4*Cout) ---------------------
    # Output pixel (2i+py, 2j+px) only sees a 3x3 window (with repeats) of the
    # 1px-padded ORIGINAL-resolution input whose top-left is (i, j).
    w33 = jnp.transpose(w_oihw, (2, 3, 1, 0)).astype(jnp.float32)   # (3,3,Cin,Cout)
    TA = ((0, 1, 1), (1, 1, 2))     # TA[phase][d] -> tap offset in the padded input
    Wmat = jnp.zeros((K9, C4), jnp.float32)
    for py in range(2):
        for px in range(2):
            for dy in range(3):
                for dx in range(3):
                    ta, tb = TA[py][dy], TA[px][dx]
                    r = (ta * 3 + tb) * Cpad
                    cc = (py * 2 + px) * Cout
                    Wmat = Wmat.at[r:r + Cin, cc:cc + Cout].add(w33[dy, dx])
    Wmat = Wmat.astype(jnp.bfloat16)

    # ---- input prep: NCHW -> NHWC, pad 1, bf16, pre-band with 2-row halo -------
    xp = jnp.transpose(x_nchw, (0, 2, 3, 1))
    xp = jnp.pad(xp, ((0, 0), (1, 1), (1, 1), (0, 0))).astype(jnp.bfloat16)
    if n_bands == 1:
        xb = xp                                           # (N, H0+2, W0+2, Cin)
    else:
        xb = jnp.stack([xp[:, b * T:b * T + T + 2] for b in range(n_bands)],
                       axis=1).reshape(N * n_bands, T + 2, W0 + 2, Cin)

    # ---- kernel: fused upsample+conv3x3 (phase matmul) + ReLU + partial stats --
    def conv_kernel(x_ref, w_ref, y_ref, sum_ref, sq_ref, lhs_ref):
        if Cpad != Cin:
            # Zero once per band so uninitialized padding lanes never reach the MXU.
            lhs_ref[...] = jnp.zeros_like(lhs_ref)
        psum = jnp.zeros((1, C4), jnp.float32)
        psq = jnp.zeros((1, C4), jnp.float32)
        for c in range(n_sub):
            r0 = c * Tc
            m0 = r0 * W0
            # im2col of the 3x3 original-resolution window for this chunk.
            for ta in range(3):
                for tb in range(3):
                    tap = x_ref[0, r0 + ta:r0 + ta + Tc, tb:tb + W0, :]  # (Tc,W0,Cin)
                    k0 = (ta * 3 + tb) * Cpad
                    lhs_ref[m0:m0 + Mc, k0:k0 + Cin] = tap.reshape(Mc, Cin)
            # One MXU matmul per chunk: (Mc, 9*Cpad) @ (9*Cpad, 4*Cout), f32 acc.
            p = jnp.dot(lhs_ref[m0:m0 + Mc, :], w_ref[...],
                        preferred_element_type=jnp.float32)
            p = jnp.maximum(p, 0.0)                       # ReLU
            pb = p.astype(jnp.bfloat16)
            y_ref[0, m0:m0 + Mc, :] = pb
            pf = pb.astype(jnp.float32)                   # stats on the values stored
            psum = psum + jnp.sum(pf, axis=0, keepdims=True)
            psq = psq + jnp.sum(pf * pf, axis=0, keepdims=True)
        sum_ref[0, 0] = psum
        sq_ref[0, 0] = psq

    y1, ysum, ysq = pl.pallas_call(
        conv_kernel,
        out_shape=(jax.ShapeDtypeStruct((N, H0 * W0, C4), jnp.bfloat16),
                   jax.ShapeDtypeStruct((N, n_bands, 1, C4), jnp.float32),
                   jax.ShapeDtypeStruct((N, n_bands, 1, C4), jnp.float32)),
        grid_spec=pltpu.PrefetchScalarGridSpec(
            num_scalar_prefetch=0,
            grid=(N, n_bands),
            in_specs=[
                pl.BlockSpec((1, T + 2, W0 + 2, Cin),
                             lambda n, b: (n * n_bands + b, 0, 0, 0)),
                pl.BlockSpec((K9, C4), lambda n, b: (0, 0)),
            ],
            out_specs=(
                pl.BlockSpec((1, M, C4), lambda n, b: (n, b, 0)),
                pl.BlockSpec((1, 1, 1, C4), lambda n, b: (n, b, 0, 0)),
                pl.BlockSpec((1, 1, 1, C4), lambda n, b: (n, b, 0, 0)),
            ),
            scratch_shapes=[pltpu.VMEM((M, K9), jnp.bfloat16)],
        ),
        compiler_params=pltpu.CompilerParams(
            dimension_semantics=("parallel", "parallel"),
            vmem_limit_bytes=vmem_limit),
    )(xb, Wmat)

    # ---- tiny stats reduction -> BN scale/shift (training-mode, biased var) ----
    cnt = jnp.float32(N * H * W)
    sum_c = jnp.sum(ysum, axis=(0, 1, 2)).reshape(4, Cout).sum(axis=0)
    sq_c = jnp.sum(ysq, axis=(0, 1, 2)).reshape(4, Cout).sum(axis=0)
    mean = sum_c / cnt
    var = jnp.maximum(sq_c / cnt - mean * mean, 0.0)    # clamp E[x^2]-E[x]^2 >= 0
    inv = jax.lax.rsqrt(var + eps)
    scale = gamma.astype(jnp.float32) * inv             # (Cout,)
    shift = beta.astype(jnp.float32) - mean * scale

    # ---- BN affine + phase->NCHW interleave: one fused XLA pass ----------------
    y = y1.reshape(N, H0, W0, 2, 2, Cout).astype(jnp.float32)   # (n,i,j,py,px,c)
    out = y * scale + shift
    out = jnp.transpose(out, (0, 5, 1, 3, 2, 4))                # (n,c,i,py,j,px)
    return out.reshape(N, Cout, H, W)


def upblock_reference(x_nchw, w_oihw, gamma, beta, eps=EPS):
    """Pure-JAX f32 reference matching the PyTorch forward (training-mode BN)."""
    xu = jnp.repeat(jnp.repeat(x_nchw, 2, axis=2), 2, axis=3)
    y = jax.lax.conv_general_dilated(
        xu, w_oihw, window_strides=(1, 1), padding=((1, 1), (1, 1)),
        dimension_numbers=('NCHW', 'OIHW', 'NCHW'))
    y = jnp.maximum(y, 0.0)
    mean = jnp.mean(y, axis=(0, 2, 3), keepdims=True)
    var = jnp.mean((y - mean) ** 2, axis=(0, 2, 3), keepdims=True)
    out = (y - mean) * jax.lax.rsqrt(var + eps)
    return out * gamma.reshape(1, -1, 1, 1) + beta.reshape(1, -1, 1, 1)


if __name__ == "__main__":
    key = jax.random.PRNGKey(0)
    k_x, k_w, k_g, k_b = jax.random.split(key, 4)

    N, Cin, Cout, H0, W0 = 2, 4, 8, 16, 16
    x = jax.random.normal(k_x, (N, Cin, H0, W0), dtype=jnp.float32)
    w = jax.random.normal(k_w, (Cout, Cin, 3, 3), dtype=jnp.float32) * 0.1
    gamma = 0.5 + jax.random.uniform(k_g, (Cout,), dtype=jnp.float32)
    beta = 0.1 * jax.random.normal(k_b, (Cout,), dtype=jnp.float32)

    ref = jax.block_until_ready(upblock_reference(x, w, gamma, beta))

    # Run both the auto-sized single-band (chunked) path and an explicit multi-band
    # (halo-fetch) path to cover both tilings.
    for br in (None, 8):
        out = jax.block_until_ready(upblock_forward(x, w, gamma, beta, band_rows=br))
        assert out.shape == (N, Cout, 2 * H0, 2 * W0), out.shape
        # bf16 MXU inputs + bf16 activation intermediate -> bf16-class tolerance.
        rel_err = float(jnp.max(jnp.abs(out - ref)) / (jnp.max(jnp.abs(ref)) + 1e-6))
        assert rel_err < 5e-2, (br, rel_err)
    print("KERNEL_OK")
</pallas_src>

<mosaic_0001>
module attributes {stable_mosaic.version = 11 : i64} {
  func.func @conv_kernel(%arg0: i32, %arg1: i32, %arg2: memref<1x18x18x4xbf16, #tpu.memory_space<vmem>>, %arg3: memref<36x32xbf16, #tpu.memory_space<vmem>>, %arg4: memref<1x256x32xbf16, #tpu.memory_space<vmem>>, %arg5: memref<1x1x1x32xf32, #tpu.memory_space<vmem>>, %arg6: memref<1x1x1x32xf32, #tpu.memory_space<vmem>>, %arg7: memref<256x36xbf16, #tpu.memory_space<vmem>>) attributes {dimension_semantics = [#tpu.dimension_semantics<parallel>, #tpu.dimension_semantics<parallel>], iteration_bounds = array<i64: 2, 1>, scalar_prefetch = 0 : i64, scratch_operands = 1 : i64, tpu.core_type = #tpu.core_type<tc>, window_params = [{transform_indices = @transform_0, window_bounds = array<i64: 1, 18, 18, 4>}, {pipeline_mode = #tpu.pipeline_mode<synchronous>, transform_indices = @transform_1, window_bounds = array<i64: 36, 32>}, {transform_indices = @transform_2, window_bounds = array<i64: 1, 256, 32>}, {transform_indices = @transform_3, window_bounds = array<i64: 1, 1, 1, 32>}, {transform_indices = @transform_4, window_bounds = array<i64: 1, 1, 1, 32>}]} {
    %cst = arith.constant 0.000000e+00 : f32
    %0 = vector.broadcast %cst : f32 to vector<1x32xf32>
    %cst_0 = arith.constant 0.000000e+00 : f32
    %1 = vector.broadcast %cst_0 : f32 to vector<1x32xf32>
    %c0 = arith.constant 0 : index
    %c0_1 = arith.constant 0 : index
    %c0_2 = arith.constant 0 : index
    %c0_3 = arith.constant 0 : index
    %2 = vector.load %arg2[%c0, %c0_1, %c0_2, %c0_3] : memref<1x18x18x4xbf16, #tpu.memory_space<vmem>>, vector<1x8x16x4xbf16>
    %3 = vector.shape_cast %2 : vector<1x8x16x4xbf16> to vector<8x16x4xbf16>
    %4 = vector.shape_cast %3 : vector<8x16x4xbf16> to vector<128x4xbf16>
    %c0_4 = arith.constant 0 : index
    %c0_5 = arith.constant 0 : index
    %5 = vector.load %arg7[%c0_4, %c0_5] : memref<256x36xbf16, #tpu.memory_space<vmem>>, vector<128x4xbf16>
    tpu.vector_store %arg7[%c0_4, %c0_5], %4 {strides = array<i32>} : memref<256x36xbf16, #tpu.memory_space<vmem>>, vector<128x4xbf16>,
    %c0_6 = arith.constant 0 : index
    %c0_7 = arith.constant 0 : index
    %c1 = arith.constant 1 : index
    %c0_8 = arith.constant 0 : index
    %6 = vector.load %arg2[%c0_6, %c0_7, %c1, %c0_8] : memref<1x18x18x4xbf16, #tpu.memory_space<vmem>>, vector<1x8x16x4xbf16>
    %7 = vector.shape_cast %6 : vector<1x8x16x4xbf16> to vector<8x16x4xbf16>
    %8 = vector.shape_cast %7 : vector<8x16x4xbf16> to vector<128x4xbf16>
    %c0_9 = arith.constant 0 : index
    %c4 = arith.constant 4 : index
    %9 = vector.load %arg7[%c0_9, %c4] : memref<256x36xbf16, #tpu.memory_space<vmem>>, vector<128x4xbf16>
    tpu.vector_store %arg7[%c0_9, %c4], %8 {strides = array<i32>} : memref<256x36xbf16, #tpu.memory_space<vmem>>, vector<128x4xbf16>,
    %c0_10 = arith.constant 0 : index
    %c0_11 = arith.constant 0 : index
    %c2 = arith.constant 2 : index
    %c0_12 = arith.constant 0 : index
    %10 = vector.load %arg2[%c0_10, %c0_11, %c2, %c0_12] : memref<1x18x18x4xbf16, #tpu.memory_space<vmem>>, vector<1x8x16x4xbf16>
    %11 = vector.shape_cast %10 : vector<1x8x16x4xbf16> to vector<8x16x4xbf16>
    %12 = vector.shape_cast %11 : vector<8x16x4xbf16> to vector<128x4xbf16>
    %c0_13 = arith.constant 0 : index
    %c8 = arith.constant 8 : index
    %13 = vector.load %arg7[%c0_13, %c8] : memref<256x36xbf16, #tpu.memory_space<vmem>>, vector<128x4xbf16>
    tpu.vector_store %arg7[%c0_13, %c8], %12 {strides = array<i32>} : memref<256x36xbf16, #tpu.memory_space<vmem>>, vector<128x4xbf16>,
    %c0_14 = arith.constant 0 : index
    %c1_15 = arith.constant 1 : index
    %c0_16 = arith.constant 0 : index
    %c0_17 = arith.constant 0 : index
    %14 = vector.load %arg2[%c0_14, %c1_15, %c0_16, %c0_17] : memref<1x18x18x4xbf16, #tpu.memory_space<vmem>>, vector<1x8x16x4xbf16>
    %15 = vector.shape_cast %14 : vector<1x8x16x4xbf16> to vector<8x16x4xbf16>
    %16 = vector.shape_cast %15 : vector<8x16x4xbf16> to vector<128x4xbf16>
    %c0_18 = arith.constant 0 : index
    %c12 = arith.constant 12 : index
    %17 = vector.load %arg7[%c0_18, %c12] : memref<256x36xbf16, #tpu.memory_space<vmem>>, vector<128x4xbf16>
    tpu.vector_store %arg7[%c0_18, %c12], %16 {strides = array<i32>} : memref<256x36xbf16, #tpu.memory_space<vmem>>, vector<128x4xbf16>,
    %c0_19 = arith.constant 0 : index
    %c1_20 = arith.constant 1 : index
    %c1_21 = arith.constant 1 : index
    %c0_22 = arith.constant 0 : index
    %18 = vector.load %arg2[%c0_19, %c1_20, %c1_21, %c0_22] : memref<1x18x18x4xbf16, #tpu.memory_space<vmem>>, vector<1x8x16x4xbf16>
    %19 = vector.shape_cast %18 : vector<1x8x16x4xbf16> to vector<8x16x4xbf16>
    %20 = vector.shape_cast %19 : vector<8x16x4xbf16> to vector<128x4xbf16>
    %c0_23 = arith.constant 0 : index
    %c16 = arith.constant 16 : index
    %21 = vector.load %arg7[%c0_23, %c16] : memref<256x36xbf16, #tpu.memory_space<vmem>>, vector<128x4xbf16>
    tpu.vector_store %arg7[%c0_23, %c16], %20 {strides = array<i32>} : memref<256x36xbf16, #tpu.memory_space<vmem>>, vector<128x4xbf16>,
    %c0_24 = arith.constant 0 : index
    %c1_25 = arith.constant 1 : index
    %c2_26 = arith.constant 2 : index
    %c0_27 = arith.constant 0 : index
    %22 = vector.load %arg2[%c0_24, %c1_25, %c2_26, %c0_27] : memref<1x18x18x4xbf16, #tpu.memory_space<vmem>>, vector<1x8x16x4xbf16>
    %23 = vector.shape_cast %22 : vector<1x8x16x4xbf16> to vector<8x16x4xbf16>
    %24 = vector.shape_cast %23 : vector<8x16x4xbf16> to vector<128x4xbf16>
    %c0_28 = arith.constant 0 : index
    %c20 = arith.constant 20 : index
    %25 = vector.load %arg7[%c0_28, %c20] : memref<256x36xbf16, #tpu.memory_space<vmem>>, vector<128x4xbf16>
    tpu.vector_store %arg7[%c0_28, %c20], %24 {strides = array<i32>} : memref<256x36xbf16, #tpu.memory_space<vmem>>, vector<128x4xbf16>,
    %c0_29 = arith.constant 0 : index
    %c2_30 = arith.constant 2 : index
    %c0_31 = arith.constant 0 : index
    %c0_32 = arith.constant 0 : index
    %26 = vector.load %arg2[%c0_29, %c2_30, %c0_31, %c0_32] : memref<1x18x18x4xbf16, #tpu.memory_space<vmem>>, vector<1x8x16x4xbf16>
    %27 = vector.shape_cast %26 : vector<1x8x16x4xbf16> to vector<8x16x4xbf16>
    %28 = vector.shape_cast %27 : vector<8x16x4xbf16> to vector<128x4xbf16>
    %c0_33 = arith.constant 0 : index
    %c24 = arith.constant 24 : index
    %29 = vector.load %arg7[%c0_33, %c24] : memref<256x36xbf16, #tpu.memory_space<vmem>>, vector<128x4xbf16>
    tpu.vector_store %arg7[%c0_33, %c24], %28 {strides = array<i32>} : memref<256x36xbf16, #tpu.memory_space<vmem>>, vector<128x4xbf16>,
    %c0_34 = arith.constant 0 : index
    %c2_35 = arith.constant 2 : index
    %c1_36 = arith.constant 1 : index
    %c0_37 = arith.constant 0 : index
    %30 = vector.load %arg2[%c0_34, %c2_35, %c1_36, %c0_37] : memref<1x18x18x4xbf16, #tpu.memory_space<vmem>>, vector<1x8x16x4xbf16>
    %31 = vector.shape_cast %30 : vector<1x8x16x4xbf16> to vector<8x16x4xbf16>
    %32 = vector.shape_cast %31 : vector<8x16x4xbf16> to vector<128x4xbf16>
    %c0_38 = arith.constant 0 : index
    %c28 = arith.constant 28 : index
    %33 = vector.load %arg7[%c0_38, %c28] : memref<256x36xbf16, #tpu.memory_space<vmem>>, vector<128x4xbf16>
    tpu.vector_store %arg7[%c0_38, %c28], %32 {strides = array<i32>} : memref<256x36xbf16, #tpu.memory_space<vmem>>, vector<128x4xbf16>,
    %c0_39 = arith.constant 0 : index
    %c2_40 = arith.constant 2 : index
    %c2_41 = arith.constant 2 : index
    %c0_42 = arith.constant 0 : index
    %34 = vector.load %arg2[%c0_39, %c2_40, %c2_41, %c0_42] : memref<1x18x18x4xbf16, #tpu.memory_space<vmem>>, vector<1x8x16x4xbf16>
    %35 = vector.shape_cast %34 : vector<1x8x16x4xbf16> to vector<8x16x4xbf16>
    %36 = vector.shape_cast %35 : vector<8x16x4xbf16> to vector<128x4xbf16>
    %c0_43 = arith.constant 0 : index
    %c32 = arith.constant 32 : index
    %37 = vector.load %arg7[%c0_43, %c32] : memref<256x36xbf16, #tpu.memory_space<vmem>>, vector<128x4xbf16>
    tpu.vector_store %arg7[%c0_43, %c32], %36 {strides = array<i32>} : memref<256x36xbf16, #tpu.memory_space<vmem>>, vector<128x4xbf16>,
    %c0_44 = arith.constant 0 : index
    %c0_45 = arith.constant 0 : index
    %38 = vector.load %arg7[%c0_44, %c0_45] : memref<256x36xbf16, #tpu.memory_space<vmem>>, vector<128x36xbf16>
    %c0_46 = arith.constant 0 : index
    %c0_47 = arith.constant 0 : index
    %39 = vector.load %arg3[%c0_46, %c0_47] : memref<36x32xbf16, #tpu.memory_space<vmem>>, vector<36x32xbf16>
    %cst_48 = arith.constant dense<0.000000e+00> : vector<128x32xf32>
    %40 = tpu.matmul %38, %39, %cst_48 {dimension_numbers = #tpu.dot_dimension_numbers<[1], [0], [0], [1], [0, 0, 1, 1], [], []>} : vector<128x36xbf16>, vector<36x32xbf16>, vector<128x32xf32> -> vector<128x32xf32>
    %cst_49 = arith.constant 0.000000e+00 : f32
    %41 = vector.broadcast %cst_49 : f32 to vector<128x32xf32>
    %42 = arith.maximumf %40, %41 : vector<128x32xf32>
    %43 = arith.truncf %42 : vector<128x32xf32> to vector<128x32xbf16>
    %c0_50 = arith.constant 0 : index
    %c0_51 = arith.constant 0 : index
    %c0_52 = arith.constant 0 : index
    %44 = vector.load %arg4[%c0_50, %c0_51, %c0_52] : memref<1x256x32xbf16, #tpu.memory_space<vmem>>, vector<1x128x32xbf16>
    %45 = vector.shape_cast %44 : vector<1x128x32xbf16> to vector<128x32xbf16>
    %46 = vector.shape_cast %43 : vector<128x32xbf16> to vector<1x128x32xbf16>
    tpu.vector_store %arg4[%c0_50, %c0_51, %c0_52], %46 {strides = array<i32>} : memref<1x256x32xbf16, #tpu.memory_space<vmem>>, vector<1x128x32xbf16>,
    %47 = arith.extf %43 : vector<128x32xbf16> to vector<128x32xf32>
    %cst_53 = arith.constant dense<0.000000e+00> : vector<32xf32>
    %48 = vector.multi_reduction <add>, %47, %cst_53 [0] : vector<128x32xf32> to vector<32xf32>
    %49 = vector.shape_cast %48 : vector<32xf32> to vector<1x32xf32>
    %50 = arith.addf %0, %49 : vector<1x32xf32>
    %51 = arith.mulf %47, %47 : vector<128x32xf32>
    %cst_54 = arith.constant dense<0.000000e+00> : vector<32xf32>
    %52 = vector.multi_reduction <add>, %51, %cst_54 [0] : vector<128x32xf32> to vector<32xf32>
    %53 = vector.shape_cast %52 : vector<32xf32> to vector<1x32xf32>
    %54 = arith.addf %1, %53 : vector<1x32xf32>
    %c0_55 = arith.constant 0 : index
    %c8_56 = arith.constant 8 : index
    %c0_57 = arith.constant 0 : index
    %c0_58 = arith.constant 0 : index
    %55 = vector.load %arg2[%c0_55, %c8_56, %c0_57, %c0_58] : memref<1x18x18x4xbf16, #tpu.memory_space<vmem>>, vector<1x8x16x4xbf16>
    %56 = vector.shape_cast %55 : vector<1x8x16x4xbf16> to vector<8x16x4xbf16>
    %57 = vector.shape_cast %56 : vector<8x16x4xbf16> to vector<128x4xbf16>
    %c128 = arith.constant 128 : index
    %c0_59 = arith.constant 0 : index
    %58 = vector.load %arg7[%c128, %c0_59] : memref<256x36xbf16, #tpu.memory_space<vmem>>, vector<128x4xbf16>
    tpu.vector_store %arg7[%c128, %c0_59], %57 {strides = array<i32>} : memref<256x36xbf16, #tpu.memory_space<vmem>>, vector<128x4xbf16>,
    %c0_60 = arith.constant 0 : index
    %c8_61 = arith.constant 8 : index
    %c1_62 = arith.constant 1 : index
    %c0_63 = arith.constant 0 : index
    %59 = vector.load %arg2[%c0_60, %c8_61, %c1_62, %c0_63] : memref<1x18x18x4xbf16, #tpu.memory_space<vmem>>, vector<1x8x16x4xbf16>
    %60 = vector.shape_cast %59 : vector<1x8x16x4xbf16> to vector<8x16x4xbf16>
    %61 = vector.shape_cast %60 : vector<8x16x4xbf16> to vector<128x4xbf16>
    %c128_64 = arith.constant 128 : index
    %c4_65 = arith.constant 4 : index
    %62 = vector.load %arg7[%c128_64, %c4_65] : memref<256x36xbf16, #tpu.memory_space<vmem>>, vector<128x4xbf16>
    tpu.vector_store %arg7[%c128_64, %c4_65], %61 {strides = array<i32>} : memref<256x36xbf16, #tpu.memory_space<vmem>>, vector<128x4xbf16>,
    %c0_66 = arith.constant 0 : index
    %c8_67 = arith.constant 8 : index
    %c2_68 = arith.constant 2 : index
    %c0_69 = arith.constant 0 : index
    %63 = vector.load %arg2[%c0_66, %c8_67, %c2_68, %c0_69] : memref<1x18x18x4xbf16, #tpu.memory_space<vmem>>, vector<1x8x16x4xbf16>
    %64 = vector.shape_cast %63 : vector<1x8x16x4xbf16> to vector<8x16x4xbf16>
    %65 = vector.shape_cast %64 : vector<8x16x4xbf16> to vector<128x4xbf16>
    %c128_70 = arith.constant 128 : index
    %c8_71 = arith.constant 8 : index
    %66 = vector.load %arg7[%c128_70, %c8_71] : memref<256x36xbf16, #tpu.memory_space<vmem>>, vector<128x4xbf16>
    tpu.vector_store %arg7[%c128_70, %c8_71], %65 {strides = array<i32>} : memref<256x36xbf16, #tpu.memory_space<vmem>>, vector<128x4xbf16>,
    %c0_72 = arith.constant 0 : index
    %c9 = arith.constant 9 : index
    %c0_73 = arith.constant 0 : index
    %c0_74 = arith.constant 0 : index
    %67 = vector.load %arg2[%c0_72, %c9, %c0_73, %c0_74] : memref<1x18x18x4xbf16, #tpu.memory_space<vmem>>, vector<1x8x16x4xbf16>
    %68 = vector.shape_cast %67 : vector<1x8x16x4xbf16> to vector<8x16x4xbf16>
    %69 = vector.shape_cast %68 : vector<8x16x4xbf16> to vector<128x4xbf16>
    %c128_75 = arith.constant 128 : index
    %c12_76 = arith.constant 12 : index
    %70 = vector.load %arg7[%c128_75, %c12_76] : memref<256x36xbf16, #tpu.memory_space<vmem>>, vector<128x4xbf16>
    tpu.vector_store %arg7[%c128_75, %c12_76], %69 {strides = array<i32>} : memref<256x36xbf16, #tpu.memory_space<vmem>>, vector<128x4xbf16>,
    %c0_77 = arith.constant 0 : index
    %c9_78 = arith.constant 9 : index
    %c1_79 = arith.constant 1 : index
    %c0_80 = arith.constant 0 : index
    %71 = vector.load %arg2[%c0_77, %c9_78, %c1_79, %c0_80] : memref<1x18x18x4xbf16, #tpu.memory_space<vmem>>, vector<1x8x16x4xbf16>
    %72 = vector.shape_cast %71 : vector<1x8x16x4xbf16> to vector<8x16x4xbf16>
    %73 = vector.shape_cast %72 : vector<8x16x4xbf16> to vector<128x4xbf16>
    %c128_81 = arith.constant 128 : index
    %c16_82 = arith.constant 16 : index
    %74 = vector.load %arg7[%c128_81, %c16_82] : memref<256x36xbf16, #tpu.memory_space<vmem>>, vector<128x4xbf16>
    tpu.vector_store %arg7[%c128_81, %c16_82], %73 {strides = array<i32>} : memref<256x36xbf16, #tpu.memory_space<vmem>>, vector<128x4xbf16>,
    %c0_83 = arith.constant 0 : index
    %c9_84 = arith.constant 9 : index
    %c2_85 = arith.constant 2 : index
    %c0_86 = arith.constant 0 : index
    %75 = vector.load %arg2[%c0_83, %c9_84, %c2_85, %c0_86] : memref<1x18x18x4xbf16, #tpu.memory_space<vmem>>, vector<1x8x16x4xbf16>
    %76 = vector.shape_cast %75 : vector<1x8x16x4xbf16> to vector<8x16x4xbf16>
    %77 = vector.shape_cast %76 : vector<8x16x4xbf16> to vector<128x4xbf16>
    %c128_87 = arith.constant 128 : index
    %c20_88 = arith.constant 20 : index
    %78 = vector.load %arg7[%c128_87, %c20_88] : memref<256x36xbf16, #tpu.memory_space<vmem>>, vector<128x4xbf16>
    tpu.vector_store %arg7[%c128_87, %c20_88], %77 {strides = array<i32>} : memref<256x36xbf16, #tpu.memory_space<vmem>>, vector<128x4xbf16>,
    %c0_89 = arith.constant 0 : index
    %c10 = arith.constant 10 : index
    %c0_90 = arith.constant 0 : index
    %c0_91 = arith.constant 0 : index
    %79 = vector.load %arg2[%c0_89, %c10, %c0_90, %c0_91] : memref<1x18x18x4xbf16, #tpu.memory_space<vmem>>, vector<1x8x16x4xbf16>
    %80 = vector.shape_cast %79 : vector<1x8x16x4xbf16> to vector<8x16x4xbf16>
    %81 = vector.shape_cast %80 : vector<8x16x4xbf16> to vector<128x4xbf16>
    %c128_92 = arith.constant 128 : index
    %c24_93 = arith.constant 24 : index
    %82 = vector.load %arg7[%c128_92, %c24_93] : memref<256x36xbf16, #tpu.memory_space<vmem>>, vector<128x4xbf16>
    tpu.vector_store %arg7[%c128_92, %c24_93], %81 {strides = array<i32>} : memref<256x36xbf16, #tpu.memory_space<vmem>>, vector<128x4xbf16>,
    %c0_94 = arith.constant 0 : index
    %c10_95 = arith.constant 10 : index
    %c1_96 = arith.constant 1 : index
    %c0_97 = arith.constant 0 : index
    %83 = vector.load %arg2[%c0_94, %c10_95, %c1_96, %c0_97] : memref<1x18x18x4xbf16, #tpu.memory_space<vmem>>, vector<1x8x16x4xbf16>
    %84 = vector.shape_cast %83 : vector<1x8x16x4xbf16> to vector<8x16x4xbf16>
    %85 = vector.shape_cast %84 : vector<8x16x4xbf16> to vector<128x4xbf16>
    %c128_98 = arith.constant 128 : index
    %c28_99 = arith.constant 28 : index
    %86 = vector.load %arg7[%c128_98, %c28_99] : memref<256x36xbf16, #tpu.memory_space<vmem>>, vector<128x4xbf16>
    tpu.vector_store %arg7[%c128_98, %c28_99], %85 {strides = array<i32>} : memref<256x36xbf16, #tpu.memory_space<vmem>>, vector<128x4xbf16>,
    %c0_100 = arith.constant 0 : index
    %c10_101 = arith.constant 10 : index
    %c2_102 = arith.constant 2 : index
    %c0_103 = arith.constant 0 : index
    %87 = vector.load %arg2[%c0_100, %c10_101, %c2_102, %c0_103] : memref<1x18x18x4xbf16, #tpu.memory_space<vmem>>, vector<1x8x16x4xbf16>
    %88 = vector.shape_cast %87 : vector<1x8x16x4xbf16> to vector<8x16x4xbf16>
    %89 = vector.shape_cast %88 : vector<8x16x4xbf16> to vector<128x4xbf16>
    %c128_104 = arith.constant 128 : index
    %c32_105 = arith.constant 32 : index
    %90 = vector.load %arg7[%c128_104, %c32_105] : memref<256x36xbf16, #tpu.memory_space<vmem>>, vector<128x4xbf16>
    tpu.vector_store %arg7[%c128_104, %c32_105], %89 {strides = array<i32>} : memref<256x36xbf16, #tpu.memory_space<vmem>>, vector<128x4xbf16>,
    %c128_106 = arith.constant 128 : index
    %c0_107 = arith.constant 0 : index
    %91 = vector.load %arg7[%c128_106, %c0_107] : memref<256x36xbf16, #tpu.memory_space<vmem>>, vector<128x36xbf16>
    %c0_108 = arith.constant 0 : index
    %c0_109 = arith.constant 0 : index
    %92 = vector.load %arg3[%c0_108, %c0_109] : memref<36x32xbf16, #tpu.memory_space<vmem>>, vector<36x32xbf16>
    %cst_110 = arith.constant dense<0.000000e+00> : vector<128x32xf32>
    %93 = tpu.matmul %91, %92, %cst_110 {dimension_numbers = #tpu.dot_dimension_numbers<[1], [0], [0], [1], [0, 0, 1, 1], [], []>} : vector<128x36xbf16>, vector<36x32xbf16>, vector<128x32xf32> -> vector<128x32xf32>
    %cst_111 = arith.constant 0.000000e+00 : f32
    %94 = vector.broadcast %cst_111 : f32 to vector<128x32xf32>
    %95 = arith.maximumf %93, %94 : vector<128x32xf32>
    %96 = arith.truncf %95 : vector<128x32xf32> to vector<128x32xbf16>
    %c0_112 = arith.constant 0 : index
    %c128_113 = arith.constant 128 : index
    %c0_114 = arith.constant 0 : index
    %97 = vector.load %arg4[%c0_112, %c128_113, %c0_114] : memref<1x256x32xbf16, #tpu.memory_space<vmem>>, vector<1x128x32xbf16>
    %98 = vector.shape_cast %97 : vector<1x128x32xbf16> to vector<128x32xbf16>
    %99 = vector.shape_cast %96 : vector<128x32xbf16> to vector<1x128x32xbf16>
    tpu.vector_store %arg4[%c0_112, %c128_113, %c0_114], %99 {strides = array<i32>} : memref<1x256x32xbf16, #tpu.memory_space<vmem>>, vector<1x128x32xbf16>,
    %100 = arith.extf %96 : vector<128x32xbf16> to vector<128x32xf32>
    %cst_115 = arith.constant dense<0.000000e+00> : vector<32xf32>
    %101 = vector.multi_reduction <add>, %100, %cst_115 [0] : vector<128x32xf32> to vector<32xf32>
    %102 = vector.shape_cast %101 : vector<32xf32> to vector<1x32xf32>
    %103 = arith.addf %50, %102 : vector<1x32xf32>
    %104 = arith.mulf %100, %100 : vector<128x32xf32>
    %cst_116 = arith.constant dense<0.000000e+00> : vector<32xf32>
    %105 = vector.multi_reduction <add>, %104, %cst_116 [0] : vector<128x32xf32> to vector<32xf32>
    %106 = vector.shape_cast %105 : vector<32xf32> to vector<1x32xf32>
    %107 = arith.addf %54, %106 : vector<1x32xf32>
    %c0_117 = arith.constant 0 : index
    %c0_118 = arith.constant 0 : index
    %c0_119 = arith.constant 0 : index
    %c0_120 = arith.constant 0 : index
    %108 = vector.load %arg5[%c0_117, %c0_118, %c0_119, %c0_120] : memref<1x1x1x32xf32, #tpu.memory_space<vmem>>, vector<1x1x1x32xf32>
    %109 = vector.shape_cast %108 : vector<1x1x1x32xf32> to vector<1x32xf32>
    %110 = vector.shape_cast %103 : vector<1x32xf32> to vector<1x1x1x32xf32>
    tpu.vector_store %arg5[%c0_117, %c0_118, %c0_119, %c0_120], %110 {strides = array<i32>} : memref<1x1x1x32xf32, #tpu.memory_space<vmem>>, vector<1x1x1x32xf32>,
    %c0_121 = arith.constant 0 : index
    %c0_122 = arith.constant 0 : index
    %c0_123 = arith.constant 0 : index
    %c0_124 = arith.constant 0 : index
    %111 = vector.load %arg6[%c0_121, %c0_122, %c0_123, %c0_124] : memref<1x1x1x32xf32, #tpu.memory_space<vmem>>, vector<1x1x1x32xf32>
    %112 = vector.shape_cast %111 : vector<1x1x1x32xf32> to vector<1x32xf32>
    %113 = vector.shape_cast %107 : vector<1x32xf32> to vector<1x1x1x32xf32>
    tpu.vector_store %arg6[%c0_121, %c0_122, %c0_123, %c0_124], %113 {strides = array<i32>} : memref<1x1x1x32xf32, #tpu.memory_space<vmem>>, vector<1x1x1x32xf32>,
    return
  }
  func.func @transform_0(%arg0: i32, %arg1: i32) -> (i32, i32, i32, i32) {
    %c1_i32 = arith.constant 1 : i32
    %0 = arith.muli %arg0, %c1_i32 : i32
    %1 = arith.addi %0, %arg1 : i32
    %c0_i32 = arith.constant 0 : i32
    %c0_i32_0 = arith.constant 0 : i32
    %c0_i32_1 = arith.constant 0 : i32
    %c0_i32_2 = arith.constant 0 : i32
    return %1, %c0_i32, %c0_i32_0, %c0_i32_1 : i32, i32, i32, i32
  }
  func.func @transform_1(%arg0: i32, %arg1: i32) -> (i32, i32) {
    %c0_i32 = arith.constant 0 : i32
    %c0_i32_0 = arith.constant 0 : i32
    %c0_i32_1 = arith.constant 0 : i32
    return %c0_i32, %c0_i32_0 : i32, i32
  }
  func.func @transform_2(%arg0: i32, %arg1: i32) -> (i32, i32, i32) {
    %c0_i32 = arith.constant 0 : i32
    %c0_i32_0 = arith.constant 0 : i32
    return %arg0, %arg1, %c0_i32 : i32, i32, i32
  }
  func.func @transform_3(%arg0: i32, %arg1: i32) -> (i32, i32, i32, i32) {
    %c0_i32 = arith.constant 0 : i32
    %c0_i32_0 = arith.constant 0 : i32
    %c0_i32_1 = arith.constant 0 : i32
    return %arg0, %arg1, %c0_i32, %c0_i32_0 : i32, i32, i32, i32
  }
  func.func @transform_4(%arg0: i32, %arg1: i32) -> (i32, i32, i32, i32) {
    %c0_i32 = arith.constant 0 : i32
    %c0_i32_0 = arith.constant 0 : i32
    %c0_i32_1 = arith.constant 0 : i32
    return %arg0, %arg1, %c0_i32, %c0_i32_0 : i32, i32, i32, i32
  }
}

</mosaic_0001>

<bundles_post_ra>
// kernel: upblock_forward.1
= control target key start
LH: loop header
LB: loop body
LE: loop exit
PB: predicated region body
PF: predicated region fallthrough
CT: control target
= control target key end

     0   :  { %s5045_s15 = smov 0   ;;  %s5047_s16 = smov 0   ;;  %s6675_s0 = inlined_call_operand.vmem [shape: bf16[2,18,18,4], index: 0, kind: input, shape index: {}]   ;;  %s6676_s1 = inlined_call_operand.vmem [shape: bf16[36,32], index: 1, kind: input, shape index: {}]   ;;  %s6677_s2 = inlined_call_operand.vmem [shape: bf16[2,256,32], index: 2, kind: output, shape index: {0}]   ;;  %s6678_s3 = inlined_call_operand.vmem [shape: f32[2,1,1,32], index: 3, kind: output, shape index: {1}]   ;;  %s6679_s4 = inlined_call_operand.vmem [shape: f32[2,1,1,32], index: 4, kind: output, shape index: {2}]  }
   0x1   :  { %s5049_s17 = smov 0  }
   0x2 LB: > { %s27_s18 = sadd.s32 1, %s5006_s16  ;;  %p4388_p0 = scmp.ge.s32.totalorder %s5010_s17, 1  ;;  %s5010_s17 = sphi %s5049_s17, %s15_s17   ;;  %s5006_s16 = sphi %s5047_s16, %s6685_s16   ;;  %s5002_s15 = sphi %s5045_s15, %s6684_s15  }
   0x3   : > { %p29_p1 = scmp.ge.s32.totalorder %s27_s18, 2  ;;  %p189_p2 = scmp.lt.s32.totalorder %s5010_s17, 3 }
   0x5   : > { %s6687_s18 = smov (%p29_p1, %s27_s18), 0  ;;  %p190_p3 = pnand %p4388_p0, %p189_p2 }
   0x6   : > { %p233_p4 = scmp.lt.s32.totalorder (!%p190_p3), %s5002_s15, 1  ;;  %s5012_s23 = smov (!%p190_p3), 4  }
   0x7   : > { %193 = sbr.rel (%p190_p3) target bundleno = 890 (0x37a), region = 28  ;;  %s5013_s24 = smov (!%p190_p3), 8  }
   0x8   : > { %s5014_s25 = smov (!%p190_p3), 12   ;;  %s5015_s26 = smov (!%p190_p3), 16  }
   0x9   : > { %s5016_s27 = smov (!%p190_p3), 20   ;;  %s5017_s28 = smov (!%p190_p3), 24  }
   0xa   : > { %s5018_s29 = smov (!%p190_p3), 28   ;;  %s5019_s6 = smov (!%p190_p3), 32  }
   0xc   : > { %s6689_s15 = smov (!%p233_p4, %s5002_s15), 1  ;;  %vm319_vm0 = vsmask.f32 3328  ;;  %vm320_vm1 = vsmask.f32 7440  ;;  %vm627_vm3 = vcmask 1042432  }
   0xd   : > { %s4933_s19 = smul.u32 216, %s6689_s15  ;;  %vm5080_vm2 = vmor %vm319_vm0, %vm320_vm1  ;;  %vm628_vm4 = vcmask 1046532   ;;  %vm278_vm6 = vcmask 27648   ;;  %vm562_vm7 = vcmask 60448   ;;  %vm734_vm8 = vcmask 93248   ;;  %s4832_s21 = sshll.u32 %s6689_s15, 7 }
   0xe   : > { %vm5149_vm5 = vmor %vm627_vm3, %vm628_vm4  ;;  %vm832_vm9 = vcmask 126048   ;;  %vm1113_vm10 = vcmask 158848   ;;  %vm1282_vm11 = vcmask 191648   ;;  %vm1948_vm12 = vcmask 1041408   ;;  %s260_s30 = scalar_lea.vmem %s6679_s4, %s6689_s15 }
   0xf   : > { %s5069_s22 = scalar_lea.vmem %s6675_s0, %s4933_s19  ;;  %vm1380_vm13 = vcmask 224448   ;;  %vm1661_vm14 = vcmask 257248   ;;  %vm1830_vm15 = vcmask 290048   ;;  %vm1923_vm0 = vcmask 293888  }
  0x10   : > { %v298_v0 = vld [vmem:[%s5069_s22 + $0xc] sm:$0xf]  ;;  %v299_v1 = vld [vmem:[%s5069_s22 + $0x10] sm:$0xf]  ;;  %v295_v2 = vld [vmem:[%s5069_s22] sm:$0xf] }
  0x11   : > { %v347_v3 = vshrl.u32 %v298_v0, 16  ;;  %v350_v4 = vshll.u32 %v298_v0, 16  ;;  %v356_v5 = vshll.u32 %v299_v1, 16  ;;  %v360_v6 = vshrl.u32 %v299_v1, 16  ;;  %v296_v7 = vld [vmem:[%s5069_s22 + $0x4] sm:$0xf] }
  0x12   : > { %v323_v8 = vshrl.u32 %v295_v2, 16  ;;  %v326_v9 = vshll.u32 %v295_v2, 16  ;;  %v332_v10 = vshll.u32 %v296_v7, 16  ;;  %v336_v11 = vshrl.u32 %v296_v7, 16  ;;  %v300_v12 = vld [vmem:[%s5069_s22 + $0x14] sm:$0x1] }
  0x13   : > { %v349_v13 = vrot.slane %v347_v3, 4  ;;  %v352_v14 = vrot.slane %v350_v4, 5  ;;  %v358_v15 = vrot.slane %v356_v5, 5  ;;  %v362_v16 = vrot.slane %v360_v6, 4  ;;  %v297_v17 = vld [vmem:[%s5069_s22 + $0x8] sm:$0x1] }
  0x14   : > { %v325_v18 = vrot.slane %v323_v8, 4  ;;  %v328_v19 = vrot.slane %v326_v9, 5  ;;  %v334_v20 = vrot.slane %v332_v10, 5  ;;  %v338_v21 = vrot.slane %v336_v11, 4  ;;  %v302_v22 = vld [vmem:[%s5069_s22 + $0x1c] sm:$0xf] }
  0x15   : > { %v353_v23 = vor.u32 %v352_v14, %v349_v13  ;;  %v363_v24 = vor.u32 %v362_v16, %v358_v15  ;;  %v366_v25 = vshll.u32 %v300_v12, 16  ;;  %v342_v26 = vshll.u32 %v297_v17, 16  ;;  %v303_v30 = vld [vmem:[%s5069_s22 + $0x20] sm:$0x1]  ;;  %v301_v33 = vld [vmem:[%s5069_s22 + $0x18] sm:$0xf] }
  0x16   : > { %v329_v28 = vor.u32 %v328_v19, %v325_v18  ;;  %v339_v29 = vor.u32 %v338_v21, %v334_v20  ;;  %v380_v31 = vshll.u32 %v302_v22, 16  ;;  %v384_v32 = vshrl.u32 %v302_v22, 16  ;;  %v305_v42 = vld [vmem:[%s5069_s22 + $0x28] sm:$0xf]  ;;  %v306_v47 = vld [vmem:[%s5069_s22 + $0x2c] sm:$0x1] }
  0x17   : > { %v354_v34 = vrot.slane %v353_v23, 4  ;;  %v364_v35 = vrot.slane %v363_v24, 4  ;;  %v368_v36 = vrot.slane %v366_v25, 5  ;;  %v344_v37 = vrot.slane %v342_v26, 5  ;;  %v304_v48 = vld [vmem:[%s5069_s22 + $0x24] sm:$0xf] }
  0x18   : > { %v330_v38 = vrot.slane %v329_v28, 4  ;;  %v340_v39 = vrot.slane %v339_v29, 4  ;;  %v382_v40 = vrot.slane %v380_v31, 5  ;;  %v386_v41 = vrot.slane %v384_v32, 4  ;;  %v308_v53 = vld [vmem:[%s5069_s22 + $0x34] sm:$0xf] }
  0x19   : > { %v359_v43 = vsel %vm5080_vm2, %v354_v34, %v358_v15  ;;  %v369_v44 = vsel %vm5080_vm2, %v364_v35, %v368_v36  ;;  %v390_v45 = vshll.u32 %v303_v30, 16  ;;  %v371_v46 = vshrl.u32 %v301_v33, 16  ;;  %v309_v62 = vld [vmem:[%s5069_s22 + $0x38] sm:$0x1]  ;;  %v307_v3 = vld [vmem:[%s5069_s22 + $0x30] sm:$0xf] }
  0x1a   : > { %518 = vrot.lane.b32.xlu1 %v359_v43, %s5012_s23  ;;  %v335_v49 = vsel %vm5080_vm2, %v330_v38, %v334_v20  ;;  %v345_v50 = vsel %vm5080_vm2, %v340_v39, %v344_v37  ;;  %v387_v51 = vor.u32 %v386_v41, %v382_v40  ;;  %v374_v52 = vshll.u32 %v301_v33, 16  ;;  %v311_v8 = vld [vmem:[%s5069_s22 + $0x40] sm:$0xf]  ;;  %v312_v17 = vld [vmem:[%s5069_s22 + $0x44] sm:$0x1] }
  0x1b   : > { %514 = vrot.lane.b32.xlu0 %v335_v49, %s5012_s23  ;;  %v392_v54 = vrot.slane %v390_v45, 5  ;;  %v373_v55 = vrot.slane %v371_v46, 4  ;;  %v404_v56 = vshll.u32 %v305_v42, 16  ;;  %v408_v57 = vshrl.u32 %v305_v42, 16  ;;  %v310_v22 = vld [vmem:[%s5069_s22 + $0x3c] sm:$0xf] }
  0x1c   : > { %v388_v58 = vrot.slane %v387_v51, 4  ;;  %v376_v59 = vrot.slane %v374_v52, 5  ;;  %v414_v60 = vshll.u32 %v306_v47, 16  ;;  %v395_v61 = vshrl.u32 %v304_v48, 16  ;;  %v314_v28 = vld [vmem:[%s5069_s22 + $0x4c] sm:$0xf] }
  0x1d   : > { %v406_v63 = vrot.slane %v404_v56, 5  ;;  %v410_v0 = vrot.slane %v408_v57, 4  ;;  %v398_v1 = vshll.u32 %v304_v48, 16  ;;  %v428_v2 = vshll.u32 %v308_v53, 16  ;;  %v315_v37 = vld [vmem:[%s5069_s22 + $0x50] sm:$0x1] }
  0x1e   : > { %520 = vrot.lane.b32.xlu1 %v369_v44, %s5012_s23  ;;  %v393_v4 = vsel %vm5080_vm2, %v388_v58, %v392_v54  ;;  %v377_v5 = vor.u32 %v376_v59, %v373_v55  ;;  %v416_v6 = vrot.slane %v414_v60, 5  ;;  %v397_v7 = vrot.slane %v395_v61, 4  ;;  %v313_v42 = vld [vmem:[%s5069_s22 + $0x48] sm:$0xf]  ;;  %v317_v47 = vld [vmem:[%s5069_s22 + $0x58] sm:$0xf] }
  0x1f   : > { %516 = vrot.lane.b32.xlu0 %v345_v50, %s5012_s23  ;;  %v411_v9 = vor.u32 %v410_v0, %v406_v63  ;;  %v400_v10 = vrot.slane %v398_v1, 5  ;;  %v430_v11 = vrot.slane %v428_v2, 5  ;;  %v432_v12 = vshrl.u32 %v308_v53, 16  ;;  %v318_v56 = vld [vmem:[%s5069_s22 + $0x5c] sm:$0x1] }
  0x20   : > { %v378_v13 = vrot.slane %v377_v5, 4  ;;  %v438_v14 = vshll.u32 %v309_v62, 16  ;;  %v419_v15 = vshrl.u32 %v307_v3, 16  ;;  %v422_v16 = vshll.u32 %v307_v3, 16  ;;  %v316_v61 = vld [vmem:[%s5069_s22 + $0x54] sm:$0xf] }
  0x21   : > { %v412_v18 = vrot.slane %v411_v9, 4  ;;  %v401_v19 = vor.u32 %v400_v10, %v397_v7  ;;  %v434_v20 = vrot.slane %v432_v12, 4  ;;  %v452_v21 = vshll.u32 %v311_v8, 16  ;;  %v580_v10 = vld [vmem:[%s5069_s22 + $0x4] sm:$0xf] }
  0x22   : > { %524 = vrot.lane.b32.xlu1 %v393_v4, %s5012_s23  ;;  %v383_v23 = vsel %vm5080_vm2, %v378_v13, %v382_v40  ;;  %v440_v24 = vrot.slane %v438_v14, 5  ;;  %v421_v25 = vrot.slane %v419_v15, 4  ;;  %v424_v26 = vrot.slane %v422_v16, 5 }
  0x23   : > { %522 = vrot.lane.b32.xlu0 %v383_v23, %s5012_s23  ;;  %v417_v29 = vsel %vm5080_vm2, %v412_v18, %v416_v6  ;;  %v402_v30 = vrot.slane %v401_v19, 4  ;;  %v435_v31 = vor.u32 %v434_v20, %v430_v11  ;;  %v454_v32 = vrot.slane %v452_v21, 5  ;;  %v581_v21 = vld [vmem:[%s5069_s22 + $0x8] sm:$0x1] }
  0x24   : > { %v425_v33 = vor.u32 %v424_v26, %v421_v25  ;;  %v456_v34 = vshrl.u32 %v311_v8, 16  ;;  %v462_v35 = vshll.u32 %v312_v17, 16  ;;  %v443_v36 = vshrl.u32 %v310_v22, 16 }
  0x25   : > { %v407_v38 = vsel %vm5080_vm2, %v402_v30, %v406_v63  ;;  %v436_v39 = vrot.slane %v435_v31, 4  ;;  %v446_v40 = vshll.u32 %v310_v22, 16  ;;  %v476_v41 = vshll.u32 %v314_v28, 16 }
  0x26   : > { %528 = vrot.lane.b32.xlu1 %v417_v29, %s5012_s23  ;;  %v426_v43 = vrot.slane %v425_v33, 4  ;;  %v458_v44 = vrot.slane %v456_v34, 4  ;;  %v464_v45 = vrot.slane %v462_v35, 5  ;;  %v445_v46 = vrot.slane %v443_v36, 4  ;;  %v584_v36 = vld [vmem:[%s5069_s22 + $0x14] sm:$0x1] }
  0x27   : > { %526 = vrot.lane.b32.xlu0 %v407_v38, %s5012_s23  ;;  %v441_v48 = vsel %vm5080_vm2, %v436_v39, %v440_v24  ;;  %v448_v49 = vrot.slane %v446_v40, 5  ;;  %v478_v50 = vrot.slane %v476_v41, 5  ;;  %v480_v51 = vshrl.u32 %v314_v28, 16  ;;  %v583_v24 = vld [vmem:[%s5069_s22 + $0x10] sm:$0xf] }
  0x28   : > { %v431_v52 = vsel %vm5080_vm2, %v426_v43, %v430_v11  ;;  %v459_v53 = vor.u32 %v458_v44, %v454_v32  ;;  %v486_v54 = vshll.u32 %v315_v37, 16  ;;  %v467_v55 = vshrl.u32 %v313_v42, 16  ;;  %v579_v28 = vld [vmem:[%s5069_s22] sm:$0xe]  ;;  %v586_v37 = vld [vmem:[%s5069_s22 + $0x1c] sm:$0xf] }
  0x29   : > { %v449_v57 = vor.u32 %v448_v49, %v445_v46  ;;  %v482_v58 = vrot.slane %v480_v51, 4  ;;  %v470_v59 = vshll.u32 %v313_v42, 16  ;;  %v500_v60 = vshll.u32 %v317_v47, 16  ;;  %v582_v39 = vld [vmem:[%s5069_s22 + $0xc] sm:$0xe] }
  0x2a   : > { %532 = vrot.lane.b32.xlu1 %v441_v48, %s5012_s23  ;;  %v460_v62 = vrot.slane %v459_v53, 4  ;;  %v488_v63 = vrot.slane %v486_v54, 5  ;;  %v469_v0 = vrot.slane %v467_v55, 4  ;;  %v504_v1 = vshrl.u32 %v317_v47, 16  ;;  %v587_v46 = vld [vmem:[%s5069_s22 + $0x20] sm:$0x1] }
  0x2b   : > { %530 = vrot.lane.b32.xlu0 %v431_v52, %s5012_s23  ;;  %v450_v2 = vrot.slane %v449_v57, 4  ;;  %v483_v3 = vor.u32 %v482_v58, %v478_v50  ;;  %v472_v4 = vrot.slane %v470_v59, 5  ;;  %v502_v5 = vrot.slane %v500_v60, 5  ;;  %v589_v47 = vld [vmem:[%s5069_s22 + $0x28] sm:$0xf] }
  0x2c   : > { %v465_v6 = vsel %vm5080_vm2, %v460_v62, %v464_v45  ;;  %v506_v7 = vrot.slane %v504_v1, 4  ;;  %v510_v8 = vshll.u32 %v318_v56, 16  ;;  %v491_v9 = vshrl.u32 %v316_v61, 16  ;;  %v585_v48 = vld [vmem:[%s5069_s22 + $0x18] sm:$0xe] }
  0x2d   : > { %v455_v11 = vsel %vm5080_vm2, %v450_v2, %v454_v32  ;;  %v484_v12 = vrot.slane %v483_v3, 4  ;;  %v473_v13 = vor.u32 %v472_v4, %v469_v0  ;;  %v494_v14 = vshll.u32 %v316_v61, 16  ;;  %v590_v55 = vld [vmem:[%s5069_s22 + $0x2c] sm:$0x1]  ;;  %v592_v56 = vld [vmem:[%s5069_s22 + $0x34] sm:$0xf] }
  0x2e   : > { %536 = vrot.lane.b32.xlu1 %v465_v6, %s5012_s23  ;;  %v507_v15 = vor.u32 %v506_v7, %v502_v5  ;;  %v512_v16 = vrot.slane %v510_v8, 5  ;;  %v493_v17 = vrot.slane %v491_v9, 4  ;;  %v632_v22 = vrot.slane %v580_v10, 5  ;;  %v588_v57 = vld [vmem:[%s5069_s22 + $0x24] sm:$0xe] }
  0x2f   : > { %534 = vrot.lane.b32.xlu0 %v455_v11, %s5012_s23  ;;  %v489_v18 = vsel %vm5080_vm2, %v484_v12, %v488_v63  ;;  %v474_v19 = vrot.slane %v473_v13, 4  ;;  %v496_v20 = vrot.slane %v494_v14, 5  ;;  %v635_v29 = vrot.slane %v581_v21, 5  ;;  %v593_v0 = vld [vmem:[%s5069_s22 + $0x38] sm:$0x1] }
  0x30   : > { %v508_v23 = vrot.slane %v507_v15, 4  ;;  %v634_v32 = vrot.slane %v632_v22, 4  ;;  %v639_v33 = vrot.slane %v583_v24, 5  ;;  %v4392_v35 = vrot.slane %v579_v28, 9  ;;  %v595_v1 = vld [vmem:[%s5069_s22 + $0x40] sm:$0xf] }
  0x31   : > { %v479_v25 = vsel %vm5080_vm2, %v474_v19, %v478_v50  ;;  %v497_v26 = vor.u32 %v496_v20, %v493_v17  ;;  %v642_v42 = vrot.slane %v584_v36, 5  ;;  %v646_v43 = vrot.slane %v586_v37, 5  ;;  %v591_v2 = vld [vmem:[%s5069_s22 + $0x30] sm:$0xe]  ;;  %v596_v9 = vld [vmem:[%s5069_s22 + $0x44] sm:$0x1] }
  0x32   : > { %540 = vrot.lane.b32.xlu1 %v489_v18, %s5012_s23  ;;  %v513_v30 = vsel %vm5080_vm2, %v508_v23, %v512_v16  ;;  %v636_v40 = vsel %vm5149_vm5, %v634_v32, %v635_v29  ;;  %v641_v41 = vrot.slane %v639_v33, 4  ;;  %v633_v44 = vsel %vm5149_vm5, %v4392_v35, %v632_v22  ;;  %v598_v10 = vld [vmem:[%s5069_s22 + $0x4c] sm:$0xf]  ;;  %v594_v11 = vld [vmem:[%s5069_s22 + $0x3c] sm:$0xe] }
  0x33   : > { %538 = vrot.lane.b32.xlu0 %v479_v25, %s5012_s23  ;;  %v498_v31 = vrot.slane %v497_v26, 4  ;;  %v4393_v45 = vrot.slane %v582_v39, 9  ;;  %v648_v50 = vrot.slane %v646_v43, 4  ;;  %v649_v51 = vrot.slane %v587_v46, 5  ;;  %v599_v15 = vld [vmem:[%s5069_s22 + $0x50] sm:$0x1] }
  0x34   : > { %v643_v49 = vsel %vm5149_vm5, %v641_v41, %v642_v42  ;;  %v653_v52 = vrot.slane %v589_v47, 5  ;;  %v4394_v54 = vrot.slane %v585_v48, 9  ;;  %v656_v60 = vrot.slane %v590_v55, 5  ;;  %v601_v19 = vld [vmem:[%s5069_s22 + $0x58] sm:$0xf] }
  0x35   : > { %v503_v38 = vsel %vm5080_vm2, %v498_v31, %v502_v5  ;;  %v640_v53 = vsel %vm5149_vm5, %v4393_v45, %v639_v33  ;;  %v650_v58 = vsel %vm5149_vm5, %v648_v50, %v649_v51  ;;  %v660_v61 = vrot.slane %v592_v56, 5  ;;  %v264_v20 = vld [vmem:[%s5069_s22 + $0xc] sm:$0xf]  ;;  %v597_v21 = vld [vmem:[%s5069_s22 + $0x48] sm:$0xe] }
  0x36   : > { %544 = vrot.lane.b32.xlu1 %v513_v30, %s5012_s23  ;;  %v655_v59 = vrot.slane %v653_v52, 4  ;;  %v647_v62 = vsel %vm5149_vm5, %v4394_v54, %v646_v43  ;;  %v4395_v63 = vrot.slane %v588_v57, 9  ;;  %v663_v5 = vrot.slane %v593_v0, 5  ;;  %281 = vst.msk [vmem:[#allocation2 + $0x8] sm:$0xf] %vm278_vm6, %v264_v20 }
  0x37   : > { %542 = vrot.lane.b32.xlu0 %v503_v38, %s5012_s23  ;;  %v662_v4 = vrot.slane %v660_v61, 4  ;;  %v667_v6 = vrot.slane %v595_v1, 5  ;;  %v4396_v8 = vrot.slane %v591_v2, 9  ;;  %v670_v14 = vrot.slane %v596_v9, 5  ;;  %v262_v22 = vld [vmem:[%s5069_s22] sm:$0xf] }
  0x38   : > { %v657_v3 = vsel %vm5149_vm5, %v655_v59, %v656_v60  ;;  %v654_v7 = vsel %vm5149_vm5, %v4395_v63, %v653_v52  ;;  %v674_v16 = vrot.slane %v598_v10, 5  ;;  %v4397_v18 = vrot.slane %v594_v11, 9  ;;  %279 = vst.msk [vmem:[#allocation2] sm:$0xf] %vm278_vm6, %v262_v22  ;;  %v602_v30 = vld [vmem:[%s5069_s22 + $0x5c] sm:$0x1] }
  0x39   : > { %v664_v12 = vsel %vm5149_vm5, %v662_v4, %v663_v5  ;;  %v669_v13 = vrot.slane %v667_v6, 4  ;;  %v661_v17 = vsel %vm5149_vm5, %v4396_v8, %v660_v61  ;;  %v677_v25 = vrot.slane %v599_v15, 5  ;;  %v265_v31 = vld [vmem:[%s5069_s22 + $0x10] sm:$0xf]  ;;  %v600_v32 = vld [vmem:[%s5069_s22 + $0x54] sm:$0xe] }
  0x3a   : > { %688 = vrot.lane.b32.xlu1 %v636_v40, %s5013_s24  ;;  %v676_v24 = vrot.slane %v674_v16, 4  ;;  %v681_v26 = vrot.slane %v601_v19, 5  ;;  %v668_v28 = vsel %vm5149_vm5, %v4397_v18, %v667_v6  ;;  %v4398_v29 = vrot.slane %v597_v21, 9  ;;  %282 = vst.msk [vmem:[#allocation2 + $0xc] sm:$0xf] %vm278_vm6, %v265_v31 }
  0x3b   : > { %686 = vrot.lane.b32.xlu0 %v633_v44, %s5013_s24  ;;  %v671_v23 = vsel %vm5149_vm5, %v669_v13, %v670_v14  ;;  %v263_v33 = vld [vmem:[%s5069_s22 + $0x4] sm:$0xf]  ;;  %v684_v37 = vrot.slane %v602_v30, 5  ;;  %v4399_v39 = vrot.slane %v600_v32, 9  ;;  %v267_v40 = vld [vmem:[%s5069_s22 + $0x1c] sm:$0xf] }
  0x3c   : > { %280 = vst.msk [vmem:[#allocation2 + $0x4] sm:$0xf] %vm278_vm6, %v263_v33  ;;  %v678_v35 = vsel %vm5149_vm5, %v676_v24, %v677_v25  ;;  %v683_v36 = vrot.slane %v681_v26, 4  ;;  %v675_v38 = vsel %vm5149_vm5, %v4398_v29, %v674_v16  ;;  %284 = vst.msk [vmem:[#allocation2 + $0x14] sm:$0xf] %vm278_vm6, %v267_v40  ;;  %vm2129_vm1 = vcmask 257024  }
  0x3d   : > { %v266_v41 = vld [vmem:[%s5069_s22 + $0x18] sm:$0xf]  ;;  %v682_v43 = vsel %vm5149_vm5, %v4399_v39, %v681_v26  ;;  %v269_v44 = vld [vmem:[%s5069_s22 + $0x28] sm:$0xf]  ;;  %v268_v45 = vld [vmem:[%s5069_s22 + $0x24] sm:$0xf] }
  0x3e   : > { %692 = vrot.lane.b32.xlu1 %v643_v49, %s5013_s24  ;;  %283 = vst.msk [vmem:[#allocation2 + $0x10] sm:$0xf] %vm278_vm6, %v266_v41  ;;  %v685_v42 = vsel %vm5149_vm5, %v683_v36, %v684_v37  ;;  %286 = vst.msk [vmem:[#allocation2 + $0x1c] sm:$0xf] %vm278_vm6, %v269_v44  ;;  %v4401_v46 = vld [vmem:[%s5069_s22 + $0x10] sm:$0xf] }
  0x3f   : > { %690 = vrot.lane.b32.xlu0 %v640_v53, %s5013_s24  ;;  %285 = vst.msk [vmem:[#allocation2 + $0x18] sm:$0xf] %vm278_vm6, %v268_v45  ;;  %v4400_v47 = vld [vmem:[%s5069_s22 + $0xc] sm:$0xf]  ;;  %v271_v48 = vld [vmem:[%s5069_s22 + $0x34] sm:$0xf] }
  0x40   : > { %288 = vst.msk [vmem:[#allocation2 + $0x24] sm:$0xf] %vm278_vm6, %v271_v48  ;;  %v270_v49 = vld [vmem:[%s5069_s22 + $0x30] sm:$0xf]  ;;  %v4403_v50 = vld [vmem:[%s5069_s22 + $0x1c] sm:$0xf] }
  0x41   : > { %287 = vst.msk [vmem:[#allocation2 + $0x20] sm:$0xf] %vm278_vm6, %v270_v49  ;;  %v4402_v51 = vld [vmem:[%s5069_s22 + $0x18] sm:$0xf]  ;;  %v273_v52 = vld [vmem:[%s5069_s22 + $0x40] sm:$0xf] }
  0x42   : > { %696 = vrot.lane.b32.xlu1 %v650_v58, %s5013_s24  ;;  %290 = vst.msk [vmem:[#allocation2 + $0x2c] sm:$0xf] %vm278_vm6, %v273_v52  ;;  %v272_v53 = vld [vmem:[%s5069_s22 + $0x3c] sm:$0xf]  ;;  %v4405_v54 = vld [vmem:[%s5069_s22 + $0x28] sm:$0xf] }
  0x43   : > { %694 = vrot.lane.b32.xlu0 %v647_v62, %s5013_s24  ;;  %289 = vst.msk [vmem:[#allocation2 + $0x28] sm:$0xf] %vm278_vm6, %v272_v53  ;;  %v275_v55 = vld [vmem:[%s5069_s22 + $0x4c] sm:$0xf]  ;;  %v4404_v56 = vld [vmem:[%s5069_s22 + $0x24] sm:$0xf] }
  0x44   : > { %292 = vst.msk [vmem:[#allocation2 + $0x34] sm:$0xf] %vm278_vm6, %v275_v55  ;;  %v274_v57 = vld [vmem:[%s5069_s22 + $0x48] sm:$0xf]  ;;  %v4407_v58 = vld [vmem:[%s5069_s22 + $0x34] sm:$0xf] }
  0x45   : > { %291 = vst.msk [vmem:[#allocation2 + $0x30] sm:$0xf] %vm278_vm6, %v274_v57  ;;  %v277_v59 = vld [vmem:[%s5069_s22 + $0x58] sm:$0xf]  ;;  %v4417_v60 = vld [vmem:[%s5069_s22 + $0x10] sm:$0xf] }
  0x46   : > { %700 = vrot.lane.b32.xlu1 %v657_v3, %s5013_s24  ;;  %v4416_v61 = vld [vmem:[%s5069_s22 + $0xc] sm:$0xf]  ;;  %294 = vst.msk [vmem:[#allocation2 + $0x3c] sm:$0xf] %vm278_vm6, %v277_v59  ;;  %v276_v62 = vld [vmem:[%s5069_s22 + $0x54] sm:$0xf] }
  0x47   : > { %698 = vrot.lane.b32.xlu0 %v654_v7, %s5013_s24  ;;  %v4406_v63 = vld [vmem:[%s5069_s22 + $0x30] sm:$0xf]  ;;  %v4420_v0 = vld [vmem:[%s5069_s22 + $0x1c] sm:$0xf]  ;;  %293 = vst.msk [vmem:[#allocation2 + $0x38] sm:$0xf] %vm278_vm6, %v276_v62 }
  0x48   : > { %v883_v1 = vshll.u32 %v4417_v60, 16  ;;  %v887_v2 = vshrl.u32 %v4417_v60, 16  ;;  %v874_v3 = vshrl.u32 %v4416_v61, 16  ;;  %v877_v4 = vshll.u32 %v4416_v61, 16  ;;  %v4409_v5 = vld [vmem:[%s5069_s22 + $0x40] sm:$0xf] }
  0x49   : > { %v907_v6 = vshll.u32 %v4420_v0, 16  ;;  %v911_v7 = vshrl.u32 %v4420_v0, 16  ;;  %v4408_v8 = vld [vmem:[%s5069_s22 + $0x3c] sm:$0xf]  ;;  %v4419_v9 = vld [vmem:[%s5069_s22 + $0x18] sm:$0xf] }
  0x4a   : > { %704 = vrot.lane.b32.xlu1 %v664_v12, %s5013_s24  ;;  %v4411_v10 = vld [vmem:[%s5069_s22 + $0x4c] sm:$0xf]  ;;  %v4418_v11 = vld [vmem:[%s5069_s22 + $0x14] sm:$0x1]  ;;  %v5282_v12 = vrot.slane %v883_v1, 5  ;;  %v889_v13 = vrot.slane %v887_v2, 4 }
  0x4b   : > { %702 = vrot.lane.b32.xlu0 %v661_v17, %s5013_s24  ;;  %v876_v14 = vrot.slane %v874_v3, 4  ;;  %v879_v15 = vrot.slane %v877_v4, 5  ;;  %v4421_v16 = vld [vmem:[%s5069_s22 + $0x20] sm:$0x1]  ;;  %v5286_v17 = vrot.slane %v907_v6, 5  ;;  %v913_v18 = vrot.slane %v911_v7, 4 }
  0x4c   : > { %v898_v19 = vshrl.u32 %v4419_v9, 16  ;;  %v901_v20 = vshll.u32 %v4419_v9, 16  ;;  %v4423_v21 = vld [vmem:[%s5069_s22 + $0x28] sm:$0xf]  ;;  %v4422_v24 = vld [vmem:[%s5069_s22 + $0x24] sm:$0xf]  ;;  %v890_v26 = vor.u32 %v889_v13, %v5282_v12 }
  0x4d   : > { %v4410_v22 = vld [vmem:[%s5069_s22 + $0x48] sm:$0xf]  ;;  %v4426_v25 = vld [vmem:[%s5069_s22 + $0x34] sm:$0xf]  ;;  %v917_v29 = vshll.u32 %v4421_v16, 16  ;;  %v931_v30 = vshll.u32 %v4423_v21, 16  ;;  %v914_v33 = vor.u32 %v913_v18, %v5286_v17 }
  0x4e   : > { %708 = vrot.lane.b32.xlu1 %v671_v23, %s5013_s24  ;;  %v893_v23 = vshll.u32 %v4418_v11, 16  ;;  %v4425_v31 = vld [vmem:[%s5069_s22 + $0x30] sm:$0xf]  ;;  %v4413_v32 = vld [vmem:[%s5069_s22 + $0x58] sm:$0xf]  ;;  %v903_v36 = vrot.slane %v901_v20, 5 }
  0x4f   : > { %706 = vrot.lane.b32.xlu0 %v668_v28, %s5013_s24  ;;  %v880_v28 = vor.u32 %v879_v15, %v876_v14  ;;  %v935_v37 = vshrl.u32 %v4423_v21, 16  ;;  %v922_v39 = vshrl.u32 %v4422_v24, 16  ;;  %v925_v40 = vshll.u32 %v4422_v24, 16  ;;  %v4424_v57 = vld [vmem:[%s5069_s22 + $0x2c] sm:$0x1] }
  0x50   : > { %v955_v41 = vshll.u32 %v4426_v25, 16  ;;  %v946_v44 = vshrl.u32 %v4425_v31, 16  ;;  %v949_v45 = vshll.u32 %v4425_v31, 16  ;;  %v895_v48 = vrot.slane %v893_v23, 5  ;;  %v4427_v62 = vld [vmem:[%s5069_s22 + $0x38] sm:$0x1] }
  0x51   : > { %v919_v49 = vrot.slane %v917_v29, 5  ;;  %v881_v52 = vrot.slane %v880_v28, 4  ;;  %v915_v53 = vrot.slane %v914_v33, 4  ;;  %v937_v55 = vrot.slane %v935_v37, 4  ;;  %v4432_v9 = vld [vmem:[%s5069_s22 + $0x4c] sm:$0xf] }
  0x52   : > { %712 = vrot.lane.b32.xlu1 %v678_v35, %s5013_s24  ;;  %v900_v35 = vrot.slane %v898_v19, 4  ;;  %v927_v59 = vrot.slane %v925_v40, 5  ;;  %v5308_v60 = vrot.slane %v955_v41, 5  ;;  %v951_v0 = vrot.slane %v949_v45, 5  ;;  %v4431_v15 = vld [vmem:[%s5069_s22 + $0x48] sm:$0xf] }
  0x53   : > { %710 = vrot.lane.b32.xlu0 %v675_v38, %s5013_s24  ;;  %v4412_v38 = vld [vmem:[%s5069_s22 + $0x54] sm:$0xf]  ;;  %v886_v6 = vsel %vm5080_vm2, %v881_v52, %v5282_v12  ;;  %v965_v14 = vshll.u32 %v4427_v62, 16  ;;  %v4430_v12 = vld [vmem:[%s5069_s22 + $0x44] sm:$0x1]  ;;  %v1003_v23 = vshll.u32 %v4432_v9, 16 }
  0x54   : > { %v1007_v24 = vshrl.u32 %v4432_v9, 16  ;;  %v994_v28 = vshrl.u32 %v4431_v15, 16  ;;  %v997_v29 = vshll.u32 %v4431_v15, 16  ;;  %v4433_v41 = vld [vmem:[%s5069_s22 + $0x50] sm:$0x1]  ;;  %vm4230_vm3 = vcmask 253952  }
  0x55   : > { %v967_v33 = vrot.slane %v965_v14, 5  ;;  %v4438_v52 = vld [vmem:[%s5069_s22 + $0x64] sm:$0xf] }
  0x56   : > { %716 = vrot.lane.b32.xlu1 %v685_v42, %s5013_s24  ;;  %v959_v42 = vshrl.u32 %v4426_v25, 16  ;;  %v996_v45 = vrot.slane %v994_v28, 4 }
  0x57   : > { %714 = vrot.lane.b32.xlu0 %v682_v43, %s5013_s24  ;;  %v4415_v43 = vld [vmem:[%s5069_s22 + $0x64] sm:$0xf] }
  0x58   : > { %v961_v61 = vrot.slane %v959_v42, 4  ;;  %v5337_v42 = vrot.slane %v1003_v23, 5 }
  0x5a   : > { %786 = vrot.lane.b32.xlu1 %v4401_v46, %s5014_s25  ;;  %v4414_v46 = vld [vmem:[%s5069_s22 + $0x60] sm:$0xf]  ;;  %v962_v16 = vor.u32 %v961_v61, %v5308_v60 }
  0x5b   : > { %784 = vrot.lane.b32.xlu0 %v4400_v47, %s5014_s25  ;;  %v891_v47 = vrot.slane %v890_v26, 4 }
  0x5e   : > { %790 = vrot.lane.b32.xlu1 %v4403_v50, %s5014_s25  ;;  %v5302_v50 = vrot.slane %v931_v30, 5  ;;  %v4435_v30 = vld [vmem:[%s5069_s22 + $0x58] sm:$0xf] }
  0x5f   : > { %788 = vrot.lane.b32.xlu0 %v4402_v51, %s5014_s25  ;;  %v4429_v51 = vld [vmem:[%s5069_s22 + $0x40] sm:$0xf] }
  0x60   : > { %v979_v1 = vshll.u32 %v4429_v51, 16  ;;  %v983_v2 = vshrl.u32 %v4429_v51, 16  ;;  %v938_v7 = vor.u32 %v937_v55, %v5302_v50 }
  0x62   : > { %794 = vrot.lane.b32.xlu1 %v4405_v54, %s5014_s25  ;;  %v904_v54 = vor.u32 %v903_v36, %v900_v35  ;;  %v5324_v19 = vrot.slane %v979_v1, 5  ;;  %v985_v20 = vrot.slane %v983_v2, 4  ;;  %v939_v25 = vrot.slane %v938_v7, 4 }
  0x63   : > { %792 = vrot.lane.b32.xlu0 %v4404_v56, %s5014_s25  ;;  %v4428_v56 = vld [vmem:[%s5069_s22 + $0x3c] sm:$0xf]  ;;  %v963_v35 = vrot.slane %v962_v16, 4  ;;  %v1051_v1 = vshll.u32 %v4438_v52, 16  ;;  %v1055_v2 = vshrl.u32 %v4438_v52, 16 }
  0x64   : > { %v970_v3 = vshrl.u32 %v4428_v56, 16  ;;  %v973_v4 = vshll.u32 %v4428_v56, 16  ;;  %v905_v11 = vrot.slane %v904_v54, 4  ;;  %v986_v37 = vor.u32 %v985_v20, %v5324_v19  ;;  %v4447_v52 = vld [vmem:[%s5069_s22 + $0x28] sm:$0xf] }
  0x65   : > { %v1013_v56 = vshll.u32 %v4433_v41, 16  ;;  %v1057_v14 = vrot.slane %v1055_v2, 4  ;;  %v4444_v41 = vld [vmem:[%s5069_s22 + $0x1c] sm:$0xf] }
  0x66   : > { %798 = vrot.lane.b32.xlu1 %v4407_v58, %s5014_s25  ;;  %v924_v58 = vrot.slane %v922_v39, 4  ;;  %v972_v21 = vrot.slane %v970_v3, 4  ;;  %v910_v31 = vsel %vm5080_vm2, %v905_v11, %v5286_v17  ;;  %v4434_v39 = vld [vmem:[%s5069_s22 + $0x54] sm:$0xf] }
  0x67   : > { %796 = vrot.lane.b32.xlu0 %v4406_v63, %s5014_s25  ;;  %v948_v63 = vrot.slane %v946_v44, 4  ;;  %v1027_v44 = vshll.u32 %v4435_v30, 16  ;;  %v1021_v51 = vshll.u32 %v4434_v39, 16 }
  0x68   : > { %v928_v13 = vor.u32 %v927_v59, %v924_v58  ;;  %v987_v58 = vrot.slane %v986_v37, 4 }
  0x69   : > { %v952_v18 = vor.u32 %v951_v0, %v948_v63  ;;  %v1029_v61 = vrot.slane %v1027_v44, 5  ;;  %v4436_v63 = vld [vmem:[%s5069_s22 + $0x5c] sm:$0x1] }
  0x6a   : > { %802 = vrot.lane.b32.xlu1 %v4409_v5, %s5014_s25  ;;  %v896_v5 = vsel %vm5080_vm2, %v891_v47, %v895_v48  ;;  %v1031_v47 = vshrl.u32 %v4435_v30, 16  ;;  %v1037_v9 = vshll.u32 %v4436_v63, 16  ;;  %v4441_v30 = vld [vmem:[%s5069_s22 + $0x10] sm:$0xf]  ;;  %v4450_v63 = vld [vmem:[%s5069_s22 + $0x34] sm:$0xf] }
  0x6b   : > { %800 = vrot.lane.b32.xlu0 %v4408_v8, %s5014_s25  ;;  %v941_v8 = vshll.u32 %v4424_v57, 16  ;;  %v953_v36 = vrot.slane %v952_v18, 4  ;;  %v4437_v57 = vld [vmem:[%s5069_s22 + $0x60] sm:$0xf]  ;;  %v4439_v18 = vld [vmem:[%s5069_s22 + $0x68] sm:$0x1] }
  0x6c   : > { %v1033_v0 = vrot.slane %v1031_v47, 4 }
  0x6d   : > { %v943_v26 = vrot.slane %v941_v8, 5  ;;  %v958_v54 = vsel %vm5080_vm2, %v953_v36, %v5308_v60  ;;  %v1023_v60 = vrot.slane %v1021_v51, 5  ;;  %v1015_v8 = vrot.slane %v1013_v56, 5  ;;  %v4445_v51 = vld [vmem:[%s5069_s22 + $0x20] sm:$0x1] }
  0x6e   : > { %806 = vrot.lane.b32.xlu1 %v4411_v10, %s5014_s25  ;;  %v920_v10 = vsel %vm5080_vm2, %v915_v53, %v919_v49  ;;  %v1018_v49 = vshrl.u32 %v4434_v39, 16  ;;  %v968_v53 = vsel %vm5080_vm2, %v963_v35, %v967_v33  ;;  %v1034_v11 = vor.u32 %v1033_v0, %v1029_v61 }
  0x6f   : > { %804 = vrot.lane.b32.xlu0 %v4410_v22, %s5014_s25  ;;  %v975_v22 = vrot.slane %v973_v4, 5  ;;  %v944_v17 = vsel %vm5080_vm2, %v939_v25, %v943_v26  ;;  %v1042_v4 = vshrl.u32 %v4437_v57, 16  ;;  %v1180_v36 = vrot.slane %v4441_v30, 5 }
  0x70   : > { %v1020_v3 = vrot.slane %v1018_v49, 4 }
  0x71   : > { %v976_v40 = vor.u32 %v975_v22, %v972_v21  ;;  %v1044_v20 = vrot.slane %v1042_v4, 4  ;;  %v1039_v21 = vrot.slane %v1037_v9, 5  ;;  %v1035_v22 = vrot.slane %v1034_v11, 4  ;;  %v4453_v9 = vld [vmem:[%s5069_s22 + $0x40] sm:$0xf] }
  0x72   : > { %810 = vrot.lane.b32.xlu1 %v4413_v32, %s5014_s25  ;;  %v929_v32 = vrot.slane %v928_v13, 4  ;;  %v1053_v13 = vrot.slane %v1051_v1, 5  ;;  %v1024_v16 = vor.u32 %v1023_v60, %v1020_v3  ;;  %v4446_v1 = vld [vmem:[%s5069_s22 + $0x24] sm:$0xe]  ;;  %v1201_v4 = vrot.slane %v4450_v63, 5 }
  0x73   : > { %808 = vrot.lane.b32.xlu0 %v4412_v38, %s5014_s25  ;;  %v989_v38 = vshll.u32 %v4430_v12, 16  ;;  %v977_v59 = vrot.slane %v976_v40, 4  ;;  %v4442_v40 = vld [vmem:[%s5069_s22 + $0x14] sm:$0x1]  ;;  %v4449_v11 = vld [vmem:[%s5069_s22 + $0x30] sm:$0xe] }
  0x74   : > { %v934_v48 = vsel %vm5080_vm2, %v929_v32, %v5302_v50  ;;  %v1058_v23 = vor.u32 %v1057_v14, %v1053_v13  ;;  %v1025_v28 = vrot.slane %v1024_v16, 4  ;;  %v1040_v32 = vsel %vm5080_vm2, %v1035_v22, %v1039_v21  ;;  %v4454_v21 = vld [vmem:[%s5069_s22 + $0x44] sm:$0x1] }
  0x75   : > { %v991_v55 = vrot.slane %v989_v38, 5  ;;  %v982_v7 = vsel %vm5080_vm2, %v977_v59, %v5324_v19  ;;  %v1203_v14 = vrot.slane %v1201_v4, 4  ;;  %v1208_v16 = vrot.slane %v4453_v9, 5  ;;  %v4475_v9 = vld [vmem:[%s5069_s22 + $0x28] sm:$0xf] }
  0x76   : > { %814 = vrot.lane.b32.xlu1 %v4415_v43, %s5014_s25  ;;  %v1009_v43 = vrot.slane %v1007_v24, 4  ;;  %v1061_v24 = vshll.u32 %v4439_v18, 16  ;;  %v1059_v33 = vrot.slane %v1058_v23, 4  ;;  %v1030_v38 = vsel %vm5080_vm2, %v1025_v28, %v1029_v61  ;;  %v4452_v23 = vld [vmem:[%s5069_s22 + $0x3c] sm:$0xe] }
  0x77   : > { %812 = vrot.lane.b32.xlu0 %v4414_v46, %s5014_s25  ;;  %v999_v46 = vrot.slane %v997_v29, 5 }
  0x78   : > { %v1010_v50 = vor.u32 %v1009_v43, %v5337_v42  ;;  %v1063_v35 = vrot.slane %v1061_v24, 5  ;;  %v4440_v43 = vld [vmem:[%s5069_s22 + $0xc] sm:$0xe] }
  0x79   : > { %v1000_v62 = vor.u32 %v999_v46, %v996_v45  ;;  %v1183_v45 = vrot.slane %v4442_v40, 5  ;;  %v1187_v46 = vrot.slane %v4444_v41, 5  ;;  %v4464_v49 = vrot.slane %v4440_v43, 9 }
  0x7a   : > { %1067 = vrot.lane.b32.xlu1 %v896_v5, %s5015_s26  ;;  %v1045_v5 = vshll.u32 %v4437_v57, 16  ;;  %v1064_v44 = vsel %vm5080_vm2, %v1059_v33, %v1063_v35  ;;  %v1190_v57 = vrot.slane %v4445_v51, 5  ;;  %v4459_v33 = vld [vmem:[%s5069_s22 + $0x58] sm:$0xf] }
  0x7b   : > { %1065 = vrot.lane.b32.xlu0 %v886_v6, %s5015_s26  ;;  %v992_v6 = vsel %vm5080_vm2, %v987_v58, %v991_v55  ;;  %v1001_v15 = vrot.slane %v1000_v62, 4  ;;  %v1189_v56 = vrot.slane %v1187_v46, 4  ;;  %v1194_v58 = vrot.slane %v4447_v52, 5  ;;  %v4448_v62 = vld [vmem:[%s5069_s22 + $0x2c] sm:$0x1] }
  0x7c   : > { %v1047_v12 = vrot.slane %v1045_v5, 5  ;;  %v1197_v60 = vrot.slane %v4448_v62, 5  ;;  %v1222_v40 = vrot.slane %v4459_v33, 5 }
  0x7d   : > { %v1006_v26 = vsel %vm5080_vm2, %v1001_v15, %v5337_v42  ;;  %v1191_v2 = vsel %vm5149_vm5, %v1189_v56, %v1190_v57  ;;  %v1196_v3 = vrot.slane %v1194_v58, 4  ;;  %v4461_v57 = vld [vmem:[%s5069_s22 + $0x60] sm:$0xe] }
  0x7e   : > { %1071 = vrot.lane.b32.xlu1 %v920_v10, %s5015_s26  ;;  %v1011_v10 = vrot.slane %v1010_v50, 4  ;;  %v1048_v29 = vor.u32 %v1047_v12, %v1044_v20  ;;  %v1181_v50 = vsel %vm5149_vm5, %v4464_v49, %v1180_v36  ;;  %v4467_v12 = vrot.slane %v4449_v11, 9 }
  0x7f   : > { %1069 = vrot.lane.b32.xlu0 %v910_v31, %s5015_s26  ;;  %v4471_v63 = vrot.slane %v4461_v57, 9  ;;  %v4600_v57 = vld [vmem:[%s5069_s22 + $0x74] sm:$0x1] }
  0x80   : > { %v1016_v19 = vsel %vm5080_vm2, %v1011_v10, %v1015_v8  ;;  %v1049_v39 = vrot.slane %v1048_v29, 4  ;;  %v4451_v8 = vld [vmem:[%s5069_s22 + $0x38] sm:$0x1]  ;;  %v1202_v30 = vsel %vm5149_vm5, %v4467_v12, %v1201_v4  ;;  %v4473_v4 = vld [vmem:[%s5069_s22 + $0x1c] sm:$0xf] }
  0x81   : > { %v1204_v15 = vrot.slane %v4451_v8, 5 }
  0x82   : > { %1075 = vrot.lane.b32.xlu1 %v944_v17, %s5015_s26  ;;  %v1182_v17 = vrot.slane %v1180_v36, 4  ;;  %v4455_v36 = vld [vmem:[%s5069_s22 + $0x48] sm:$0xe] }
  0x83   : > { %1073 = vrot.lane.b32.xlu0 %v934_v48, %s5015_s26  ;;  %v1054_v48 = vsel %vm5080_vm2, %v1049_v39, %v1053_v13  ;;  %v1198_v13 = vsel %vm5149_vm5, %v1196_v3, %v1197_v60  ;;  %v1205_v24 = vsel %vm5149_vm5, %v1203_v14, %v1204_v15  ;;  %v4469_v43 = vrot.slane %v4455_v36, 9  ;;  %v4474_v14 = vld [vmem:[%s5069_s22 + $0x24] sm:$0xf]  ;;  %v4598_v15 = vld [vmem:[%s5069_s22 + $0x6c] sm:$0xf] }
  0x84   : > { %v1184_v55 = vsel %vm5149_vm5, %v1182_v17, %v1183_v45  ;;  %v4462_v17 = vld [vmem:[%s5069_s22 + $0x64] sm:$0xf] }
  0x85   : > { %v1229_v51 = vrot.slane %v4462_v17, 5  ;;  %v4597_v17 = vld [vmem:[%s5069_s22 + $0x68] sm:$0x1] }
  0x86   : > { %1079 = vrot.lane.b32.xlu1 %v968_v53, %s5015_s26 }
  0x87   : > { %1077 = vrot.lane.b32.xlu0 %v958_v54, %s5015_s26  ;;  %v4443_v54 = vld [vmem:[%s5069_s22 + $0x18] sm:$0xe]  ;;  %v1230_v3 = vsel %vm5149_vm5, %v4471_v63, %v1229_v51 }
  0x88   : > { %v4465_v61 = vrot.slane %v4443_v54, 9 }
  0x8a   : > { %1083 = vrot.lane.b32.xlu1 %v992_v6, %s5015_s26  ;;  %v1188_v6 = vsel %vm5149_vm5, %v4465_v61, %v1187_v46  ;;  %v4458_v46 = vld [vmem:[%s5069_s22 + $0x54] sm:$0xe] }
  0x8b   : > { %1081 = vrot.lane.b32.xlu0 %v982_v7, %s5015_s26  ;;  %v4466_v7 = vrot.slane %v4446_v1, 9  ;;  %v4470_v54 = vrot.slane %v4458_v46, 9  ;;  %v4480_v46 = vld [vmem:[%s5069_s22 + $0x48] sm:$0xf] }
  0x8c   : > { %v519_v25 = vpop.permute.xlu1 %518 }
  0x8d   : > { %565 = vst.msk [vmem:[#allocation2 + $0x8] sm:$0xf] %vm562_vm7, %v519_v25  ;;  %v515_v31 = vpop.permute.xlu0 %514  ;;  %v1195_v20 = vsel %vm5149_vm5, %v4466_v7, %v1194_v58  ;;  %v1210_v25 = vrot.slane %v1208_v16, 4  ;;  %v1223_v62 = vsel %vm5149_vm5, %v4470_v54, %v1222_v40  ;;  %v4595_v7 = vld [vmem:[%s5069_s22 + $0x60] sm:$0xf] }
  0x8e   : > { %563 = vst.msk [vmem:[#allocation2] sm:$0xf] %vm562_vm7, %v515_v31  ;;  %1087 = vrot.lane.b32.xlu1 %v1016_v19, %s5015_s26  ;;  %v4456_v19 = vld [vmem:[%s5069_s22 + $0x4c] sm:$0xf]  ;;  %v4468_v31 = vrot.slane %v4452_v23, 9  ;;  %v2316_v11 = vshll.u32 %v4595_v7, 16 }
  0x8f   : > { %1085 = vrot.lane.b32.xlu0 %v1006_v26, %s5015_s26  ;;  %v1211_v26 = vrot.slane %v4454_v21, 5  ;;  %v1215_v28 = vrot.slane %v4456_v19, 5  ;;  %v2337_v19 = vshrl.u32 %v4598_v15, 16  ;;  %v4579_v23 = vld [vmem:[%s5069_s22 + $0x60] sm:$0xf] }
  0x90   : > { %v521_v37 = vpop.permute.xlu1 %520  ;;  %v2318_v21 = vrot.slane %v2316_v11, 5  ;;  %2272 = vst.msk [vmem:[#allocation2 + $0x40] sm:$0xf] %vm278_vm6, %v4579_v23 }
  0x91   : > { %566 = vst.msk [vmem:[#allocation2 + $0xc] sm:$0xf] %vm562_vm7, %v521_v37  ;;  %v517_v42 = vpop.permute.xlu0 %516  ;;  %v1212_v37 = vsel %vm5149_vm5, %v1210_v25, %v1211_v26  ;;  %v4476_v25 = vld [vmem:[%s5069_s22 + $0x30] sm:$0xf] }
  0x92   : > { %564 = vst.msk [vmem:[#allocation2 + $0x4] sm:$0xf] %vm562_vm7, %v517_v42  ;;  %1091 = vrot.lane.b32.xlu1 %v1040_v32, %s5015_s26  ;;  %v4457_v32 = vld [vmem:[%s5069_s22 + $0x50] sm:$0x1]  ;;  %v1209_v42 = vsel %vm5149_vm5, %v4468_v31, %v1208_v16  ;;  %v4479_v31 = vld [vmem:[%s5069_s22 + $0x40] sm:$0xf] }
  0x93   : > { %1089 = vrot.lane.b32.xlu0 %v1030_v38, %s5015_s26  ;;  %v1217_v38 = vrot.slane %v1215_v28, 4  ;;  %v1218_v39 = vrot.slane %v4457_v32, 5  ;;  %v4478_v32 = vld [vmem:[%s5069_s22 + $0x3c] sm:$0xf] }
  0x94   : > { %v525_v47 = vpop.permute.xlu1 %524 }
  0x95   : > { %568 = vst.msk [vmem:[#allocation2 + $0x14] sm:$0xf] %vm562_vm7, %v525_v47  ;;  %v523_v53 = vpop.permute.xlu0 %522  ;;  %v1219_v47 = vsel %vm5149_vm5, %v1217_v38, %v1218_v39 }
  0x96   : > { %567 = vst.msk [vmem:[#allocation2 + $0x10] sm:$0xf] %vm562_vm7, %v523_v53  ;;  %1095 = vrot.lane.b32.xlu1 %v1064_v44, %s5015_s26  ;;  %v4460_v44 = vld [vmem:[%s5069_s22 + $0x5c] sm:$0x1]  ;;  %v1216_v53 = vsel %vm5149_vm5, %v4469_v43, %v1215_v28  ;;  %v4580_v43 = vld [vmem:[%s5069_s22 + $0x64] sm:$0xf] }
  0x97   : > { %1093 = vrot.lane.b32.xlu0 %v1054_v48, %s5015_s26  ;;  %v1224_v48 = vrot.slane %v1222_v40, 4  ;;  %v1225_v49 = vrot.slane %v4460_v44, 5  ;;  %2273 = vst.msk [vmem:[#allocation2 + $0x44] sm:$0xf] %vm278_vm6, %v4580_v43 }
  0x98   : > { %v529_v59 = vpop.permute.xlu1 %528 }
  0x99   : > { %570 = vst.msk [vmem:[#allocation2 + $0x1c] sm:$0xf] %vm562_vm7, %v529_v59  ;;  %v527_v0 = vpop.permute.xlu0 %526  ;;  %v1226_v58 = vsel %vm5149_vm5, %v1224_v48, %v1225_v49  ;;  %v1231_v59 = vrot.slane %v1229_v51, 4 }
  0x9a   : > { %569 = vst.msk [vmem:[#allocation2 + $0x18] sm:$0xf] %vm562_vm7, %v527_v0  ;;  %1236 = vrot.lane.b32.xlu1 %v1184_v55, %s5016_s27  ;;  %v4463_v55 = vld [vmem:[%s5069_s22 + $0x68] sm:$0x1] }
  0x9b   : > { %1234 = vrot.lane.b32.xlu0 %v1181_v50, %s5016_s27  ;;  %v1232_v50 = vrot.slane %v4463_v55, 5  ;;  %v4582_v55 = vld [vmem:[%s5069_s22 + $0x70] sm:$0xf] }
  0x9c   : > { %v533_v5 = vpop.permute.xlu1 %532  ;;  %2275 = vst.msk [vmem:[#allocation2 + $0x4c] sm:$0xf] %vm278_vm6, %v4582_v55 }
  0x9d   : > { %572 = vst.msk [vmem:[#allocation2 + $0x24] sm:$0xf] %vm562_vm7, %v533_v5  ;;  %v531_v10 = vpop.permute.xlu0 %530  ;;  %v1233_v1 = vsel %vm5149_vm5, %v1231_v59, %v1232_v50  ;;  %v4482_v59 = vld [vmem:[%s5069_s22 + $0x54] sm:$0xf] }
  0x9e   : > { %571 = vst.msk [vmem:[#allocation2 + $0x20] sm:$0xf] %vm562_vm7, %v531_v10  ;;  %1240 = vrot.lane.b32.xlu1 %v1191_v2, %s5016_s27  ;;  %v2313_v10 = vshrl.u32 %v4595_v7, 16  ;;  %v4622_v7 = vld [vmem:[%s5069_s22 + $0x6c] sm:$0xe] }
  0x9f   : > { %1238 = vrot.lane.b32.xlu0 %v1188_v6, %s5016_s27  ;;  %v4472_v6 = vld [vmem:[%s5069_s22 + $0x18] sm:$0xf] }
  0xa0   : > { %v537_v18 = vpop.permute.xlu1 %536  ;;  %v2315_v12 = vrot.slane %v2313_v10, 4 }
  0xa1   : > { %574 = vst.msk [vmem:[#allocation2 + $0x2c] sm:$0xf] %vm562_vm7, %v537_v18  ;;  %v535_v22 = vpop.permute.xlu0 %534  ;;  %v4596_v18 = vld [vmem:[%s5069_s22 + $0x64] sm:$0xf] }
  0xa2   : > { %573 = vst.msk [vmem:[#allocation2 + $0x28] sm:$0xf] %vm562_vm7, %v535_v22  ;;  %1244 = vrot.lane.b32.xlu1 %v1198_v13, %s5016_s27  ;;  %v2340_v22 = vshll.u32 %v4598_v15, 16  ;;  %v2322_v26 = vshll.u32 %v4596_v18, 16  ;;  %v2326_v28 = vshrl.u32 %v4596_v18, 16  ;;  %v2319_v33 = vor.u32 %v2318_v21, %v2315_v12 }
  0xa3   : > { %1242 = vrot.lane.b32.xlu0 %v1195_v20, %s5016_s27  ;;  %v4477_v20 = vld [vmem:[%s5069_s22 + $0x34] sm:$0xf]  ;;  %v4644_v18 = vrot.slane %v4622_v7, 9  ;;  %v4692_v7 = vld [vmem:[%s5069_s22 + $0x70] sm:$0xf] }
  0xa4   : > { %v541_v29 = vpop.permute.xlu1 %540  ;;  %v2342_v36 = vrot.slane %v2340_v22, 5  ;;  %v2324_v39 = vrot.slane %v2322_v26, 5  ;;  %v4624_v21 = vld [vmem:[%s5069_s22 + $0x74] sm:$0x1] }
  0xa5   : > { %576 = vst.msk [vmem:[#allocation2 + $0x34] sm:$0xf] %vm562_vm7, %v541_v29  ;;  %v539_v35 = vpop.permute.xlu0 %538 }
  0xa6   : > { %575 = vst.msk [vmem:[#allocation2 + $0x30] sm:$0xf] %vm562_vm7, %v539_v35  ;;  %1248 = vrot.lane.b32.xlu1 %v1205_v24, %s5016_s27  ;;  %v2339_v35 = vrot.slane %v2337_v19, 4 }
  0xa7   : > { %1246 = vrot.lane.b32.xlu0 %v1202_v30, %s5016_s27  ;;  %v4599_v30 = vld [vmem:[%s5069_s22 + $0x70] sm:$0xf] }
  0xa8   : > { %v545_v41 = vpop.permute.xlu1 %544  ;;  %v2346_v40 = vshll.u32 %v4599_v30, 16  ;;  %v2343_v48 = vor.u32 %v2342_v36, %v2339_v35 }
  0xa9   : > { %578 = vst.msk [vmem:[#allocation2 + $0x3c] sm:$0xf] %vm562_vm7, %v545_v41  ;;  %v543_v45 = vpop.permute.xlu0 %542  ;;  %v2350_v41 = vshrl.u32 %v4599_v30, 16  ;;  %v4668_v30 = vld [vmem:[%s5069_s22 + $0x70] sm:$0xf] }
  0xaa   : > { %577 = vst.msk [vmem:[#allocation2 + $0x38] sm:$0xf] %vm562_vm7, %v543_v45  ;;  %1252 = vrot.lane.b32.xlu1 %v1212_v37, %s5016_s27  ;;  %v4581_v37 = vld [vmem:[%s5069_s22 + $0x6c] sm:$0xf]  ;;  %v2348_v51 = vrot.slane %v2346_v40, 5  ;;  %v2344_v50 = vrot.slane %v2343_v48, 4 }
  0xab   : > { %1250 = vrot.lane.b32.xlu0 %v1209_v42, %s5016_s27  ;;  %v2328_v42 = vrot.slane %v2326_v28, 4  ;;  %2274 = vst.msk [vmem:[#allocation2 + $0x48] sm:$0xf] %vm278_vm6, %v4581_v37  ;;  %v4481_v45 = vld [vmem:[%s5069_s22 + $0x4c] sm:$0xf]  ;;  %v2352_v54 = vrot.slane %v2350_v41, 4 }
  0xac   : > { %v689_v52 = vpop.permute.xlu1 %688  ;;  %v4670_v28 = vld [vmem:[%s5069_s22 + $0x78] sm:$0xf]  ;;  %v2867_v41 = vshll.u32 %v4668_v30, 16 }
  0xad   : > { %736 = vst.msk [vmem:[#allocation2 + $0x4] sm:$0xf] %vm734_vm8, %v689_v52  ;;  %v687_v56 = vpop.permute.xlu0 %686  ;;  %v2329_v52 = vor.u32 %v2328_v42, %v2324_v39  ;;  %v2882_v37 = vshrl.u32 %v4670_v28, 16  ;;  %v2871_v42 = vshrl.u32 %v4668_v30, 16  ;;  %v4489_v30 = vld [vmem:[%s5069_s22 + $0x1c] sm:$0xf] }
  0xae   : > { %735 = vst.msk [vmem:[#allocation2] sm:$0xf] %vm734_vm8, %v687_v56  ;;  %1256 = vrot.lane.b32.xlu1 %v1219_v47, %s5016_s27  ;;  %v2320_v47 = vrot.slane %v2319_v33, 4  ;;  %v2628_v33 = vrot.slane %v4624_v21, 5 }
  0xaf   : > { %1254 = vrot.lane.b32.xlu0 %v1216_v53, %s5016_s27  ;;  %v2332_v53 = vshll.u32 %v4597_v17, 16  ;;  %v2330_v63 = vrot.slane %v2329_v52, 4  ;;  %v4651_v17 = vld [vmem:[%s5069_s22 + $0x6c] sm:$0xf] }
  0xb0   : > { %v693_v61 = vpop.permute.xlu1 %692 }
  0xb1   : > { %738 = vst.msk [vmem:[#allocation2 + $0xc] sm:$0xf] %vm734_vm8, %v693_v61  ;;  %v691_v0 = vpop.permute.xlu0 %690  ;;  %v4619_v61 = vld [vmem:[%s5069_s22 + $0x60] sm:$0xe] }
  0xb2   : > { %737 = vst.msk [vmem:[#allocation2 + $0x8] sm:$0xf] %vm734_vm8, %v691_v0  ;;  %1260 = vrot.lane.b32.xlu1 %v1226_v58, %s5016_s27  ;;  %v2325_v58 = vsel %vm5080_vm2, %v2320_v47, %v2324_v39  ;;  %v2334_v0 = vrot.slane %v2332_v53, 5  ;;  %v2884_v47 = vrot.slane %v2882_v37, 4 }
  0xb3   : > { %1258 = vrot.lane.b32.xlu0 %v1223_v62, %s5016_s27 }
  0xb4   : > { %v697_v2 = vpop.permute.xlu1 %696  ;;  %v2335_v10 = vsel %vm5080_vm2, %v2330_v63, %v2334_v0 }
  0xb5   : > { %740 = vst.msk [vmem:[#allocation2 + $0x14] sm:$0xf] %vm734_vm8, %v697_v2  ;;  %v695_v60 = vpop.permute.xlu0 %694  ;;  %v2353_v2 = vor.u32 %v2352_v54, %v2348_v51  ;;  %v2873_v54 = vrot.slane %v2871_v42, 4  ;;  %v1431_v42 = vshll.u32 %v4489_v30, 16 }
  0xb6   : > { %739 = vst.msk [vmem:[#allocation2 + $0x10] sm:$0xf] %vm734_vm8, %v695_v60  ;;  %1264 = vrot.lane.b32.xlu1 %v1233_v1, %s5016_s27  ;;  %v4620_v1 = vld [vmem:[%s5069_s22 + $0x64] sm:$0xf] }
  0xb7   : > { %1262 = vrot.lane.b32.xlu0 %v1230_v3, %s5016_s27  ;;  %v2356_v3 = vshll.u32 %v4600_v57, 16  ;;  %v2354_v11 = vrot.slane %v2353_v2, 4  ;;  %v4653_v57 = vld [vmem:[%s5069_s22 + $0x78] sm:$0xf] }
  0xb8   : > { %v701_v5 = vpop.permute.xlu1 %700 }
  0xb9   : > { %742 = vst.msk [vmem:[#allocation2 + $0x1c] sm:$0xf] %vm734_vm8, %v701_v5  ;;  %v699_v8 = vpop.permute.xlu0 %698  ;;  %v4643_v5 = vrot.slane %v4619_v61, 9  ;;  %v4652_v61 = vld [vmem:[%s5069_s22 + $0x70] sm:$0xf] }
  0xba   : > { %741 = vst.msk [vmem:[#allocation2 + $0x18] sm:$0xf] %vm734_vm8, %v699_v8  ;;  %1334 = vrot.lane.b32.xlu1 %v4473_v4, %s5017_s28  ;;  %v2349_v4 = vsel %vm5080_vm2, %v2344_v50, %v2348_v51  ;;  %v4623_v8 = vld [vmem:[%s5069_s22 + $0x70] sm:$0xf]  ;;  %v2869_v51 = vrot.slane %v2867_v41, 5 }
  0xbb   : > { %1332 = vrot.lane.b32.xlu0 %v4472_v6, %s5017_s28  ;;  %v2618_v6 = vrot.slane %v4620_v1, 5 }
  0xbc   : > { %v705_v13 = vpop.permute.xlu1 %704  ;;  %v2874_v63 = vor.u32 %v2873_v54, %v2869_v51 }
  0xbd   : > { %744 = vst.msk [vmem:[#allocation2 + $0x24] sm:$0xf] %vm734_vm8, %v705_v13  ;;  %v703_v16 = vpop.permute.xlu0 %702  ;;  %v2358_v13 = vrot.slane %v2356_v3, 5  ;;  %v2619_v12 = vsel %vm5149_vm5, %v4643_v5, %v2618_v6  ;;  %v4672_v3 = vld [vmem:[%s5069_s22 + $0x80] sm:$0x1] }
  0xbe   : > { %743 = vst.msk [vmem:[#allocation2 + $0x20] sm:$0xf] %vm734_vm8, %v703_v16  ;;  %1338 = vrot.lane.b32.xlu1 %v4475_v9, %s5017_s28  ;;  %v4621_v16 = vld [vmem:[%s5069_s22 + $0x68] sm:$0x1] }
  0xbf   : > { %1336 = vrot.lane.b32.xlu0 %v4474_v14, %s5017_s28  ;;  %v4667_v14 = vld [vmem:[%s5069_s22 + $0x6c] sm:$0xf]  ;;  %v2621_v26 = vrot.slane %v4621_v16, 5 }
  0xc0   : > { %v709_v24 = vpop.permute.xlu1 %708  ;;  %v2858_v19 = vshrl.u32 %v4667_v14, 16  ;;  %v2861_v22 = vshll.u32 %v4667_v14, 16  ;;  %v4488_v14 = vld [vmem:[%s5069_s22 + $0x18] sm:$0xf] }
  0xc1   : > { %746 = vst.msk [vmem:[#allocation2 + $0x2c] sm:$0xf] %vm734_vm8, %v709_v24  ;;  %v707_v29 = vpop.permute.xlu0 %706  ;;  %v2359_v24 = vsel %vm5080_vm2, %v2354_v11, %v2358_v13  ;;  %v2901_v13 = vshll.u32 %v4672_v3, 16  ;;  %v1422_v21 = vshrl.u32 %v4488_v14, 16 }
  0xc2   : > { %745 = vst.msk [vmem:[#allocation2 + $0x28] sm:$0xf] %vm734_vm8, %v707_v29  ;;  %1342 = vrot.lane.b32.xlu1 %v4477_v20, %s5017_s28  ;;  %v2625_v20 = vrot.slane %v4623_v8, 5  ;;  %v2860_v35 = vrot.slane %v2858_v19, 4  ;;  %v2863_v36 = vrot.slane %v2861_v22, 5  ;;  %v1425_v19 = vshll.u32 %v4488_v14, 16 }
  0xc3   : > { %1340 = vrot.lane.b32.xlu0 %v4476_v25, %s5017_s28  ;;  %v2620_v25 = vrot.slane %v2618_v6, 4  ;;  %v4691_v6 = vld [vmem:[%s5069_s22 + $0x6c] sm:$0xe] }
  0xc4   : > { %v713_v38 = vpop.permute.xlu1 %712  ;;  %v4715_v16 = vrot.slane %v4691_v6, 9  ;;  %v1427_v37 = vrot.slane %v1425_v19, 5 }
  0xc5   : > { %748 = vst.msk [vmem:[#allocation2 + $0x34] sm:$0xf] %vm734_vm8, %v713_v38  ;;  %v711_v44 = vpop.permute.xlu0 %710  ;;  %v2885_v38 = vshll.u32 %v4670_v28, 16  ;;  %v2622_v40 = vsel %vm5149_vm5, %v2620_v25, %v2621_v26  ;;  %v2903_v25 = vrot.slane %v2901_v13, 5  ;;  %v4695_v26 = vld [vmem:[%s5069_s22 + $0x7c] sm:$0xf] }
  0xc6   : > { %747 = vst.msk [vmem:[#allocation2 + $0x30] sm:$0xf] %vm734_vm8, %v711_v44  ;;  %1346 = vrot.lane.b32.xlu1 %v4479_v31, %s5017_s28  ;;  %v2626_v31 = vsel %vm5149_vm5, %v4644_v18, %v2625_v20  ;;  %v4671_v44 = vld [vmem:[%s5069_s22 + $0x7c] sm:$0xf]  ;;  %v3163_v18 = vrot.slane %v4692_v7, 5 }
  0xc7   : > { %1344 = vrot.lane.b32.xlu0 %v4478_v32, %s5017_s28  ;;  %v2627_v32 = vrot.slane %v2625_v20, 4  ;;  %v2887_v48 = vrot.slane %v2885_v38, 5  ;;  %v2891_v52 = vshll.u32 %v4671_v44, 16  ;;  %v2895_v53 = vshrl.u32 %v4671_v44, 16  ;;  %v4739_v38 = vld [vmem:[%s5069_s22 + $0x78] sm:$0xf] }
  0xc8   : > { %v717_v49 = vpop.permute.xlu1 %716 }
  0xc9   : > { %750 = vst.msk [vmem:[#allocation2 + $0x3c] sm:$0xf] %vm734_vm8, %v717_v49  ;;  %v715_v56 = vpop.permute.xlu0 %714  ;;  %v2897_v1 = vrot.slane %v2895_v53, 4 }
  0xca   : > { %749 = vst.msk [vmem:[#allocation2 + $0x38] sm:$0xf] %vm734_vm8, %v715_v56  ;;  %1350 = vrot.lane.b32.xlu1 %v4481_v45, %s5017_s28  ;;  %v2629_v45 = vsel %vm5149_vm5, %v2627_v32, %v2628_v33  ;;  %v4669_v56 = vld [vmem:[%s5069_s22 + $0x74] sm:$0x1]  ;;  %v3170_v33 = vrot.slane %v4695_v26, 5 }
  0xcb   : > { %1348 = vrot.lane.b32.xlu0 %v4480_v46, %s5017_s28  ;;  %v2864_v46 = vor.u32 %v2863_v36, %v2860_v35  ;;  %v2877_v0 = vshll.u32 %v4669_v56, 16  ;;  %v3165_v35 = vrot.slane %v3163_v18, 4  ;;  %v1424_v36 = vrot.slane %v1422_v21, 4 }
  0xcc   : > { %v787_v62 = vpop.permute.xlu1 %786 }
  0xcd   : > { %834 = vst.msk [vmem:[#allocation2 + $0x4] sm:$0xf] %vm832_vm9, %v787_v62  ;;  %v785_v60 = vpop.permute.xlu0 %784  ;;  %v2893_v62 = vrot.slane %v2891_v52, 5 }
  0xce   : > { %833 = vst.msk [vmem:[#allocation2] sm:$0xf] %vm832_vm9, %v785_v60  ;;  %2504 = vrot.lane.b32.xlu1 %v2325_v58, %s5012_s23  ;;  %v2865_v58 = vrot.slane %v2864_v46, 4  ;;  %v4654_v60 = vld [vmem:[%s5069_s22 + $0x7c] sm:$0xf]  ;;  %v3406_v46 = vshll.u32 %v4739_v38, 16 }
  0xcf   : > { %1352 = vrot.lane.b32.xlu0 %v4482_v59, %s5017_s28  ;;  %v2888_v59 = vor.u32 %v2887_v48, %v2884_v47  ;;  %v2898_v11 = vor.u32 %v2897_v1, %v2893_v62  ;;  %v3172_v48 = vrot.slane %v3170_v33, 4 }
  0xd0   : > { %v791_v9 = vpop.permute.xlu1 %790 }
  0xd1   : > { %836 = vst.msk [vmem:[#allocation2 + $0xc] sm:$0xf] %vm832_vm9, %v791_v9  ;;  %v789_v15 = vpop.permute.xlu0 %788  ;;  %v2889_v5 = vrot.slane %v2888_v59, 4  ;;  %v2875_v9 = vrot.slane %v2874_v63, 4  ;;  %v4490_v59 = vld [vmem:[%s5069_s22 + $0x20] sm:$0x1] }
  0xd2   : > { %835 = vst.msk [vmem:[#allocation2 + $0x8] sm:$0xf] %vm832_vm9, %v789_v15  ;;  %2508 = vrot.lane.b32.xlu1 %v2349_v4, %s5012_s23  ;;  %v2870_v4 = vsel %vm5080_vm2, %v2865_v58, %v2869_v51  ;;  %v4740_v51 = vld [vmem:[%s5069_s22 + $0x7c] sm:$0xf]  ;;  %v4723_v63 = vld [vmem:[%s5069_s22 + $0x78] sm:$0xf] }
  0xd3   : > { %2506 = vrot.lane.b32.xlu0 %v2335_v10, %s5012_s23  ;;  %v2879_v10 = vrot.slane %v2877_v0, 5  ;;  %v2894_v20 = vsel %vm5080_vm2, %v2889_v5, %v2893_v62  ;;  %v3412_v62 = vshll.u32 %v4740_v51, 16  ;;  %v3416_v1 = vshrl.u32 %v4740_v51, 16 }
  0xd4   : > { %v795_v23 = vpop.permute.xlu1 %794  ;;  %v1441_v6 = vshll.u32 %v4490_v59, 16 }
  0xd5   : > { %838 = vst.msk [vmem:[#allocation2 + $0x14] sm:$0xf] %vm832_vm9, %v795_v23  ;;  %v793_v29 = vpop.permute.xlu0 %792  ;;  %v2880_v23 = vsel %vm5080_vm2, %v2875_v9, %v2879_v10  ;;  %v4724_v9 = vld [vmem:[%s5069_s22 + $0x7c] sm:$0xf] }
  0xd6   : > { %837 = vst.msk [vmem:[#allocation2 + $0x10] sm:$0xf] %vm832_vm9, %v793_v29  ;;  %2672 = vrot.lane.b32.xlu1 %v2619_v12, %s5013_s24  ;;  %v4694_v12 = vld [vmem:[%s5069_s22 + $0x78] sm:$0xe]  ;;  %v4693_v29 = vld [vmem:[%s5069_s22 + $0x74] sm:$0x1] }
  0xd7   : > { %2510 = vrot.lane.b32.xlu0 %v2359_v24, %s5012_s23  ;;  %v2899_v24 = vrot.slane %v2898_v11, 4  ;;  %v4716_v32 = vrot.slane %v4694_v12, 9  ;;  %v3166_v41 = vrot.slane %v4693_v29, 5  ;;  %v3414_v11 = vrot.slane %v3412_v62, 5 }
  0xd8   : > { %v799_v39 = vpop.permute.xlu1 %798  ;;  %v1443_v21 = vrot.slane %v1441_v6, 5 }
  0xd9   : > { %840 = vst.msk [vmem:[#allocation2 + $0x1c] sm:$0xf] %vm832_vm9, %v799_v39  ;;  %v797_v43 = vpop.permute.xlu0 %796  ;;  %v3171_v47 = vsel %vm5149_vm5, %v4716_v32, %v3170_v33  ;;  %v3167_v53 = vsel %vm5149_vm5, %v3165_v35, %v3166_v41 }
  0xda   : > { %839 = vst.msk [vmem:[#allocation2 + $0x18] sm:$0xf] %vm832_vm9, %v797_v43  ;;  %2676 = vrot.lane.b32.xlu1 %v2626_v31, %s5013_s24  ;;  %v3164_v31 = vsel %vm5149_vm5, %v4715_v16, %v3163_v18  ;;  %v1435_v43 = vshrl.u32 %v4489_v30, 16  ;;  %v4741_v16 = vld [vmem:[%s5069_s22 + $0x80] sm:$0x1]  ;;  %v3418_v18 = vrot.slane %v3416_v1, 4 }
  0xdb   : > { %2674 = vrot.lane.b32.xlu0 %v2622_v40, %s5013_s24  ;;  %v2904_v40 = vsel %vm5080_vm2, %v2899_v24, %v2903_v25  ;;  %v3422_v26 = vshll.u32 %v4741_v16, 16 }
  0xdc   : > { %v803_v49 = vpop.permute.xlu1 %802  ;;  %v1437_v56 = vrot.slane %v1435_v43, 4  ;;  %v3419_v30 = vor.u32 %v3418_v18, %v3414_v11 }
  0xdd   : > { %842 = vst.msk [vmem:[#allocation2 + $0x24] sm:$0xf] %vm832_vm9, %v803_v49  ;;  %v801_v55 = vpop.permute.xlu0 %800  ;;  %v1428_v49 = vor.u32 %v1427_v37, %v1424_v36  ;;  %v3424_v43 = vrot.slane %v3422_v26, 5  ;;  %v4765_v26 = vld [vmem:[%s5069_s22 + $0x80] sm:$0x1] }
  0xde   : > { %841 = vst.msk [vmem:[#allocation2 + $0x20] sm:$0xf] %vm832_vm9, %v801_v55  ;;  %2769 = vrot.lane.b32.xlu1 %v4651_v17, %s5014_s25  ;;  %v4696_v17 = vld [vmem:[%s5069_s22 + $0x80] sm:$0x1]  ;;  %v1433_v55 = vrot.slane %v1431_v42, 5 }
  0xdf   : > { %2678 = vrot.lane.b32.xlu0 %v2629_v45, %s5013_s24  ;;  %v3403_v45 = vshrl.u32 %v4739_v38, 16  ;;  %v3173_v54 = vrot.slane %v4696_v17, 5  ;;  %v1429_v0 = vrot.slane %v1428_v49, 4  ;;  %v4726_v42 = vld [vmem:[%s5069_s22 + $0x88] sm:$0xf]  ;;  %v3420_v17 = vrot.slane %v3419_v30, 4 }
  0xe0   : > { %v807_v50 = vpop.permute.xlu1 %806  ;;  %v1438_v5 = vor.u32 %v1437_v56, %v1433_v55  ;;  %v4513_v49 = vld [vmem:[%s5069_s22 + $0x1c] sm:$0xf] }
  0xe1   : > { %844 = vst.msk [vmem:[#allocation2 + $0x2c] sm:$0xf] %vm832_vm9, %v807_v50  ;;  %v805_v2 = vpop.permute.xlu0 %804  ;;  %v3405_v50 = vrot.slane %v3403_v45, 4  ;;  %v1434_v13 = vsel %vm5080_vm2, %v1429_v0, %v1433_v55  ;;  %v4512_v45 = vld [vmem:[%s5069_s22 + $0x18] sm:$0xe]  ;;  %v1728_v59 = vrot.slane %v4513_v49, 5 }
  0xe2   : > { %843 = vst.msk [vmem:[#allocation2 + $0x28] sm:$0xf] %vm832_vm9, %v805_v2  ;;  %2773 = vrot.lane.b32.xlu1 %v4653_v57, %s5014_s25  ;;  %v4491_v57 = vld [vmem:[%s5069_s22 + $0x24] sm:$0xf]  ;;  %v1439_v12 = vrot.slane %v1438_v5, 4  ;;  %v4536_v56 = vrot.slane %v4512_v45, 9 }
  0xe3   : > { %2771 = vrot.lane.b32.xlu0 %v4652_v61, %s5014_s25  ;;  %v3408_v61 = vrot.slane %v3406_v46, 5  ;;  %v1446_v2 = vshrl.u32 %v4491_v57, 16  ;;  %v1449_v3 = vshll.u32 %v4491_v57, 16  ;;  %v1730_v5 = vrot.slane %v1728_v59, 4 }
  0xe4   : > { %v811_v8 = vpop.permute.xlu1 %810  ;;  %v1444_v35 = vsel %vm5080_vm2, %v1439_v12, %v1443_v21  ;;  %v4515_v12 = vld [vmem:[%s5069_s22 + $0x24] sm:$0xe]  ;;  %v4516_v21 = vld [vmem:[%s5069_s22 + $0x28] sm:$0xf] }
  0xe5   : > { %846 = vst.msk [vmem:[#allocation2 + $0x34] sm:$0xf] %vm832_vm9, %v811_v8  ;;  %v809_v15 = vpop.permute.xlu0 %808  ;;  %v4492_v8 = vld [vmem:[%s5069_s22 + $0x28] sm:$0xf]  ;;  %v3409_v10 = vor.u32 %v3408_v61, %v3405_v50  ;;  %v1448_v14 = vrot.slane %v1446_v2, 4 }
  0xe6   : > { %845 = vst.msk [vmem:[#allocation2 + $0x30] sm:$0xf] %vm832_vm9, %v809_v15  ;;  %3049 = vrot.lane.b32.xlu1 %v2870_v4, %s5015_s26  ;;  %v3174_v4 = vsel %vm5149_vm5, %v3172_v48, %v3173_v54  ;;  %v1451_v15 = vrot.slane %v1449_v3, 5  ;;  %v1455_v19 = vshll.u32 %v4492_v8, 16  ;;  %v4514_v61 = vld [vmem:[%s5069_s22 + $0x20] sm:$0x1] }
  0xe7   : > { %2775 = vrot.lane.b32.xlu0 %v4654_v60, %s5014_s25  ;;  %v3410_v25 = vrot.slane %v3409_v10, 4  ;;  %v4601_v3 = vld [vmem:[%s5069_s22 + $0x78] sm:$0xf]  ;;  %v1731_v6 = vrot.slane %v4514_v61, 5  ;;  %v4764_v10 = vld [vmem:[%s5069_s22 + $0x7c] sm:$0xf] }
  0xe8   : > { %v815_v22 = vpop.permute.xlu1 %814  ;;  %v1452_v29 = vor.u32 %v1451_v15, %v1448_v14  ;;  %v1457_v36 = vrot.slane %v1455_v19, 5  ;;  %v4602_v19 = vld [vmem:[%s5069_s22 + $0x7c] sm:$0xf] }
  0xe9   : > { %848 = vst.msk [vmem:[#allocation2 + $0x3c] sm:$0xf] %vm832_vm9, %v815_v22  ;;  %v813_v28 = vpop.permute.xlu0 %812  ;;  %v1459_v22 = vshrl.u32 %v4492_v8, 16  ;;  %v3415_v41 = vsel %vm5080_vm2, %v3410_v25, %v3414_v11  ;;  %v1729_v8 = vsel %vm5149_vm5, %v4536_v56, %v1728_v59  ;;  %v2361_v11 = vshrl.u32 %v4601_v3, 16  ;;  %v4584_v56 = vld [vmem:[%s5069_s22 + $0x7c] sm:$0xf] }
  0xea   : > { %847 = vst.msk [vmem:[#allocation2 + $0x38] sm:$0xf] %vm832_vm9, %v813_v28  ;;  %3053 = vrot.lane.b32.xlu1 %v2894_v20, %s5015_s26  ;;  %v4725_v28 = vld [vmem:[%s5069_s22 + $0x84] sm:$0xf]  ;;  %v3708_v25 = vrot.slane %v4764_v10, 5 }
  0xeb   : > { %3051 = vrot.lane.b32.xlu0 %v2880_v23, %s5015_s26  ;;  %v4742_v23 = vld [vmem:[%s5069_s22 + $0x84] sm:$0xf]  ;;  %v1461_v37 = vrot.slane %v1459_v22, 4  ;;  %v4966_v22 = vld [vmem:[%s6676_s1 + $0x10] ss:$0 sps:$4 sm:$0x33]  }
  0xec   : > { %v1068_v39 = vpop.permute.xlu1 %1067  ;;  %v3430_v32 = vshll.u32 %v4742_v23, 16  ;;  %4931 = vmatprep.subr.msk.bf16.mxu0 %vm1948_vm12, %v4966_v22  ;;  %2277 = vst.msk [vmem:[#allocation2 + $0x54] sm:$0xf] %vm278_vm6, %v4584_v56  ;;  %v4969_v59 = vld [vmem:[%s6676_s1] sm:$0xff]  }
  0xed   : > { %1115 = vst.msk [vmem:[#allocation2 + $0x4] sm:$0xf] %vm1113_vm10, %v1068_v39  ;;  %v1066_v44 = vpop.permute.xlu0 %1065  ;;  %v4493_v39 = vld [vmem:[%s5069_s22 + $0x2c] sm:$0x1]  ;;  %v1462_v51 = vor.u32 %v1461_v37, %v1457_v36  ;;  %v2370_v37 = vshll.u32 %v4602_v19, 16 }
  0xee   : > { %1114 = vst.msk [vmem:[#allocation2] sm:$0xf] %vm1113_vm10, %v1066_v44  ;;  %3217 = vrot.lane.b32.xlu1 %v3164_v31, %s5016_s27  ;;  %v3427_v31 = vshrl.u32 %v4742_v23, 16  ;;  %v1453_v44 = vrot.slane %v1452_v29, 4  ;;  %v1732_v23 = vsel %vm5149_vm5, %v1730_v5, %v1731_v6  ;;  %v2363_v29 = vrot.slane %v2361_v11, 4 }
  0xef   : > { %3055 = vrot.lane.b32.xlu0 %v2904_v40, %s5015_s26  ;;  %v4743_v40 = vld [vmem:[%s5069_s22 + $0x88] sm:$0xf]  ;;  %v4585_v5 = vld [vmem:[%s5069_s22 + $0x84] sm:$0xf] }
  0xf0   : > { %v1072_v52 = vpop.permute.xlu1 %1071  ;;  %v3429_v46 = vrot.slane %v3427_v31, 4  ;;  %v3440_v54 = vshrl.u32 %v4743_v40, 16  ;;  %v1458_v57 = vsel %vm5080_vm2, %v1453_v44, %v1457_v36  ;;  %v1950_v31 = vsel %vm1948_vm12, %v4966_v22, 0  ;;  %2278 = vst.msk [vmem:[#allocation2 + $0x58] sm:$0xf] %vm278_vm6, %v4585_v5 }
  0xf1   : > { %1117 = vst.msk [vmem:[#allocation2 + $0xc] sm:$0xf] %vm1113_vm10, %v1072_v52  ;;  %v1070_v58 = vpop.permute.xlu0 %1069  ;;  %v1465_v52 = vshll.u32 %v4493_v39, 16  ;;  %v4604_v39 = vld [vmem:[%s5069_s22 + $0x84] sm:$0xf]  ;;  %4888 = vmatpush3.bf16.msra.mxu0 %v1950_v31  ;;  %v3710_v44 = vrot.slane %v3708_v25, 4 }
  0xf2   : > { %1116 = vst.msk [vmem:[#allocation2 + $0x8] sm:$0xf] %vm1113_vm10, %v1070_v58  ;;  %3221 = vrot.lane.b32.xlu1 %v3171_v47, %s5016_s27  ;;  %v3432_v47 = vrot.slane %v3430_v32, 5  ;;  %v3425_v58 = vsel %vm5080_vm2, %v3420_v17, %v3424_v43  ;;  %v3442_v2 = vrot.slane %v3440_v54, 4  ;;  %v4583_v32 = vld [vmem:[%s5069_s22 + $0x78] sm:$0xf] }
  0xf3   : > { %3219 = vrot.lane.b32.xlu0 %v3167_v53, %s5016_s27  ;;  %v3436_v53 = vshll.u32 %v4743_v40, 16  ;;  %v1467_v0 = vrot.slane %v1465_v52, 5  ;;  %2276 = vst.msk [vmem:[#allocation2 + $0x50] sm:$0xf] %vm278_vm6, %v4583_v32  ;;  %v1735_v43 = vrot.slane %v4516_v21, 5  ;;  %v3711_v17 = vrot.slane %v4765_v26, 5 }
  0xf4   : > { %v1076_v60 = vpop.permute.xlu1 %1075  ;;  %v3433_v50 = vor.u32 %v3432_v47, %v3429_v46  ;;  %v4517_v47 = vld [vmem:[%s5069_s22 + $0x2c] sm:$0x1]  ;;  %v2388_v49 = vshll.u32 %v4604_v39, 16  ;;  %v4603_v54 = vld [vmem:[%s5069_s22 + $0x80] sm:$0x1] }
  0xf5   : > { %1119 = vst.msk [vmem:[#allocation2 + $0x14] sm:$0xf] %vm1113_vm10, %v1076_v60  ;;  %v1074_v7 = vpop.permute.xlu0 %1073  ;;  %v3438_v1 = vrot.slane %v3436_v53, 5  ;;  %v2372_v53 = vrot.slane %v2370_v37, 5 }
  0xf6   : > { %1118 = vst.msk [vmem:[#allocation2 + $0x10] sm:$0xf] %vm1113_vm10, %v1074_v7  ;;  %3314 = vrot.lane.b32.xlu1 %v4723_v63, %s5017_s28  ;;  %v1463_v63 = vrot.slane %v1462_v51, 4  ;;  %v4763_v7 = vld [vmem:[%s5069_s22 + $0x78] sm:$0xe] }
  0xf7   : > { %3223 = vrot.lane.b32.xlu0 %v3174_v4, %s5016_s27  ;;  %v4744_v4 = vld [vmem:[%s5069_s22 + $0x8c] sm:$0x1]  ;;  %v3443_v16 = vor.u32 %v3442_v2, %v3438_v1 }
  0xf8   : > { %v1080_v20 = vpop.permute.xlu1 %1079  ;;  %v1468_v15 = vsel %vm5080_vm2, %v1463_v63, %v1467_v0  ;;  %v3446_v18 = vshll.u32 %v4744_v4, 16  ;;  %v1737_v63 = vrot.slane %v1735_v43, 4  ;;  %v1738_v0 = vrot.slane %v4517_v47, 5 }
  0xf9   : > { %1121 = vst.msk [vmem:[#allocation2 + $0x1c] sm:$0xf] %vm1113_vm10, %v1080_v20  ;;  %v1078_v24 = vpop.permute.xlu0 %1077 }
  0xfa   : > { %1120 = vst.msk [vmem:[#allocation2 + $0x18] sm:$0xf] %vm1113_vm10, %v1078_v24  ;;  %1613 = vrot.lane.b32.xlu1 %v1434_v13, %s5018_s29  ;;  %v2364_v13 = vshll.u32 %v4601_v3, 16  ;;  %v4787_v24 = vrot.slane %v4763_v7, 9  ;;  %v3448_v36 = vrot.slane %v3446_v18, 5  ;;  %v1739_v18 = vsel %vm5149_vm5, %v1737_v63, %v1738_v0 }
  0xfb   : > { %3316 = vrot.lane.b32.xlu0 %v4724_v9, %s5017_s28  ;;  %v3434_v9 = vrot.slane %v3433_v50, 4  ;;  %v4970_v50 = vld [vmem:[%s6676_s1 + $0x10] ss:$0 sps:$4 sm:$0x33]   ;;  %v4767_v7 = vld [vmem:[%s5069_s22 + $0x88] sm:$0xf] }
  0xfc   : > { %v1084_v33 = vpop.permute.xlu1 %1083  ;;  %v2366_v30 = vrot.slane %v2364_v13, 5  ;;  %v3709_v45 = vsel %vm5149_vm5, %v4787_v24, %v3708_v25  ;;  %v3927_v4 = vsel %vm1948_vm12, %v4970_v50, 0  ;;  %4932 = vmatprep.subr.msk.bf16.mxu1 %vm1948_vm12, %v4970_v50  ;;  %v4586_v25 = vld [vmem:[%s5069_s22 + $0x88] sm:$0xf] }
  0xfd   : > { %1123 = vst.msk [vmem:[#allocation2 + $0x24] sm:$0xf] %vm1113_vm10, %v1084_v33  ;;  %v1082_v38 = vpop.permute.xlu0 %1081  ;;  %4910 = vmatpush3.bf16.msra.mxu1 %v3927_v4 }
  0xfe   : > { %1122 = vst.msk [vmem:[#allocation2 + $0x20] sm:$0xf] %vm1113_vm10, %v1082_v38  ;;  %3318 = vrot.lane.b32.xlu1 %v4725_v28, %s5017_s28  ;;  %v3439_v28 = vsel %vm5080_vm2, %v3434_v9, %v3438_v1  ;;  %v2374_v38 = vshrl.u32 %v4602_v19, 16  ;;  %v2367_v46 = vor.u32 %v2366_v30, %v2363_v29  ;;  %v4766_v1 = vld [vmem:[%s5069_s22 + $0x84] sm:$0xe]  ;;  %v2380_v9 = vshll.u32 %v4603_v54, 16 }
  0xff   : > { %1615 = vrot.lane.b32.xlu0 %v1444_v35, %s5018_s29  ;;  %v3444_v35 = vrot.slane %v3443_v16, 4  ;;  %v4606_v29 = vld [vmem:[%s5069_s22 + $0x8c] sm:$0x1]  ;;  %2279 = vst.msk [vmem:[#allocation2 + $0x5c] sm:$0xf] %vm278_vm6, %v4586_v25  ;;  %v4974_v30 = vld [vmem:[%s6676_s1] sm:$0xff]  }
 0x100   : > { %v1088_v48 = vpop.permute.xlu1 %1087  ;;  %v2368_v2 = vrot.slane %v2367_v46, 4  ;;  %v2382_v22 = vrot.slane %v2380_v9, 5  ;;  %v4629_v46 = vld [vmem:[%s5069_s22 + $0x88] sm:$0xf]  ;;  %v4627_v54 = vld [vmem:[%s5069_s22 + $0x80] sm:$0x1] }
 0x101   : > { %1125 = vst.msk [vmem:[#allocation2 + $0x2c] sm:$0xf] %vm1113_vm10, %v1088_v48  ;;  %v1086_v55 = vpop.permute.xlu0 %1085  ;;  %v2385_v48 = vshrl.u32 %v4604_v39, 16  ;;  %v3449_v52 = vsel %vm5080_vm2, %v3444_v35, %v3448_v36  ;;  %v4626_v39 = vld [vmem:[%s5069_s22 + $0x7c] sm:$0xf]  ;;  %v2639_v56 = vrot.slane %v4629_v46, 5 }
 0x102   : > { %1124 = vst.msk [vmem:[#allocation2 + $0x28] sm:$0xf] %vm1113_vm10, %v1086_v55  ;;  %3594 = vrot.lane.b32.xlu1 %v3415_v41, %s5018_s29  ;;  %v4968_v41 = vld [vmem:[%s6676_s1 + $0x8] sm:$0xff]   ;;  %v2376_v55 = vrot.slane %v2374_v38, 4  ;;  %v2373_v16 = vsel %vm5080_vm2, %v2368_v2, %v2372_v53  ;;  %v4625_v38 = vld [vmem:[%s5069_s22 + $0x78] sm:$0xe] }
 0x103   : > { %3320 = vrot.lane.b32.xlu0 %v4726_v42, %s5017_s28  ;;  %v4537_v42 = vrot.slane %v4515_v12, 9  ;;  %4889 = vmatprep.subr.bf16.mxu0 %v4968_v41  ;;  %v2387_v3 = vrot.slane %v2385_v48, 4  ;;  %v2635_v0 = vrot.slane %v4627_v54, 5  ;;  %v2641_v4 = vrot.slane %v2639_v56, 4 }
 0x104   : > { %v1092_v62 = vpop.permute.xlu1 %1091  ;;  %4890 = vmatpush3.bf16.msra.mxu0 %v4968_v41  ;;  %v2404_v41 = vshll.u32 %v4606_v29, 16  ;;  %v4675_v29 = vld [vmem:[%s5069_s22 + $0x8c] sm:$0x1] }
 0x105   : > { %1127 = vst.msk [vmem:[#allocation2 + $0x34] sm:$0xf] %vm1113_vm10, %v1092_v62  ;;  %v1090_v60 = vpop.permute.xlu0 %1089  ;;  %v1736_v61 = vsel %vm5149_vm5, %v4537_v42, %v1735_v43  ;;  %v3712_v62 = vsel %vm5149_vm5, %v3710_v44, %v3711_v17  ;;  %4891 = vmatprep.subr.bf16.mxu0 %v4969_v59  ;;  %v4645_v44 = vrot.slane %v4625_v38, 9  ;;  %v2632_v17 = vrot.slane %v4626_v39, 5 }
 0x106   : > { %1126 = vst.msk [vmem:[#allocation2 + $0x30] sm:$0xf] %vm1113_vm10, %v1090_v60  ;;  %1617 = vrot.lane.b32.xlu1 %v1458_v57, %s5018_s29  ;;  %v2390_v60 = vrot.slane %v2388_v49, 5  ;;  %v2925_v38 = vshll.u32 %v4675_v29, 16 }
 0x107   : > { %3596 = vrot.lane.b32.xlu0 %v3425_v58, %s5018_s29  ;;  %v4605_v58 = vld [vmem:[%s5069_s22 + $0x88] sm:$0xf]  ;;  %v2634_v63 = vrot.slane %v2632_v17, 4 }
 0x108   : > { %v1096_v14 = vpop.permute.xlu1 %1095  ;;  %v2394_v10 = vshll.u32 %v4605_v58, 16  ;;  %v2398_v11 = vshrl.u32 %v4605_v58, 16  ;;  %4892 = vmatpush3.bf16.msra.mxu0 %v4969_v59  ;;  %v2391_v12 = vor.u32 %v2390_v60, %v2387_v3  ;;  %v4630_v58 = vld [vmem:[%s5069_s22 + $0x8c] sm:$0x1]  ;;  %v4674_v3 = vld [vmem:[%s5069_s22 + $0x88] sm:$0xf] }
 0x109   : > { %1129 = vst.msk [vmem:[#allocation2 + $0x3c] sm:$0xf] %vm1113_vm10, %v1096_v14  ;;  %v1094_v20 = vpop.permute.xlu0 %1093  ;;  %v4973_v14 = vld [vmem:[%s6676_s1 + $0x8] sm:$0xff]   ;;  %v2642_v5 = vrot.slane %v4630_v58, 5  ;;  %v4701_v58 = vld [vmem:[%s5069_s22 + $0x94] sm:$0xf] }
 0x10a   : > { %1128 = vst.msk [vmem:[#allocation2 + $0x38] sm:$0xf] %vm1113_vm10, %v1094_v20  ;;  %1782 = vrot.lane.b32.xlu1 %v1729_v8, %s5019_s6  ;;  %v2377_v8 = vor.u32 %v2376_v55, %v2372_v53  ;;  %v3715_v20 = vrot.slane %v4767_v7, 5  ;;  %4911 = vmatprep.subr.bf16.mxu1 %v4973_v14  ;;  %v2400_v24 = vrot.slane %v2398_v11, 4  ;;  %v2392_v32 = vrot.slane %v2391_v12, 4 }
 0x10b   : > { %1619 = vrot.lane.b32.xlu0 %v1468_v15, %s5018_s29  ;;  %v4788_v15 = vrot.slane %v4766_v1, 9  ;;  %4912 = vmatpush3.bf16.msra.mxu1 %v4973_v14  ;;  %v4676_v1 = vld [vmem:[%s5069_s22 + $0x90] sm:$0xf]  ;;  %v2636_v11 = vsel %vm5149_vm5, %v2634_v63, %v2635_v0  ;;  %v2919_v14 = vshrl.u32 %v4674_v3, 16 }
 0x10c   : > { %v1237_v33 = vpop.permute.xlu1 %1236  ;;  %v2378_v19 = vrot.slane %v2377_v8, 4  ;;  %4913 = vmatprep.subr.bf16.mxu1 %v4974_v30  ;;  %v2930_v8 = vshrl.u32 %v4676_v1, 16  ;;  %v2933_v9 = vshll.u32 %v4676_v1, 16  ;;  %v4699_v1 = vld [vmem:[%s5069_s22 + $0x8c] sm:$0x1] }
 0x10d   : > { %1284 = vst.msk [vmem:[#allocation2 + $0x4] sm:$0xf] %vm1282_vm11, %v1237_v33  ;;  %v1235_v40 = vpop.permute.xlu0 %1234  ;;  %v3716_v31 = vsel %vm5149_vm5, %v4788_v15, %v3715_v20  ;;  %v3717_v33 = vrot.slane %v3715_v20, 4  ;;  %v2643_v20 = vsel %vm5149_vm5, %v2641_v4, %v2642_v5  ;;  %v3184_v5 = vrot.slane %v4701_v58, 5 }
 0x10e   : > { %1283 = vst.msk [vmem:[#allocation2] sm:$0xf] %vm1282_vm11, %v1235_v40  ;;  %3598 = vrot.lane.b32.xlu1 %v3439_v28, %s5018_s29  ;;  %v4768_v28 = vld [vmem:[%s5069_s22 + $0x8c] sm:$0x1]  ;;  %v2383_v36 = vsel %vm5080_vm2, %v2378_v19, %v2382_v22  ;;  %v2935_v19 = vrot.slane %v2933_v9, 5 }
 0x10f   : > { %1784 = vrot.lane.b32.xlu0 %v1732_v23, %s5019_s6  ;;  %v2396_v23 = vrot.slane %v2394_v10, 5  ;;  %v3718_v37 = vrot.slane %v4768_v28, 5  ;;  %4914 = vmatpush3.bf16.msra.mxu1 %v4974_v30  ;;  %v4657_v30 = vld [vmem:[%s5069_s22 + $0x90] sm:$0xf] }
 0x110   : > { %v1241_v51 = vpop.permute.xlu1 %1240 }
 0x111   : > { %1286 = vst.msk [vmem:[#allocation2 + $0xc] sm:$0xf] %vm1282_vm11, %v1241_v51  ;;  %v1239_v57 = vpop.permute.xlu0 %1238  ;;  %v2401_v40 = vor.u32 %v2400_v24, %v2396_v23  ;;  %v2397_v43 = vsel %vm5080_vm2, %v2392_v32, %v2396_v23  ;;  %v3719_v48 = vsel %vm5149_vm5, %v3717_v33, %v3718_v37  ;;  %v2406_v51 = vrot.slane %v2404_v41, 5  ;;  %v4678_v41 = vld [vmem:[%s5069_s22 + $0x98] sm:$0x1] }
 0x112   : > { %1285 = vst.msk [vmem:[#allocation2 + $0x8] sm:$0xf] %vm1282_vm11, %v1239_v57  ;;  %3762 = vrot.lane.b32.xlu1 %v3709_v45, %s5019_s6  ;;  %v4628_v45 = vld [vmem:[%s5069_s22 + $0x84] sm:$0xe]  ;;  %v2633_v57 = vsel %vm5149_vm5, %v4645_v44, %v2632_v17 }
 0x113   : > { %3600 = vrot.lane.b32.xlu0 %v3449_v52, %s5018_s29  ;;  %v2402_v49 = vrot.slane %v2401_v40, 4  ;;  %v4673_v52 = vld [vmem:[%s5069_s22 + $0x84] sm:$0xf]  ;;  %v4646_v55 = vrot.slane %v4628_v45, 9  ;;  %v4698_v45 = vld [vmem:[%s5069_s22 + $0x88] sm:$0xf] }
 0x114   : > { %v1245_v6 = vpop.permute.xlu1 %1244  ;;  %v2906_v59 = vshrl.u32 %v4673_v52, 16  ;;  %v2909_v50 = vshll.u32 %v4673_v52, 16  ;;  %v4697_v17 = vld [vmem:[%s5069_s22 + $0x84] sm:$0xe]  ;;  %v4494_v52 = vld [vmem:[%s5069_s22 + $0x30] sm:$0xf] }
 0x115   : > { %1288 = vst.msk [vmem:[#allocation2 + $0x14] sm:$0xf] %vm1282_vm11, %v1245_v6  ;;  %v1243_v13 = vpop.permute.xlu0 %1242  ;;  %v2640_v60 = vsel %vm5149_vm5, %v4646_v55, %v2639_v56  ;;  %v4717_v54 = vrot.slane %v4697_v17, 9  ;;  %v3177_v55 = vrot.slane %v4698_v45, 5 }
 0x116   : > { %1287 = vst.msk [vmem:[#allocation2 + $0x10] sm:$0xf] %vm1282_vm11, %v1243_v13  ;;  %1786 = vrot.lane.b32.xlu1 %v1736_v61, %s5019_s6  ;;  %v2908_v6 = vrot.slane %v2906_v59, 4  ;;  %v2911_v7 = vrot.slane %v2909_v50, 5  ;;  %v2915_v13 = vshll.u32 %v4674_v3, 16  ;;  %v1470_v59 = vshrl.u32 %v4494_v52, 16 }
 0x117   : > { %3764 = vrot.lane.b32.xlu0 %v3712_v62, %s5019_s6  ;;  %v2407_v62 = vsel %vm5080_vm2, %v2402_v49, %v2406_v51  ;;  %v2949_v51 = vshll.u32 %v4678_v41, 16  ;;  %v1473_v50 = vshll.u32 %v4494_v52, 16  ;;  %v4495_v3 = vld [vmem:[%s5069_s22 + $0x34] sm:$0xf] }
 0x118   : > { %v1249_v21 = vpop.permute.xlu1 %1248  ;;  %v2912_v12 = vor.u32 %v2911_v7, %v2908_v6  ;;  %v2917_v23 = vrot.slane %v2915_v13, 5  ;;  %v3179_v6 = vrot.slane %v3177_v55, 4  ;;  %v3180_v7 = vrot.slane %v4699_v1, 5  ;;  %v4728_v52 = vld [vmem:[%s5069_s22 + $0x94] sm:$0xf] }
 0x119   : > { %1290 = vst.msk [vmem:[#allocation2 + $0x1c] sm:$0xf] %vm1282_vm11, %v1249_v21  ;;  %v1247_v26 = vpop.permute.xlu0 %1246  ;;  %v2932_v21 = vrot.slane %v2930_v8, 4  ;;  %v2951_v0 = vrot.slane %v2949_v51, 5  ;;  %v1472_v8 = vrot.slane %v1470_v59, 4  ;;  %v1475_v9 = vrot.slane %v1473_v50, 5 }
 0x11a   : > { %1289 = vst.msk [vmem:[#allocation2 + $0x18] sm:$0xf] %vm1282_vm11, %v1247_v26  ;;  %2512 = vrot.lane.b32.xlu1 %v2373_v16, %s5012_s23  ;;  %v4677_v16 = vld [vmem:[%s5069_s22 + $0x94] sm:$0xf]  ;;  %v2921_v26 = vrot.slane %v2919_v14, 4  ;;  %v1479_v14 = vshll.u32 %v4495_v3, 16 }
 0x11b   : > { %1788 = vrot.lane.b32.xlu0 %v1739_v18, %s5019_s6  ;;  %v4655_v18 = vld [vmem:[%s5069_s22 + $0x84] sm:$0xf]  ;;  %v2939_v24 = vshll.u32 %v4677_v16, 16  ;;  %v2943_v25 = vshrl.u32 %v4677_v16, 16  ;;  %v2936_v32 = vor.u32 %v2935_v19, %v2932_v21  ;;  %v3181_v19 = vsel %vm5149_vm5, %v3179_v6, %v3180_v7 }
 0x11c   : > { %v1253_v35 = vpop.permute.xlu1 %1252  ;;  %v2922_v37 = vor.u32 %v2921_v26, %v2917_v23 }
 0x11d   : > { %1292 = vst.msk [vmem:[#allocation2 + $0x24] sm:$0xf] %vm1282_vm11, %v1253_v35  ;;  %v1251_v42 = vpop.permute.xlu0 %1250  ;;  %v4656_v35 = vld [vmem:[%s5069_s22 + $0x88] sm:$0xf]  ;;  %v2945_v39 = vrot.slane %v2943_v25, 4  ;;  %v2937_v44 = vrot.slane %v2936_v32, 4 }
 0x11e   : > { %1291 = vst.msk [vmem:[#allocation2 + $0x20] sm:$0xf] %vm1282_vm11, %v1251_v42  ;;  %3766 = vrot.lane.b32.xlu1 %v3716_v31, %s5019_s6  ;;  %v2913_v31 = vrot.slane %v2912_v12, 4  ;;  %v4658_v42 = vld [vmem:[%s5069_s22 + $0x94] sm:$0xf]  ;;  %v3186_v25 = vrot.slane %v3184_v5, 4 }
 0x11f   : > { %2514 = vrot.lane.b32.xlu0 %v2383_v36, %s5012_s23  ;;  %v2941_v36 = vrot.slane %v2939_v24, 5  ;;  %v4496_v32 = vld [vmem:[%s5069_s22 + $0x38] sm:$0x1] }
 0x120   : > { %v1257_v47 = vpop.permute.xlu1 %1256  ;;  %v1489_v17 = vshll.u32 %v4496_v32, 16 }
 0x121   : > { %1294 = vst.msk [vmem:[#allocation2 + $0x2c] sm:$0xf] %vm1282_vm11, %v1257_v47  ;;  %v1255_v53 = vpop.permute.xlu0 %1254  ;;  %v2923_v47 = vrot.slane %v2922_v37, 4  ;;  %v2946_v49 = vor.u32 %v2945_v39, %v2941_v36  ;;  %v2942_v56 = vsel %vm5080_vm2, %v2937_v44, %v2941_v36 }
 0x122   : > { %1293 = vst.msk [vmem:[#allocation2 + $0x28] sm:$0xf] %vm1282_vm11, %v1255_v53  ;;  %2516 = vrot.lane.b32.xlu1 %v2397_v43, %s5012_s23  ;;  %v2918_v43 = vsel %vm5080_vm2, %v2913_v31, %v2917_v23  ;;  %v4746_v23 = vld [vmem:[%s5069_s22 + $0x94] sm:$0xf]  ;;  %v1491_v58 = vrot.slane %v1489_v17, 5 }
 0x123   : > { %3768 = vrot.lane.b32.xlu0 %v3719_v48, %s5019_s6  ;;  %v2927_v48 = vrot.slane %v2925_v38, 5  ;;  %v2947_v63 = vrot.slane %v2946_v49, 4  ;;  %v3460_v36 = vshll.u32 %v4746_v23, 16  ;;  %v3464_v37 = vshrl.u32 %v4746_v23, 16  ;;  %v4727_v38 = vld [vmem:[%s5069_s22 + $0x90] sm:$0xf] }
 0x124   : > { %v1261_v61 = vpop.permute.xlu1 %1260  ;;  %v4519_v23 = vld [vmem:[%s5069_s22 + $0x34] sm:$0xf] }
 0x125   : > { %1296 = vst.msk [vmem:[#allocation2 + $0x34] sm:$0xf] %vm1282_vm11, %v1261_v61  ;;  %v1259_v2 = vpop.permute.xlu0 %1258  ;;  %v2952_v13 = vsel %vm5080_vm2, %v2947_v63, %v2951_v0  ;;  %v3466_v49 = vrot.slane %v3464_v37, 4  ;;  %v1742_v32 = vrot.slane %v4519_v23, 5  ;;  %v4611_v23 = vld [vmem:[%s5069_s22 + $0xa0] sm:$0xf] }
 0x126   : > { %1295 = vst.msk [vmem:[#allocation2 + $0x30] sm:$0xf] %vm1282_vm11, %v1259_v2  ;;  %2680 = vrot.lane.b32.xlu1 %v2633_v57, %s5013_s24  ;;  %v4700_v57 = vld [vmem:[%s5069_s22 + $0x90] sm:$0xe] }
 0x127   : > { %2518 = vrot.lane.b32.xlu0 %v2407_v62, %s5012_s23  ;;  %v2928_v62 = vsel %vm5080_vm2, %v2923_v47, %v2927_v48  ;;  %v4718_v4 = vrot.slane %v4700_v57, 9  ;;  %v3462_v48 = vrot.slane %v3460_v36, 5 }
 0x128   : > { %v1265_v10 = vpop.permute.xlu1 %1264 }
 0x129   : > { %1298 = vst.msk [vmem:[#allocation2 + $0x3c] sm:$0xf] %vm1282_vm11, %v1265_v10  ;;  %v1263_v15 = vpop.permute.xlu0 %1262  ;;  %v4745_v10 = vld [vmem:[%s5069_s22 + $0x90] sm:$0xf]  ;;  %v3185_v21 = vsel %vm5149_vm5, %v4718_v4, %v3184_v5  ;;  %v3467_v0 = vor.u32 %v3466_v49, %v3462_v48 }
 0x12a   : > { %1297 = vst.msk [vmem:[#allocation2 + $0x38] sm:$0xf] %vm1282_vm11, %v1263_v15  ;;  %2684 = vrot.lane.b32.xlu1 %v2640_v60, %s5013_s24  ;;  %v3178_v60 = vsel %vm5149_vm5, %v4717_v54, %v3177_v55  ;;  %v1483_v15 = vshrl.u32 %v4495_v3, 16  ;;  %v3454_v12 = vshll.u32 %v4745_v10, 16  ;;  %v4747_v55 = vld [vmem:[%s5069_s22 + $0x98] sm:$0x1] }
 0x12b   : > { %2682 = vrot.lane.b32.xlu0 %v2636_v11, %s5013_s24  ;;  %v3470_v1 = vshll.u32 %v4747_v55, 16  ;;  %v4769_v49 = vld [vmem:[%s5069_s22 + $0x90] sm:$0xe] }
 0x12c   : > { %v1335_v22 = vpop.permute.xlu1 %1334  ;;  %v1485_v29 = vrot.slane %v1483_v15, 4 }
 0x12d   : > { %1382 = vst.msk [vmem:[#allocation2 + $0x4] sm:$0xf] %vm1380_vm13, %v1335_v22  ;;  %v1333_v28 = vpop.permute.xlu0 %1332  ;;  %v1476_v22 = vor.u32 %v1475_v9, %v1472_v8  ;;  %v4499_v8 = vld [vmem:[%s5069_s22 + $0x44] sm:$0x1]  ;;  %v3472_v15 = vrot.slane %v3470_v1, 5 }
 0x12e   : > { %1381 = vst.msk [vmem:[#allocation2] sm:$0xf] %vm1380_vm13, %v1333_v28  ;;  %2777 = vrot.lane.b32.xlu1 %v4655_v18, %s5014_s25  ;;  %v4702_v18 = vld [vmem:[%s5069_s22 + $0x98] sm:$0x1]  ;;  %v1481_v28 = vrot.slane %v1479_v14, 5  ;;  %v3468_v14 = vrot.slane %v3467_v0, 4 }
 0x12f   : > { %2686 = vrot.lane.b32.xlu0 %v2643_v20, %s5013_s24  ;;  %v3451_v20 = vshrl.u32 %v4745_v10, 16  ;;  %v3187_v26 = vrot.slane %v4702_v18, 5  ;;  %v1477_v39 = vrot.slane %v1476_v22, 4  ;;  %v4518_v22 = vld [vmem:[%s5069_s22 + $0x30] sm:$0xe] }
 0x130   : > { %v1339_v33 = vpop.permute.xlu1 %1338  ;;  %v1486_v44 = vor.u32 %v1485_v29, %v1481_v28  ;;  %v3473_v29 = vsel %vm5080_vm2, %v3468_v14, %v3472_v15  ;;  %v4522_v1 = vld [vmem:[%s5069_s22 + $0x40] sm:$0xf] }
 0x131   : > { %1384 = vst.msk [vmem:[#allocation2 + $0xc] sm:$0xf] %vm1380_vm13, %v1339_v33  ;;  %v1337_v40 = vpop.permute.xlu0 %1336  ;;  %v3453_v33 = vrot.slane %v3451_v20, 4  ;;  %v1482_v51 = vsel %vm5080_vm2, %v1477_v39, %v1481_v28  ;;  %v1513_v20 = vshll.u32 %v4499_v8, 16  ;;  %v4610_v8 = vld [vmem:[%s5069_s22 + $0x9c] sm:$0xf] }
 0x132   : > { %1383 = vst.msk [vmem:[#allocation2 + $0x8] sm:$0xf] %vm1380_vm13, %v1337_v40  ;;  %2781 = vrot.lane.b32.xlu1 %v4657_v30, %s5014_s25  ;;  %v4497_v30 = vld [vmem:[%s5069_s22 + $0x3c] sm:$0xf]  ;;  %v1487_v57 = vrot.slane %v1486_v44, 4  ;;  %v1744_v44 = vrot.slane %v1742_v32, 4 }
 0x133   : > { %2779 = vrot.lane.b32.xlu0 %v4656_v35, %s5014_s25  ;;  %v3456_v35 = vrot.slane %v3454_v12, 5  ;;  %v1494_v40 = vshrl.u32 %v4497_v30, 16  ;;  %v1497_v41 = vshll.u32 %v4497_v30, 16 }
 0x134   : > { %v1343_v46 = vpop.permute.xlu1 %1342  ;;  %v1492_v6 = vsel %vm5080_vm2, %v1487_v57, %v1491_v58  ;;  %v4608_v57 = vld [vmem:[%s5069_s22 + $0x94] sm:$0xf]  ;;  %v4789_v58 = vrot.slane %v4769_v49, 9 }
 0x135   : > { %1386 = vst.msk [vmem:[#allocation2 + $0x14] sm:$0xf] %vm1380_vm13, %v1343_v46  ;;  %v1341_v53 = vpop.permute.xlu0 %1340  ;;  %v4498_v46 = vld [vmem:[%s5069_s22 + $0x40] sm:$0xf]  ;;  %v3457_v47 = vor.u32 %v3456_v35, %v3453_v33  ;;  %v1499_v54 = vrot.slane %v1497_v41, 5 }
 0x136   : > { %1385 = vst.msk [vmem:[#allocation2 + $0x10] sm:$0xf] %vm1380_vm13, %v1341_v53  ;;  %3057 = vrot.lane.b32.xlu1 %v2918_v43, %s5015_s26  ;;  %v3188_v43 = vsel %vm5149_vm5, %v3186_v25, %v3187_v26  ;;  %v1496_v53 = vrot.slane %v1494_v40, 4  ;;  %v1503_v59 = vshll.u32 %v4498_v46, 16  ;;  %v1507_v50 = vshrl.u32 %v4498_v46, 16 }
 0x137   : > { %2783 = vrot.lane.b32.xlu0 %v4658_v42, %s5014_s25  ;;  %v3458_v63 = vrot.slane %v3457_v47, 4  ;;  %v4607_v35 = vld [vmem:[%s5069_s22 + $0x90] sm:$0xf]  ;;  %v4520_v40 = vld [vmem:[%s5069_s22 + $0x38] sm:$0x1] }
 0x138   : > { %v1347_v61 = vpop.permute.xlu1 %1346  ;;  %v1500_v3 = vor.u32 %v1499_v54, %v1496_v53  ;;  %v1505_v7 = vrot.slane %v1503_v59, 5  ;;  %v1509_v9 = vrot.slane %v1507_v50, 4  ;;  %v2409_v17 = vshrl.u32 %v4607_v35, 16  ;;  %v4521_v50 = vld [vmem:[%s5069_s22 + $0x3c] sm:$0xe] }
 0x139   : > { %1388 = vst.msk [vmem:[#allocation2 + $0x1c] sm:$0xf] %vm1380_vm13, %v1347_v61  ;;  %v1345_v2 = vpop.permute.xlu0 %1344  ;;  %v4748_v61 = vld [vmem:[%s5069_s22 + $0x9c] sm:$0xf] }
 0x13a   : > { %1387 = vst.msk [vmem:[#allocation2 + $0x18] sm:$0xf] %vm1380_vm13, %v1345_v2  ;;  %3061 = vrot.lane.b32.xlu1 %v2942_v56, %s5015_s26  ;;  %v4729_v2 = vld [vmem:[%s5069_s22 + $0x9c] sm:$0xf]  ;;  %v3478_v4 = vshll.u32 %v4748_v61, 16  ;;  %v1501_v18 = vrot.slane %v1500_v3, 4 }
 0x13b   : > { %3059 = vrot.lane.b32.xlu0 %v2928_v62, %s5015_s26  ;;  %v4587_v3 = vld [vmem:[%s5069_s22 + $0x90] sm:$0xf] }
 0x13c   : > { %v1351_v11 = vpop.permute.xlu1 %1350  ;;  %v1506_v30 = vsel %vm5080_vm2, %v1501_v18, %v1505_v7  ;;  %2280 = vst.msk [vmem:[#allocation2 + $0x60] sm:$0xf] %vm278_vm6, %v4587_v3  ;;  %v2433_v18 = vshrl.u32 %v4610_v8, 16 }
 0x13d   : > { %1390 = vst.msk [vmem:[#allocation2 + $0x24] sm:$0xf] %vm1380_vm13, %v1351_v11  ;;  %v1349_v16 = vpop.permute.xlu0 %1348  ;;  %v4749_v11 = vld [vmem:[%s5069_s22 + $0xa0] sm:$0xf] }
 0x13e   : > { %1389 = vst.msk [vmem:[#allocation2 + $0x20] sm:$0xf] %vm1380_vm13, %v1349_v16  ;;  %3225 = vrot.lane.b32.xlu1 %v3178_v60, %s5016_s27  ;;  %v3475_v60 = vshrl.u32 %v4748_v61, 16  ;;  %v4730_v16 = vld [vmem:[%s5069_s22 + $0xa0] sm:$0xf]  ;;  %v3484_v25 = vshll.u32 %v4749_v11, 16 }
 0x13f   : > { %3063 = vrot.lane.b32.xlu0 %v2952_v13, %s5015_s26  ;;  %v3463_v13 = vsel %vm5080_vm2, %v3458_v63, %v3462_v48  ;;  %v3488_v26 = vshrl.u32 %v4749_v11, 16  ;;  %v1745_v48 = vrot.slane %v4520_v40, 5  ;;  %v2411_v61 = vrot.slane %v2409_v17, 4 }
 0x140   : > { %v2505_v24 = vpop.permute.xlu1 %2504  ;;  %v3477_v12 = vrot.slane %v3475_v60, 4  ;;  %v3486_v39 = vrot.slane %v3484_v25, 5  ;;  %v1749_v11 = vrot.slane %v4522_v1, 5 }
 0x141   : > { %2552 = vst.msk [vmem:[#allocation2 + $0x40] sm:$0xf] %vm562_vm7, %v2505_v24  ;;  %v1353_v31 = vpop.permute.xlu0 %1352  ;;  %v1510_v24 = vor.u32 %v1509_v9, %v1505_v7  ;;  %v3490_v41 = vrot.slane %v3488_v26, 4  ;;  %v1746_v0 = vsel %vm5149_vm5, %v1744_v44, %v1745_v48  ;;  %v2422_v7 = vshrl.u32 %v4608_v57, 16  ;;  %v4523_v26 = vld [vmem:[%s5069_s22 + $0x44] sm:$0x1] }
 0x142   : > { %1391 = vst.msk [vmem:[#allocation2 + $0x28] sm:$0xf] %vm1380_vm13, %v1353_v31  ;;  %3229 = vrot.lane.b32.xlu1 %v3185_v21, %s5016_s27  ;;  %v3480_v21 = vrot.slane %v3478_v4, 5  ;;  %v4538_v31 = vrot.slane %v4518_v22, 9  ;;  %v1751_v40 = vrot.slane %v1749_v11, 4 }
 0x143   : > { %3227 = vrot.lane.b32.xlu0 %v3181_v19, %s5016_s27  ;;  %v1511_v37 = vrot.slane %v1510_v24, 4  ;;  %v3491_v54 = vor.u32 %v3490_v41, %v3486_v39  ;;  %v2424_v22 = vrot.slane %v2422_v7, 4  ;;  %v4588_v24 = vld [vmem:[%s5069_s22 + $0x94] sm:$0xf]  ;;  %v1752_v41 = vrot.slane %v4523_v26, 5 }
 0x144   : > { %v2509_v42 = vpop.permute.xlu1 %2508  ;;  %v3481_v33 = vor.u32 %v3480_v21, %v3477_v12  ;;  %v1743_v46 = vsel %vm5149_vm5, %v4538_v31, %v1742_v32  ;;  %2281 = vst.msk [vmem:[#allocation2 + $0x64] sm:$0xf] %vm278_vm6, %v4588_v24  ;;  %v4772_v32 = vld [vmem:[%s5069_s22 + $0x9c] sm:$0xe] }
 0x145   : > { %2554 = vst.msk [vmem:[#allocation2 + $0x48] sm:$0xf] %vm562_vm7, %v2509_v42  ;;  %v2507_v45 = vpop.permute.xlu0 %2506  ;;  %v3492_v4 = vrot.slane %v3491_v54, 4 }
 0x146   : > { %2553 = vst.msk [vmem:[#allocation2 + $0x44] sm:$0xf] %vm562_vm7, %v2507_v45  ;;  %3322 = vrot.lane.b32.xlu1 %v4727_v38, %s5017_s28  ;;  %v1515_v38 = vrot.slane %v1513_v20, 5  ;;  %v2412_v45 = vshll.u32 %v4607_v35, 16  ;;  %v3482_v47 = vrot.slane %v3481_v33, 4  ;;  %v2436_v20 = vshll.u32 %v4610_v8, 16 }
 0x147   : > { %3231 = vrot.lane.b32.xlu0 %v3188_v43, %s5016_s27  ;;  %v4750_v43 = vld [vmem:[%s5069_s22 + $0xa4] sm:$0x1]  ;;  %v2435_v33 = vrot.slane %v2433_v18, 4  ;;  %v4633_v18 = vld [vmem:[%s5069_s22 + $0x98] sm:$0x1] }
 0x148   : > { %v2673_v56 = vpop.permute.xlu1 %2672  ;;  %v1516_v53 = vsel %vm5080_vm2, %v1511_v37, %v1515_v38  ;;  %v3494_v55 = vshll.u32 %v4750_v43, 16  ;;  %v3487_v63 = vsel %vm5080_vm2, %v3482_v47, %v3486_v39  ;;  %v2438_v35 = vrot.slane %v2436_v20, 5  ;;  %v4589_v38 = vld [vmem:[%s5069_s22 + $0x9c] sm:$0xf] }
 0x149   : > { %2720 = vst.msk [vmem:[#allocation2 + $0x40] sm:$0xf] %vm734_vm8, %v2673_v56  ;;  %v2511_v62 = vpop.permute.xlu0 %2510  ;;  %v2446_v37 = vshrl.u32 %v4611_v23, 16 }
 0x14a   : > { %2555 = vst.msk [vmem:[#allocation2 + $0x4c] sm:$0xf] %vm562_vm7, %v2511_v62  ;;  %1621 = vrot.lane.b32.xlu1 %v1482_v51, %s5018_s29  ;;  %v4770_v51 = vld [vmem:[%s5069_s22 + $0x94] sm:$0xf]  ;;  %v2414_v62 = vrot.slane %v2412_v45, 5  ;;  %v2439_v48 = vor.u32 %v2438_v35, %v2435_v33 }
 0x14b   : > { %3324 = vrot.lane.b32.xlu0 %v4728_v52, %s5017_s28  ;;  %v3722_v59 = vrot.slane %v4770_v51, 5  ;;  %2282 = vst.msk [vmem:[#allocation2 + $0x68] sm:$0xf] %vm278_vm6, %v4589_v38  ;;  %v2448_v51 = vrot.slane %v2446_v37, 4 }
 0x14c   : > { %v2677_v5 = vpop.permute.xlu1 %2676  ;;  %v2415_v15 = vor.u32 %v2414_v62, %v2411_v61  ;;  %v2440_v61 = vrot.slane %v2439_v48, 4  ;;  %v4631_v62 = vld [vmem:[%s5069_s22 + $0x90] sm:$0xe] }
 0x14d   : > { %2722 = vst.msk [vmem:[#allocation2 + $0x48] sm:$0xf] %vm734_vm8, %v2677_v5  ;;  %v2675_v10 = vpop.permute.xlu0 %2674  ;;  %v3496_v5 = vrot.slane %v3494_v55, 5 }
 0x14e   : > { %2721 = vst.msk [vmem:[#allocation2 + $0x44] sm:$0xf] %vm734_vm8, %v2675_v10  ;;  %3326 = vrot.lane.b32.xlu1 %v4729_v2, %s5017_s28  ;;  %v4771_v2 = vld [vmem:[%s5069_s22 + $0x98] sm:$0x1]  ;;  %v4539_v10 = vrot.slane %v4521_v50, 9  ;;  %v2416_v31 = vrot.slane %v2415_v15, 4 }
 0x14f   : > { %1623 = vrot.lane.b32.xlu0 %v1492_v6, %s5018_s29  ;;  %v2418_v6 = vshll.u32 %v4608_v57, 16  ;;  %v3725_v14 = vrot.slane %v4771_v2, 5  ;;  %v3497_v21 = vsel %vm5080_vm2, %v3492_v4, %v3496_v5  ;;  %v4590_v57 = vld [vmem:[%s5069_s22 + $0xa0] sm:$0xf]  ;;  %v4634_v15 = vld [vmem:[%s5069_s22 + $0x9c] sm:$0xe] }
 0x150   : > { %v2770_v19 = vpop.permute.xlu1 %2769  ;;  %2283 = vst.msk [vmem:[#allocation2 + $0x6c] sm:$0xf] %vm278_vm6, %v4590_v57 }
 0x151   : > { %2817 = vst.msk [vmem:[#allocation2 + $0x40] sm:$0xf] %vm832_vm9, %v2770_v19  ;;  %v2679_v28 = vpop.permute.xlu0 %2678  ;;  %v2420_v19 = vrot.slane %v2418_v6, 5  ;;  %v4647_v6 = vrot.slane %v4631_v62, 9 }
 0x152   : > { %2723 = vst.msk [vmem:[#allocation2 + $0x4c] sm:$0xf] %vm734_vm8, %v2679_v28  ;;  %3602 = vrot.lane.b32.xlu1 %v3463_v13, %s5018_s29  ;;  %v3724_v13 = vrot.slane %v3722_v59, 4  ;;  %v4609_v28 = vld [vmem:[%s5069_s22 + $0x98] sm:$0x1] }
 0x153   : > { %3328 = vrot.lane.b32.xlu0 %v4730_v16, %s5017_s28  ;;  %v3723_v16 = vsel %vm5149_vm5, %v4789_v58, %v3722_v59  ;;  %v2425_v43 = vor.u32 %v2424_v22, %v2420_v19  ;;  %v2428_v44 = vshll.u32 %v4609_v28, 16  ;;  %v2421_v45 = vsel %vm5080_vm2, %v2416_v31, %v2420_v19  ;;  %v4774_v59 = vld [vmem:[%s5069_s22 + $0xa4] sm:$0x1] }
 0x154   : > { %v2774_v36 = vpop.permute.xlu1 %2773  ;;  %v3732_v4 = vrot.slane %v4774_v59, 5  ;;  %v4648_v22 = vrot.slane %v4634_v15, 9  ;;  %v4636_v31 = vld [vmem:[%s5069_s22 + $0xa4] sm:$0x1]  ;;  %v4661_v59 = vld [vmem:[%s5069_s22 + $0xa8] sm:$0xf] }
 0x155   : > { %2819 = vst.msk [vmem:[#allocation2 + $0x48] sm:$0xf] %vm832_vm9, %v2774_v36  ;;  %v2772_v42 = vpop.permute.xlu0 %2771  ;;  %v2442_v36 = vshll.u32 %v4611_v23, 16  ;;  %v2426_v54 = vrot.slane %v2425_v43, 4  ;;  %v2430_v55 = vrot.slane %v2428_v44, 5 }
 0x156   : > { %2818 = vst.msk [vmem:[#allocation2 + $0x44] sm:$0xf] %vm832_vm9, %v2772_v42  ;;  %1625 = vrot.lane.b32.xlu1 %v1506_v30, %s5018_s29  ;;  %v3726_v30 = vsel %vm5149_vm5, %v3724_v13, %v3725_v14  ;;  %v4773_v42 = vld [vmem:[%s5069_s22 + $0xa0] sm:$0xf] }
 0x157   : > { %3604 = vrot.lane.b32.xlu0 %v3473_v29, %s5018_s29  ;;  %v1750_v29 = vsel %vm5149_vm5, %v4539_v10, %v1749_v11  ;;  %v3729_v47 = vrot.slane %v4773_v42, 5  ;;  %v2444_v49 = vrot.slane %v2442_v36, 5  ;;  %v2431_v3 = vsel %vm5080_vm2, %v2426_v54, %v2430_v55  ;;  %v4679_v11 = vld [vmem:[%s5069_s22 + $0x9c] sm:$0xf] }
 0x158   : > { %v3050_v52 = vpop.permute.xlu1 %3049  ;;  %v2957_v19 = vshll.u32 %v4679_v11, 16  ;;  %v2656_v42 = vrot.slane %v4636_v31, 5  ;;  %v4500_v31 = vld [vmem:[%s5069_s22 + $0x48] sm:$0xf] }
 0x159   : > { %3097 = vst.msk [vmem:[#allocation2 + $0x40] sm:$0xf] %vm1113_vm10, %v3050_v52  ;;  %v2776_v56 = vpop.permute.xlu0 %2775  ;;  %v2445_v8 = vsel %vm5080_vm2, %v2440_v61, %v2444_v49 }
 0x15a   : > { %2820 = vst.msk [vmem:[#allocation2 + $0x4c] sm:$0xf] %vm832_vm9, %v2776_v56  ;;  %1790 = vrot.lane.b32.xlu1 %v1743_v46, %s5019_s6  ;;  %v4790_v46 = vrot.slane %v4772_v32, 9  ;;  %v4612_v56 = vld [vmem:[%s5069_s22 + $0xa4] sm:$0x1]  ;;  %v2959_v35 = vrot.slane %v2957_v19, 5 }
 0x15b   : > { %1627 = vrot.lane.b32.xlu0 %v1516_v53, %s5018_s29  ;;  %v1753_v53 = vsel %vm5149_vm5, %v1751_v40, %v1752_v41  ;;  %v2452_v1 = vshll.u32 %v4612_v56, 16  ;;  %v4680_v32 = vld [vmem:[%s5069_s22 + $0xa0] sm:$0xf] }
 0x15c   : > { %v3054_v60 = vpop.permute.xlu1 %3053  ;;  %v3730_v50 = vsel %vm5149_vm5, %v4790_v46, %v3729_v47  ;;  %v2963_v43 = vshll.u32 %v4680_v32, 16  ;;  %v2967_v44 = vshrl.u32 %v4680_v32, 16 }
 0x15d   : > { %3099 = vst.msk [vmem:[#allocation2 + $0x48] sm:$0xf] %vm1113_vm10, %v3054_v60  ;;  %v3052_v9 = vpop.permute.xlu0 %3051  ;;  %v3731_v60 = vrot.slane %v3729_v47, 4  ;;  %v2454_v10 = vrot.slane %v2452_v1, 5  ;;  %v4659_v47 = vld [vmem:[%s5069_s22 + $0x9c] sm:$0xf] }
 0x15e   : > { %3098 = vst.msk [vmem:[#allocation2 + $0x44] sm:$0xf] %vm1113_vm10, %v3052_v9  ;;  %3606 = vrot.lane.b32.xlu1 %v3487_v63, %s5018_s29  ;;  %v4632_v63 = vld [vmem:[%s5069_s22 + $0x94] sm:$0xf]  ;;  %v2965_v55 = vrot.slane %v2963_v43, 5  ;;  %v2969_v56 = vrot.slane %v2967_v44, 4 }
 0x15f   : > { %1792 = vrot.lane.b32.xlu0 %v1746_v0, %s5019_s6  ;;  %v2449_v0 = vor.u32 %v2448_v51, %v2444_v49  ;;  %v2646_v7 = vrot.slane %v4632_v63, 5  ;;  %v3733_v14 = vsel %vm5149_vm5, %v3731_v60, %v3732_v4  ;;  %v4660_v1 = vld [vmem:[%s5069_s22 + $0xa0] sm:$0xf]  ;;  %v4684_v60 = vld [vmem:[%s5069_s22 + $0xb0] sm:$0x1]  ;;  %v1521_v43 = vshll.u32 %v4500_v31, 16 }
 0x160   : > { %v3218_v12 = vpop.permute.xlu1 %3217 }
 0x161   : > { %3265 = vst.msk [vmem:[#allocation2 + $0x40] sm:$0xf] %vm1282_vm11, %v3218_v12  ;;  %v3056_v25 = vpop.permute.xlu0 %3055  ;;  %v2450_v9 = vrot.slane %v2449_v0, 4  ;;  %v2647_v12 = vsel %vm5149_vm5, %v4647_v6, %v2646_v7  ;;  %v2648_v24 = vrot.slane %v2646_v7, 4  ;;  %v4703_v7 = vld [vmem:[%s5069_s22 + $0x9c] sm:$0xe] }
 0x162   : > { %3100 = vst.msk [vmem:[#allocation2 + $0x4c] sm:$0xf] %vm1113_vm10, %v3056_v25  ;;  %3770 = vrot.lane.b32.xlu1 %v3723_v16, %s5019_s6  ;;  %v4635_v16 = vld [vmem:[%s5069_s22 + $0xa0] sm:$0xf]  ;;  %v2649_v25 = vrot.slane %v4633_v18, 5  ;;  %v4719_v18 = vrot.slane %v4703_v7, 9 }
 0x163   : > { %3608 = vrot.lane.b32.xlu0 %v3497_v21, %s5018_s29  ;;  %v2954_v21 = vshrl.u32 %v4679_v11, 16  ;;  %v2653_v23 = vrot.slane %v4635_v16, 5  ;;  %v2455_v28 = vsel %vm5080_vm2, %v2450_v9, %v2454_v10  ;;  %v2997_v10 = vshll.u32 %v4684_v60, 16 }
 0x164   : > { %v3222_v39 = vpop.permute.xlu1 %3221  ;;  %v2650_v37 = vsel %vm5149_vm5, %v2648_v24, %v2649_v25  ;;  %v4706_v25 = vld [vmem:[%s5069_s22 + $0xa8] sm:$0xe] }
 0x165   : > { %3267 = vst.msk [vmem:[#allocation2 + $0x48] sm:$0xf] %vm1282_vm11, %v3222_v39  ;;  %v3220_v17 = vpop.permute.xlu0 %3219  ;;  %v2956_v33 = vrot.slane %v2954_v21, 4  ;;  %v2654_v36 = vsel %vm5149_vm5, %v4648_v22, %v2653_v23  ;;  %v2655_v41 = vrot.slane %v2653_v23, 4  ;;  %v2999_v19 = vrot.slane %v2997_v10, 5 }
 0x166   : > { %3266 = vst.msk [vmem:[#allocation2 + $0x44] sm:$0xf] %vm1282_vm11, %v3220_v17  ;;  %1794 = vrot.lane.b32.xlu1 %v1750_v29, %s5019_s6  ;;  %v4682_v29 = vld [vmem:[%s5069_s22 + $0xa8] sm:$0xf]  ;;  %v4683_v17 = vld [vmem:[%s5069_s22 + $0xac] sm:$0xf] }
 0x167   : > { %3772 = vrot.lane.b32.xlu0 %v3726_v30, %s5019_s6  ;;  %v2978_v38 = vshrl.u32 %v4682_v29, 16  ;;  %v2981_v39 = vshll.u32 %v4682_v29, 16  ;;  %v2960_v46 = vor.u32 %v2959_v35, %v2956_v33  ;;  %v2987_v51 = vshll.u32 %v4683_v17, 16  ;;  %v4501_v22 = vld [vmem:[%s5069_s22 + $0x4c] sm:$0xf] }
 0x168   : > { %v3315_v52 = vpop.permute.xlu1 %3314  ;;  %v2657_v54 = vsel %vm5149_vm5, %v2655_v41, %v2656_v42  ;;  %v1527_v33 = vshll.u32 %v4501_v22, 16  ;;  %v1531_v35 = vshrl.u32 %v4501_v22, 16  ;;  %v1518_v42 = vshrl.u32 %v4500_v31, 16  ;;  %v4732_v10 = vld [vmem:[%s5069_s22 + $0xac] sm:$0xf] }
 0x169   : > { %3362 = vst.msk [vmem:[#allocation2 + $0x40] sm:$0xf] %vm1380_vm13, %v3315_v52  ;;  %v3224_v58 = vpop.permute.xlu0 %3223  ;;  %v2980_v48 = vrot.slane %v2978_v38, 4  ;;  %v2983_v49 = vrot.slane %v2981_v39, 5  ;;  %v2991_v52 = vshrl.u32 %v4683_v17, 16  ;;  %v2989_v62 = vrot.slane %v2987_v51, 5 }
 0x16a   : > { %3268 = vst.msk [vmem:[#allocation2 + $0x4c] sm:$0xf] %vm1282_vm11, %v3224_v58  ;;  %2520 = vrot.lane.b32.xlu1 %v2421_v45, %s5012_s23  ;;  %v4681_v58 = vld [vmem:[%s5069_s22 + $0xa4] sm:$0x1]  ;;  %v4708_v17 = vld [vmem:[%s5069_s22 + $0xb0] sm:$0x1] }
 0x16b   : > { %1796 = vrot.lane.b32.xlu0 %v1753_v53, %s5019_s6  ;;  %v2984_v61 = vor.u32 %v2983_v49, %v2980_v48  ;;  %v2993_v63 = vrot.slane %v2991_v52, 4  ;;  %v4502_v49 = vld [vmem:[%s5069_s22 + $0x50] sm:$0x1]  ;;  %v4752_v51 = vld [vmem:[%s5069_s22 + $0xac] sm:$0xf] }
 0x16c   : > { %v1614_v2 = vpop.permute.xlu1 %1613 }
 0x16d   : > { %1662 = vst.msk [vmem:[#allocation2] sm:$0xf] %vm1661_vm14, %v1614_v2  ;;  %v3317_v5 = vpop.permute.xlu0 %3316  ;;  %v2970_v2 = vor.u32 %v2969_v56, %v2965_v55  ;;  %v2985_v6 = vrot.slane %v2984_v61, 4  ;;  %v2994_v9 = vor.u32 %v2993_v63, %v2989_v62  ;;  %v1523_v56 = vrot.slane %v1521_v43, 5 }
 0x16e   : > { %3363 = vst.msk [vmem:[#allocation2 + $0x44] sm:$0xf] %vm1380_vm13, %v3317_v5  ;;  %3774 = vrot.lane.b32.xlu1 %v3730_v50, %s5019_s6  ;;  %v2961_v50 = vrot.slane %v2960_v46, 4  ;;  %v1533_v46 = vrot.slane %v1531_v35, 4  ;;  %v1537_v61 = vshll.u32 %v4502_v49, 16  ;;  %v3512_v63 = vshrl.u32 %v4752_v51, 16 }
 0x16f   : > { %2522 = vrot.lane.b32.xlu0 %v2431_v3, %s5012_s23  ;;  %v2973_v3 = vshll.u32 %v4681_v58, 16  ;;  %v2995_v21 = vrot.slane %v2994_v9, 4  ;;  %v4483_v9 = vld [vmem:[%s5069_s22 + $0x58] sm:$0xf] }
 0x170   : > { %v3319_v13 = vpop.permute.xlu1 %3318  ;;  %v2966_v5 = vsel %vm5080_vm2, %v2961_v50, %v2965_v55  ;;  %v1520_v55 = vrot.slane %v1518_v42, 4  ;;  %v4754_v42 = vld [vmem:[%s5069_s22 + $0xb4] sm:$0xf] }
 0x171   : > { %3364 = vst.msk [vmem:[#allocation2 + $0x48] sm:$0xf] %vm1380_vm13, %v3319_v13  ;;  %v1616_v20 = vpop.permute.xlu0 %1615  ;;  %v4662_v13 = vld [vmem:[%s5069_s22 + $0xac] sm:$0xf]  ;;  %v2975_v15 = vrot.slane %v2973_v3, 5  ;;  %v3000_v41 = vsel %vm5080_vm2, %v2995_v21, %v2999_v19 }
 0x172   : > { %1663 = vst.msk [vmem:[#allocation2 + $0x4] sm:$0xf] %vm1661_vm14, %v1616_v20  ;;  %2524 = vrot.lane.b32.xlu1 %v2445_v8, %s5012_s23  ;;  %v4704_v8 = vld [vmem:[%s5069_s22 + $0xa0] sm:$0xf]  ;;  %v1524_v3 = vor.u32 %v1523_v56, %v1520_v55  ;;  %v3523_v55 = vshrl.u32 %v4754_v42, 16  ;;  %v3526_v56 = vshll.u32 %v4754_v42, 16 }
 0x173   : > { %3776 = vrot.lane.b32.xlu0 %v3733_v14, %s5019_s6  ;;  %v2971_v14 = vrot.slane %v2970_v2, 4  ;;  %v3191_v20 = vrot.slane %v4704_v8, 5 }
 0x174   : > { %v3595_v26 = vpop.permute.xlu1 %3594  ;;  %v1525_v22 = vrot.slane %v1524_v3, 4  ;;  %v4526_v3 = vld [vmem:[%s5069_s22 + $0x50] sm:$0x1] }
 0x175   : > { %3642 = vst.msk [vmem:[#allocation2 + $0x40] sm:$0xf] %vm1661_vm14, %v3595_v26  ;;  %v3321_v30 = vpop.permute.xlu0 %3320  ;;  %v2976_v24 = vsel %vm5080_vm2, %v2971_v14, %v2975_v15  ;;  %v4707_v26 = vld [vmem:[%s5069_s22 + $0xac] sm:$0xf]  ;;  %v3192_v32 = vsel %vm5149_vm5, %v4719_v18, %v3191_v20  ;;  %v3193_v38 = vrot.slane %v3191_v20, 4  ;;  %v3514_v15 = vrot.slane %v3512_v63, 4 }
 0x176   : > { %3365 = vst.msk [vmem:[#allocation2 + $0x4c] sm:$0xf] %vm1380_vm13, %v3321_v30  ;;  %2688 = vrot.lane.b32.xlu1 %v2647_v12, %s5013_s24  ;;  %v2990_v12 = vsel %vm5080_vm2, %v2985_v6, %v2989_v62  ;;  %v3508_v62 = vshll.u32 %v4752_v51, 16  ;;  %v4503_v6 = vld [vmem:[%s5069_s22 + $0x54] sm:$0xf] }
 0x177   : > { %2526 = vrot.lane.b32.xlu0 %v2455_v28, %s5012_s23  ;;  %v4705_v28 = vld [vmem:[%s5069_s22 + $0xa4] sm:$0x1]  ;;  %v1545_v21 = vshll.u32 %v4503_v6, 16 }
 0x178   : > { %v1618_v40 = vpop.permute.xlu1 %1617  ;;  %v3194_v39 = vrot.slane %v4705_v28, 5  ;;  %v6074_v14 = vrot.slane %v3508_v62, 5 }
 0x179   : > { %1664 = vst.msk [vmem:[#allocation2 + $0x8] sm:$0xf] %vm1661_vm14, %v1618_v40  ;;  %v3597_v45 = vpop.permute.xlu0 %3596  ;;  %v1547_v35 = vrot.slane %v1545_v21, 5 }
 0x17a   : > { %3643 = vst.msk [vmem:[#allocation2 + $0x44] sm:$0xf] %vm1661_vm14, %v3597_v45  ;;  %2692 = vrot.lane.b32.xlu1 %v2654_v36, %s5013_s24  ;;  %v4720_v36 = vrot.slane %v4706_v25, 9  ;;  %v6048_v45 = vrot.slane %v1527_v33, 5  ;;  %v3195_v48 = vsel %vm5149_vm5, %v3193_v38, %v3194_v39  ;;  %v3515_v28 = vor.u32 %v3514_v15, %v6074_v14  ;;  %v4755_v39 = vld [vmem:[%s5069_s22 + $0xb8] sm:$0xf] }
 0x17b   : > { %2690 = vrot.lane.b32.xlu0 %v2650_v37, %s5013_s24  ;;  %v3198_v37 = vrot.slane %v4707_v26, 5  ;;  %v3532_v49 = vshll.u32 %v4755_v39, 16  ;;  %v3536_v51 = vshrl.u32 %v4755_v39, 16  ;;  %v4614_v15 = vld [vmem:[%s5069_s22 + $0xac] sm:$0xf] }
 0x17c   : > { %v1783_v53 = vpop.permute.xlu1 %1782  ;;  %v1534_v50 = vor.u32 %v1533_v46, %v6048_v45  ;;  %v3516_v43 = vrot.slane %v3515_v28, 4 }
 0x17d   : > { %1831 = vst.msk [vmem:[#allocation2] sm:$0xf] %vm1830_vm15, %v1783_v53  ;;  %v1620_v57 = vpop.permute.xlu0 %1619  ;;  %v3200_v53 = vrot.slane %v3198_v37, 4  ;;  %v6109_v63 = vrot.slane %v3532_v49, 5 }
 0x17e   : > { %1665 = vst.msk [vmem:[#allocation2 + $0xc] sm:$0xf] %vm1661_vm14, %v1620_v57  ;;  %2785 = vrot.lane.b32.xlu1 %v4659_v47, %s5014_s25  ;;  %v3199_v47 = vsel %vm5149_vm5, %v4720_v36, %v3198_v37  ;;  %v1530_v37 = vsel %vm5080_vm2, %v1525_v22, %v6048_v45  ;;  %v4734_v45 = vld [vmem:[%s5069_s22 + $0xb8] sm:$0xf] }
 0x17f   : > { %2694 = vrot.lane.b32.xlu0 %v2657_v54, %s5013_s24  ;;  %v3201_v54 = vrot.slane %v4708_v17, 5 }
 0x180   : > { %v3599_v0 = vpop.permute.xlu1 %3598 }
 0x181   : > { %3644 = vst.msk [vmem:[#allocation2 + $0x48] sm:$0xf] %vm1661_vm14, %v3599_v0  ;;  %v1785_v4 = vpop.permute.xlu0 %1784  ;;  %v4731_v0 = vld [vmem:[%s5069_s22 + $0xa8] sm:$0xf]  ;;  %v3202_v2 = vsel %vm5149_vm5, %v3200_v53, %v3201_v54  ;;  %v4733_v53 = vld [vmem:[%s5069_s22 + $0xb4] sm:$0xf] }
 0x182   : > { %1832 = vst.msk [vmem:[#allocation2 + $0x4] sm:$0xf] %vm1830_vm15, %v1785_v4  ;;  %2789 = vrot.lane.b32.xlu1 %v4661_v59, %s5014_s25  ;;  %v4751_v59 = vld [vmem:[%s5069_s22 + $0xa8] sm:$0xf] }
 0x183   : > { %2787 = vrot.lane.b32.xlu0 %v4660_v1, %s5014_s25  ;;  %v3499_v60 = vshrl.u32 %v4751_v59, 16  ;;  %v3502_v4 = vshll.u32 %v4751_v59, 16 }
 0x184   : > { %v3763_v11 = vpop.permute.xlu1 %3762 }
 0x185   : > { %3810 = vst.msk [vmem:[#allocation2 + $0x40] sm:$0xf] %vm1830_vm15, %v3763_v11  ;;  %v3601_v16 = vpop.permute.xlu0 %3600  ;;  %v1535_v11 = vrot.slane %v1534_v50, 4 }
 0x186   : > { %3645 = vst.msk [vmem:[#allocation2 + $0x4c] sm:$0xf] %vm1661_vm14, %v3601_v16  ;;  %3065 = vrot.lane.b32.xlu1 %v2966_v5, %s5015_s26  ;;  %v4504_v5 = vld [vmem:[%s5069_s22 + $0x58] sm:$0xf]  ;;  %v4753_v16 = vld [vmem:[%s5069_s22 + $0xb0] sm:$0x1] }
 0x187   : > { %2791 = vrot.lane.b32.xlu0 %v4662_v13, %s5014_s25  ;;  %v1539_v13 = vrot.slane %v1537_v61, 5  ;;  %v1551_v18 = vshll.u32 %v4504_v5, 16  ;;  %v1555_v20 = vshrl.u32 %v4504_v5, 16  ;;  %v3528_v5 = vrot.slane %v3526_v56, 5  ;;  %v4527_v56 = vld [vmem:[%s5069_s22 + $0x54] sm:$0xe] }
 0x188   : > { %v1787_v23 = vpop.permute.xlu1 %1786 }
 0x189   : > { %1833 = vst.msk [vmem:[#allocation2 + $0x8] sm:$0xf] %vm1830_vm15, %v1787_v23  ;;  %v3765_v29 = vpop.permute.xlu0 %3764  ;;  %v4967_v30 = vld [vmem:[#allocation2] sm:$0xff]   ;;  %v3501_v23 = vrot.slane %v3499_v60, 4  ;;  %v1540_v26 = vsel %vm5080_vm2, %v1535_v11, %v1539_v13  ;;  %v6087_v31 = vrot.slane %v1551_v18, 5  ;;  %v1759_v11 = vrot.slane %v4526_v3, 5 }
 0x18a   : > { %3811 = vst.msk [vmem:[#allocation2 + $0x44] sm:$0xf] %vm1830_vm15, %v3765_v29  ;;  %3069 = vrot.lane.b32.xlu1 %v2990_v12, %s5015_s26  ;;  %4893 = vmatprep.mubr.msk.bf16.mxu0 %vm1923_vm0, %v4967_v30  ;;  %v1542_v12 = vshrl.u32 %v4503_v6, 16  ;;  %v3518_v29 = vshll.u32 %v4753_v16, 16  ;;  %v4505_v30 = vld [vmem:[%s5069_s22 + $0x5c] sm:$0x1] }
 0x18b   : > { %3067 = vrot.lane.b32.xlu0 %v2976_v24, %s5015_s26  ;;  %v3504_v24 = vrot.slane %v3502_v4, 5  ;;  %v1561_v17 = vshll.u32 %v4505_v30, 16  ;;  %v4756_v60 = vld [vmem:[%s5069_s22 + $0xbc] sm:$0x1]  ;;  %v3525_v4 = vrot.slane %v3523_v55, 4 }
 0x18c   : > { %v2513_v40 = vpop.permute.xlu1 %2512  ;;  %v1544_v33 = vrot.slane %v1542_v12, 4  ;;  %v4613_v16 = vld [vmem:[%s5069_s22 + $0xa8] sm:$0xf] }
 0x18d   : > { %2556 = vst.msk [vmem:[#allocation2 + $0x50] sm:$0xf] %vm562_vm7, %v2513_v40  ;;  %v1789_v44 = vpop.permute.xlu0 %1788  ;;  %v3505_v38 = vor.u32 %v3504_v24, %v3501_v23  ;;  %v1563_v59 = vrot.slane %v1561_v17, 5  ;;  %v3529_v21 = vor.u32 %v3528_v5, %v3525_v4  ;;  %v4777_v23 = vld [vmem:[%s5069_s22 + $0xb0] sm:$0x1]  ;;  %v2466_v24 = vshll.u32 %v4614_v15, 16 }
 0x18e   : > { %1834 = vst.msk [vmem:[#allocation2 + $0xc] sm:$0xf] %vm1830_vm15, %v1789_v44  ;;  %3233 = vrot.lane.b32.xlu1 %v3192_v32, %s5016_s27  ;;  %v1557_v32 = vrot.slane %v1555_v20, 4  ;;  %v3520_v44 = vrot.slane %v3518_v29, 5  ;;  %v2460_v28 = vshll.u32 %v4613_v16, 16  ;;  %v4541_v4 = vrot.slane %v4527_v56, 9 }
 0x18f   : > { %3071 = vrot.lane.b32.xlu0 %v3000_v41, %s5015_s26  ;;  %v3506_v54 = vrot.slane %v3505_v38, 4  ;;  %v4592_v17 = vld [vmem:[%s5069_s22 + $0xac] sm:$0xf] }
 0x190   : > { %v3767_v52 = vpop.permute.xlu1 %3766  ;;  %v1558_v46 = vor.u32 %v1557_v32, %v6087_v31  ;;  %2285 = vst.msk [vmem:[#allocation2 + $0x74] sm:$0xf] %vm278_vm6, %v4592_v17 }
 0x191   : > { %3812 = vst.msk [vmem:[#allocation2 + $0x48] sm:$0xf] %vm1830_vm15, %v3767_v52  ;;  %v2515_v57 = vpop.permute.xlu0 %2514  ;;  %v4971_v58 = vld [vmem:[#allocation2 + $0x40] sm:$0xff]  }
 0x192   : > { %2557 = vst.msk [vmem:[#allocation2 + $0x54] sm:$0xf] %vm562_vm7, %v2515_v57  ;;  %3237 = vrot.lane.b32.xlu1 %v3199_v47, %s5016_s27  ;;  %4915 = vmatprep.mubr.msk.bf16.mxu1 %vm1923_vm0, %v4971_v58  ;;  %v1548_v47 = vor.u32 %v1547_v35, %v1544_v33  ;;  %v3521_v58 = vsel %vm5080_vm2, %v3516_v43, %v3520_v44  ;;  %v1559_v61 = vrot.slane %v1558_v46, 4  ;;  %v3530_v35 = vrot.slane %v3529_v21, 4  ;;  %v4618_v21 = vld [vmem:[%s5069_s22 + $0xbc] sm:$0x1] }
 0x193   : > { %3235 = vrot.lane.b32.xlu0 %v3195_v48, %s5016_s27  ;;  %v4525_v48 = vld [vmem:[%s5069_s22 + $0x4c] sm:$0xf]  ;;  %v2462_v44 = vrot.slane %v2460_v28, 5 }
 0x194   : > { %v2517_v1 = vpop.permute.xlu1 %2516  ;;  %v1756_v50 = vrot.slane %v4525_v48, 5  ;;  %v1549_v62 = vrot.slane %v1548_v47, 4  ;;  %v4615_v48 = vld [vmem:[%s5069_s22 + $0xb0] sm:$0x1] }
 0x195   : > { %2558 = vst.msk [vmem:[#allocation2 + $0x58] sm:$0xf] %vm562_vm7, %v2517_v1  ;;  %v3769_v7 = vpop.permute.xlu0 %3768  ;;  %v4972_v8 = vld [vmem:[#allocation2 + $0x8] sm:$0xff]  }
 0x196   : > { %3813 = vst.msk [vmem:[#allocation2 + $0x4c] sm:$0xf] %vm1830_vm15, %v3769_v7  ;;  %3330 = vrot.lane.b32.xlu1 %v4731_v0, %s5017_s28  ;;  %4894 = vmatmul.mubr.msk.bf16.vlgmr.msra.gmra.mxu0 %vm1923_vm0, %v4972_v8  ;;  %v3538_v0 = vrot.slane %v3536_v51, 4  ;;  %v4524_v7 = vld [vmem:[%s5069_s22 + $0x48] sm:$0xe]  ;;  %v1758_v8 = vrot.slane %v1756_v50, 4  ;;  %v1554_v20 = vsel %vm5080_vm2, %v1549_v62, %v6087_v31  ;;  %v3535_v51 = vsel %vm5080_vm2, %v3530_v35, %v6109_v63 }
 0x197   : > { %3239 = vrot.lane.b32.xlu0 %v3202_v2, %s5016_s27  ;;  %v3511_v2 = vsel %vm5080_vm2, %v3506_v54, %v6074_v14  ;;  %v3542_v14 = vshll.u32 %v4756_v60, 16  ;;  %v4540_v12 = vrot.slane %v4524_v7, 9  ;;  %v4591_v54 = vld [vmem:[%s5069_s22 + $0xa8] sm:$0xf] }
 0x198   : > { %v2681_v19 = vpop.permute.xlu1 %2680  ;;  %v3539_v13 = vor.u32 %v3538_v0, %v6109_v63  ;;  %v1760_v29 = vsel %vm5149_vm5, %v1758_v8, %v1759_v11  ;;  %2284 = vst.msk [vmem:[#allocation2 + $0x70] sm:$0xf] %vm278_vm6, %v4591_v54  ;;  %v4779_v0 = vld [vmem:[%s5069_s22 + $0xb8] sm:$0xf]  ;;  %v4642_v54 = vld [vmem:[%s5069_s22 + $0xbc] sm:$0x1] }
 0x199   : > { %2724 = vst.msk [vmem:[#allocation2 + $0x50] sm:$0xf] %vm734_vm8, %v2681_v19  ;;  %v2519_v25 = vpop.permute.xlu0 %2518  ;;  %v3544_v31 = vrot.slane %v3542_v14, 5  ;;  %v1757_v33 = vsel %vm5149_vm5, %v4540_v12, %v1756_v50  ;;  %v2476_v50 = vshll.u32 %v4615_v48, 16  ;;  %v3743_v11 = vrot.slane %v4779_v0, 5 }
 0x19a   : > { %2559 = vst.msk [vmem:[#allocation2 + $0x5c] sm:$0xf] %vm562_vm7, %v2519_v25  ;;  %1354 = vrot.lane.b32.xlu1 %v4483_v9, %s5017_s28  ;;  %v6121_v9 = vld [vmem:[%s5069_s22 + $0xac] sm:$0xf]  ;;  %v2470_v25 = vshrl.u32 %v4614_v15, 16  ;;  %v3540_v30 = vrot.slane %v3539_v13, 4 }
 0x19b   : > { %3332 = vrot.lane.b32.xlu0 %v4732_v10, %s5017_s28  ;;  %v1564_v10 = vsel %vm5080_vm2, %v1559_v61, %v1563_v59  ;;  %v3736_v22 = vrot.slane %v6121_v9, 5  ;;  %v2478_v9 = vrot.slane %v2476_v50, 5  ;;  %v4780_v14 = vld [vmem:[%s5069_s22 + $0xbc] sm:$0x1]  ;;  %v3745_v28 = vrot.slane %v3743_v11, 4 }
 0x19c   : > { %v2685_v36 = vpop.permute.xlu1 %2684  ;;  %v2472_v42 = vrot.slane %v2470_v25, 4  ;;  %v4778_v25 = vld [vmem:[%s5069_s22 + $0xb4] sm:$0xe]  ;;  %v4637_v48 = vld [vmem:[%s5069_s22 + $0xa8] sm:$0xe] }
 0x19d   : > { %2726 = vst.msk [vmem:[#allocation2 + $0x58] sm:$0xf] %vm734_vm8, %v2685_v36  ;;  %v2683_v40 = vpop.permute.xlu0 %2682  ;;  %v4975_v41 = vld [vmem:[#allocation2 + $0x48] sm:$0xff]   ;;  %v3738_v39 = vrot.slane %v3736_v22, 4  ;;  %v4792_v35 = vrot.slane %v4778_v25, 9 }
 0x19e   : > { %2725 = vst.msk [vmem:[#allocation2 + $0x54] sm:$0xf] %vm734_vm8, %v2683_v40  ;;  %1631 = vrot.lane.b32.xlu1 %v1540_v26, %s5018_s29  ;;  %4916 = vmatmul.mubr.msk.bf16.vlgmr.msra.gmra.mxu1 %vm1923_vm0, %v4975_v41  ;;  %v2457_v26 = vshrl.u32 %v4613_v16, 16  ;;  %v4775_v36 = vld [vmem:[%s5069_s22 + $0xa8] sm:$0xe]  ;;  %v3739_v40 = vrot.slane %v4777_v23, 5 }
 0x19f   : > { %1629 = vrot.lane.b32.xlu0 %v1530_v37, %s5018_s29  ;;  %v4528_v37 = vld [vmem:[%s5069_s22 + $0x58] sm:$0xf]  ;;  %v6147_v41 = vrot.slane %v2466_v24, 5  ;;  %v4791_v46 = vrot.slane %v4775_v36, 9  ;;  %v4593_v23 = vld [vmem:[%s5069_s22 + $0xb4] sm:$0xf]  ;;  %v3744_v17 = vsel %vm5149_vm5, %v4792_v35, %v3743_v11 }
 0x1a0   : > { %v2778_v52 = vpop.permute.xlu1 %2777  ;;  %v2459_v43 = vrot.slane %v2457_v26, 4  ;;  %v1763_v47 = vrot.slane %v4528_v37, 5  ;;  %2286 = vst.msk [vmem:[#allocation2 + $0x78] sm:$0xf] %vm278_vm6, %v4593_v23  ;;  %v4638_v37 = vld [vmem:[%s5069_s22 + $0xac] sm:$0xf] }
 0x1a1   : > { %2821 = vst.msk [vmem:[#allocation2 + $0x50] sm:$0xf] %vm832_vm9, %v2778_v52  ;;  %v2687_v57 = vpop.permute.xlu0 %2686  ;;  %v4529_v52 = vld [vmem:[%s5069_s22 + $0x5c] sm:$0x1]  ;;  %v2473_v59 = vor.u32 %v2472_v42, %v6147_v41  ;;  %v3737_v60 = vsel %vm5149_vm5, %v4791_v46, %v3736_v22  ;;  %v4639_v46 = vld [vmem:[%s5069_s22 + $0xb0] sm:$0x1] }
 0x1a2   : > { %2727 = vst.msk [vmem:[#allocation2 + $0x5c] sm:$0xf] %vm734_vm8, %v2687_v57  ;;  %3336 = vrot.lane.b32.xlu1 %v4734_v45, %s5017_s28  ;;  %v3545_v45 = vsel %vm5080_vm2, %v3540_v30, %v3544_v31  ;;  %v4616_v57 = vld [vmem:[%s5069_s22 + $0xb4] sm:$0xf]  ;;  %v2463_v61 = vor.u32 %v2462_v44, %v2459_v43  ;;  %v1765_v62 = vrot.slane %v1763_v47, 4  ;;  %v1766_v63 = vrot.slane %v4529_v52, 5 }
 0x1a3   : > { %3334 = vrot.lane.b32.xlu0 %v4733_v53, %s5017_s28  ;;  %v4617_v53 = vld [vmem:[%s5069_s22 + $0xb8] sm:$0xf]  ;;  %v2481_v5 = vshrl.u32 %v4616_v57, 16  ;;  %v2474_v8 = vrot.slane %v2473_v59, 4  ;;  %v1764_v12 = vsel %vm5149_vm5, %v4541_v4, %v1763_v47  ;;  %v2500_v31 = vshll.u32 %v4618_v21, 16 }
 0x1a4   : > { %v2782_v1 = vpop.permute.xlu1 %2781  ;;  %v1767_v13 = vsel %vm5149_vm5, %v1765_v62, %v1766_v63  ;;  %v4641_v43 = vld [vmem:[%s5069_s22 + $0xb8] sm:$0xf]  ;;  %v2670_v63 = vrot.slane %v4642_v54, 5 }
 0x1a5   : > { %2823 = vst.msk [vmem:[#allocation2 + $0x58] sm:$0xf] %vm832_vm9, %v2782_v1  ;;  %v2780_v6 = vpop.permute.xlu0 %2779  ;;  %v2490_v1 = vshll.u32 %v4617_v53, 16  ;;  %v2479_v26 = vsel %vm5080_vm2, %v2474_v8, %v2478_v9  ;;  %v2502_v42 = vrot.slane %v2500_v31, 5  ;;  %v4686_v59 = vld [vmem:[%s5069_s22 + $0xb8] sm:$0xf] }
 0x1a6   : > { %2822 = vst.msk [vmem:[#allocation2 + $0x54] sm:$0xf] %vm832_vm9, %v2780_v6  ;;  %3612 = vrot.lane.b32.xlu1 %v3521_v58, %s5018_s29  ;;  %v3740_v58 = vsel %vm5149_vm5, %v3738_v39, %v3739_v40  ;;  %v2484_v6 = vshll.u32 %v4616_v57, 16  ;;  %v4688_v9 = vld [vmem:[%s5069_s22 + $0xc0] sm:$0xf] }
 0x1a7   : > { %3610 = vrot.lane.b32.xlu0 %v3511_v2, %s5018_s29  ;;  %v2494_v2 = vshrl.u32 %v4617_v53, 16  ;;  %v6181_v15 = vrot.slane %v2490_v1, 5  ;;  %v2663_v53 = vrot.slane %v4639_v46, 5  ;;  %v4663_v31 = vld [vmem:[%s5069_s22 + $0xb4] sm:$0xf] }
 0x1a8   : > { %v3058_v18 = vpop.permute.xlu1 %3057  ;;  %v2486_v22 = vrot.slane %v2484_v6, 5  ;;  %v4710_v46 = vld [vmem:[%s5069_s22 + $0xb8] sm:$0xf] }
 0x1a9   : > { %3101 = vst.msk [vmem:[#allocation2 + $0x50] sm:$0xf] %vm1113_vm10, %v3058_v18  ;;  %v2784_v19 = vpop.permute.xlu0 %2783  ;;  %v2496_v16 = vrot.slane %v2494_v2, 4  ;;  %v4594_v18 = vld [vmem:[%s5069_s22 + $0xb8] sm:$0xf]  ;;  %v3011_v2 = vshll.u32 %v4686_v59, 16 }
 0x1aa   : > { %2824 = vst.msk [vmem:[#allocation2 + $0x5c] sm:$0xf] %vm832_vm9, %v2784_v19  ;;  %1635 = vrot.lane.b32.xlu1 %v1564_v10, %s5018_s29  ;;  %v2464_v10 = vrot.slane %v2463_v61, 4  ;;  %v2483_v19 = vrot.slane %v2481_v5, 4  ;;  %v4685_v61 = vld [vmem:[%s5069_s22 + $0xb4] sm:$0xf] }
 0x1ab   : > { %1633 = vrot.lane.b32.xlu0 %v1554_v20, %s5018_s29  ;;  %2287 = vst.msk [vmem:[#allocation2 + $0x7c] sm:$0xf] %vm278_vm6, %v4594_v18  ;;  %v2497_v30 = vor.u32 %v2496_v16, %v6181_v15  ;;  %v3002_v5 = vshrl.u32 %v4685_v61, 16  ;;  %v3005_v6 = vshll.u32 %v4685_v61, 16 }
 0x1ac   : > { %v3062_v32 = vpop.permute.xlu1 %3061  ;;  %v2487_v36 = vor.u32 %v2486_v22, %v2483_v19  ;;  %v3026_v19 = vshrl.u32 %v4688_v9, 16  ;;  %v3029_v22 = vshll.u32 %v4688_v9, 16  ;;  %v4507_v9 = vld [vmem:[%s5069_s22 + $0x64] sm:$0xf] }
 0x1ad   : > { %3103 = vst.msk [vmem:[#allocation2 + $0x58] sm:$0xf] %vm1113_vm10, %v3062_v32  ;;  %v3060_v38 = vpop.permute.xlu0 %3059  ;;  %v2498_v40 = vrot.slane %v2497_v30, 4  ;;  %v3007_v21 = vrot.slane %v3005_v6, 5 }
 0x1ae   : > { %3102 = vst.msk [vmem:[#allocation2 + $0x54] sm:$0xf] %vm1113_vm10, %v3060_v38  ;;  %1800 = vrot.lane.b32.xlu1 %v1760_v29, %s5019_s6  ;;  %v3746_v29 = vrot.slane %v4780_v14, 5  ;;  %v3028_v35 = vrot.slane %v3026_v19, 4 }
 0x1af   : > { %1798 = vrot.lane.b32.xlu0 %v1757_v33, %s5019_s6  ;;  %v2469_v33 = vsel %vm5080_vm2, %v2464_v10, %v6147_v41  ;;  %v2660_v41 = vrot.slane %v4638_v37, 5 }
 0x1b0   : > { %v3226_v49 = vpop.permute.xlu1 %3225  ;;  %v3747_v39 = vsel %vm5149_vm5, %v3745_v28, %v3746_v29 }
 0x1b1   : > { %3269 = vst.msk [vmem:[#allocation2 + $0x50] sm:$0xf] %vm1282_vm11, %v3226_v49  ;;  %v3064_v55 = vpop.permute.xlu0 %3063  ;;  %v2667_v49 = vrot.slane %v4641_v43, 5  ;;  %v2662_v52 = vrot.slane %v2660_v41, 4 }
 0x1b2   : > { %3104 = vst.msk [vmem:[#allocation2 + $0x5c] sm:$0xf] %vm1113_vm10, %v3064_v55  ;;  %3616 = vrot.lane.b32.xlu1 %v3545_v45, %s5018_s29  ;;  %v2488_v45 = vrot.slane %v2487_v36, 4  ;;  %v4640_v55 = vld [vmem:[%s5069_s22 + $0xb4] sm:$0xe]  ;;  %v3031_v36 = vrot.slane %v3029_v22, 5 }
 0x1b3   : > { %3614 = vrot.lane.b32.xlu0 %v3535_v51, %s5018_s29  ;;  %v2503_v51 = vsel %vm5080_vm2, %v2498_v40, %v2502_v42  ;;  %v2669_v62 = vrot.slane %v2667_v49, 4  ;;  %v4650_v0 = vrot.slane %v4640_v55, 9  ;;  %v2664_v1 = vsel %vm5149_vm5, %v2662_v52, %v2663_v53 }
 0x1b4   : > { %v3230_v3 = vpop.permute.xlu1 %3229  ;;  %v2493_v57 = vsel %vm5080_vm2, %v2488_v45, %v6181_v15  ;;  %v3032_v45 = vor.u32 %v3031_v36, %v3028_v35  ;;  %v3205_v52 = vrot.slane %v4710_v46, 5 }
 0x1b5   : > { %3271 = vst.msk [vmem:[#allocation2 + $0x58] sm:$0xf] %vm1282_vm11, %v3230_v3  ;;  %v3228_v7 = vpop.permute.xlu0 %3227  ;;  %v3015_v3 = vshrl.u32 %v4686_v59, 16  ;;  %v2671_v10 = vsel %vm5149_vm5, %v2669_v62, %v2670_v63  ;;  %v2668_v11 = vsel %vm5149_vm5, %v4650_v0, %v2667_v49  ;;  %v4709_v59 = vld [vmem:[%s5069_s22 + $0xb4] sm:$0xe] }
 0x1b6   : > { %3270 = vst.msk [vmem:[#allocation2 + $0x54] sm:$0xf] %vm1282_vm11, %v3228_v7  ;;  %3780 = vrot.lane.b32.xlu1 %v3740_v58, %s5019_s6  ;;  %v4649_v58 = vrot.slane %v4637_v48, 9  ;;  %v4689_v7 = vld [vmem:[%s5069_s22 + $0xc4] sm:$0xf]  ;;  %v3033_v55 = vrot.slane %v3032_v45, 4 }
 0x1b7   : > { %3778 = vrot.lane.b32.xlu0 %v3737_v60, %s5019_s6  ;;  %v3017_v14 = vrot.slane %v3015_v3, 4  ;;  %v3035_v15 = vshll.u32 %v4689_v7, 16  ;;  %v3039_v16 = vshrl.u32 %v4689_v7, 16  ;;  %v3207_v61 = vrot.slane %v3205_v52, 4  ;;  %v4735_v45 = vld [vmem:[%s5069_s22 + $0xc0] sm:$0xf] }
 0x1b8   : > { %v3323_v20 = vpop.permute.xlu1 %3322  ;;  %v2661_v4 = vsel %vm5149_vm5, %v4649_v58, %v2660_v41 }
 0x1b9   : > { %3366 = vst.msk [vmem:[#allocation2 + $0x50] sm:$0xf] %vm1380_vm13, %v3323_v20  ;;  %v3232_v24 = vpop.permute.xlu0 %3231  ;;  %v4687_v20 = vld [vmem:[%s5069_s22 + $0xbc] sm:$0x1]  ;;  %v3037_v28 = vrot.slane %v3035_v15, 5  ;;  %v3041_v29 = vrot.slane %v3039_v16, 4 }
 0x1ba   : > { %3272 = vst.msk [vmem:[#allocation2 + $0x5c] sm:$0xf] %vm1282_vm11, %v3232_v24  ;;  %1804 = vrot.lane.b32.xlu1 %v1767_v13, %s5019_s6  ;;  %v3013_v13 = vrot.slane %v3011_v2, 5  ;;  %v4664_v24 = vld [vmem:[%s5069_s22 + $0xb8] sm:$0xf] }
 0x1bb   : > { %1802 = vrot.lane.b32.xlu0 %v1764_v12, %s5019_s6  ;;  %v3004_v12 = vrot.slane %v3002_v5, 4  ;;  %v3042_v41 = vor.u32 %v3041_v29, %v3037_v28  ;;  %v3038_v0 = vsel %vm5080_vm2, %v3033_v55, %v3037_v28  ;;  %v4713_v2 = vld [vmem:[%s5069_s22 + $0xc4] sm:$0xf] }
 0x1bc   : > { %v1622_v32 = vpop.permute.xlu1 %1621  ;;  %v3018_v25 = vor.u32 %v3017_v14, %v3013_v13  ;;  %v3212_v5 = vrot.slane %v4713_v2, 5  ;;  %v4485_v14 = vld [vmem:[%s5069_s22 + $0x64] sm:$0xf] }
 0x1bd   : > { %1666 = vst.msk [vmem:[#allocation2 + $0x10] sm:$0xf] %vm1661_vm14, %v1622_v32  ;;  %v3325_v38 = vpop.permute.xlu0 %3324  ;;  %v3008_v32 = vor.u32 %v3007_v21, %v3004_v12  ;;  %v3043_v49 = vrot.slane %v3042_v41, 4  ;;  %v4484_v21 = vld [vmem:[%s5069_s22 + $0x60] sm:$0xf] }
 0x1be   : > { %3367 = vst.msk [vmem:[#allocation2 + $0x54] sm:$0xf] %vm1380_vm13, %v3325_v38  ;;  %2530 = vrot.lane.b32.xlu1 %v2479_v26, %s5012_s23  ;;  %v3021_v26 = vshll.u32 %v4687_v20, 16  ;;  %v4666_v38 = vld [vmem:[%s5069_s22 + $0xc4] sm:$0xf]  ;;  %v3019_v40 = vrot.slane %v3018_v25, 4 }
 0x1bf   : > { %2528 = vrot.lane.b32.xlu0 %v2469_v33, %s5012_s23  ;;  %v4690_v33 = vld [vmem:[%s5069_s22 + $0xc8] sm:$0x1]  ;;  %v3214_v15 = vrot.slane %v3212_v5, 4  ;;  %v1579_v20 = vshrl.u32 %v4507_v9, 16 }
 0x1c0   : > { %v3327_v44 = vpop.permute.xlu1 %3326  ;;  %v3023_v42 = vrot.slane %v3021_v26, 5  ;;  %v3045_v43 = vshll.u32 %v4690_v33, 16  ;;  %v4508_v33 = vld [vmem:[%s5069_s22 + $0x68] sm:$0x1] }
 0x1c1   : > { %3368 = vst.msk [vmem:[#allocation2 + $0x58] sm:$0xf] %vm1380_vm13, %v3327_v44  ;;  %v1624_v47 = vpop.permute.xlu0 %1623  ;;  %v1581_v29 = vrot.slane %v1579_v20, 4  ;;  %v4760_v20 = vld [vmem:[%s5069_s22 + $0xcc] sm:$0xf] }
 0x1c2   : > { %1667 = vst.msk [vmem:[#allocation2 + $0x14] sm:$0xf] %vm1661_vm14, %v1624_v47  ;;  %3784 = vrot.lane.b32.xlu1 %v3747_v39, %s5019_s6  ;;  %v4665_v39 = vld [vmem:[%s5069_s22 + $0xc0] sm:$0xf]  ;;  %v3024_v48 = vsel %vm5080_vm2, %v3019_v40, %v3023_v42  ;;  %v4736_v42 = vld [vmem:[%s5069_s22 + $0xc4] sm:$0xf] }
 0x1c3   : > { %3782 = vrot.lane.b32.xlu0 %v3744_v17, %s5019_s6  ;;  %v3009_v17 = vrot.slane %v3008_v32, 4 }
 0x1c4   : > { %v3603_v56 = vpop.permute.xlu1 %3602 }
 0x1c5   : > { %3646 = vst.msk [vmem:[#allocation2 + $0x50] sm:$0xf] %vm1661_vm14, %v3603_v56  ;;  %v3329_v50 = vpop.permute.xlu0 %3328  ;;  %v3014_v54 = vsel %vm5080_vm2, %v3009_v17, %v3013_v13  ;;  %v4711_v56 = vld [vmem:[%s5069_s22 + $0xbc] sm:$0x1]  ;;  %v4506_v13 = vld [vmem:[%s5069_s22 + $0x60] sm:$0xf] }
 0x1c6   : > { %3369 = vst.msk [vmem:[#allocation2 + $0x5c] sm:$0xf] %vm1380_vm13, %v3329_v50  ;;  %2534 = vrot.lane.b32.xlu1 %v2503_v51, %s5012_s23  ;;  %v3047_v51 = vrot.slane %v3045_v43, 5  ;;  %v3208_v62 = vrot.slane %v4711_v56, 5  ;;  %v1566_v22 = vshrl.u32 %v4506_v13, 16  ;;  %v1585_v43 = vshll.u32 %v4508_v33, 16 }
 0x1c7   : > { %2532 = vrot.lane.b32.xlu0 %v2493_v57, %s5012_s23  ;;  %v3574_v33 = vshll.u32 %v4760_v20, 16 }
 0x1c8   : > { %v1626_v60 = vpop.permute.xlu1 %1625  ;;  %v3048_v50 = vsel %vm5080_vm2, %v3043_v49, %v3047_v51  ;;  %v1568_v35 = vrot.slane %v1566_v22, 4  ;;  %v4509_v49 = vld [vmem:[%s5069_s22 + $0x6c] sm:$0xf] }
 0x1c9   : > { %1668 = vst.msk [vmem:[#allocation2 + $0x18] sm:$0xf] %vm1661_vm14, %v1626_v60  ;;  %v3605_v8 = vpop.permute.xlu0 %3604  ;;  %v3209_v60 = vsel %vm5149_vm5, %v3207_v61, %v3208_v62  ;;  %v1590_v61 = vshrl.u32 %v4509_v49, 16  ;;  %v1593_v62 = vshll.u32 %v4509_v49, 16  ;;  %v4530_v49 = vld [vmem:[%s5069_s22 + $0x60] sm:$0xe] }
 0x1ca   : > { %3647 = vst.msk [vmem:[#allocation2 + $0x54] sm:$0xf] %vm1661_vm14, %v3605_v8  ;;  %2698 = vrot.lane.b32.xlu1 %v2664_v1, %s5013_s24  ;;  %v4721_v1 = vrot.slane %v4709_v59, 9  ;;  %v4712_v8 = vld [vmem:[%s5069_s22 + $0xc0] sm:$0xe]  ;;  %v1587_v59 = vrot.slane %v1585_v43, 5 }
 0x1cb   : > { %2696 = vrot.lane.b32.xlu0 %v2661_v4, %s5013_s24  ;;  %v4714_v4 = vld [vmem:[%s5069_s22 + $0xc8] sm:$0x1]  ;;  %v4722_v19 = vrot.slane %v4712_v8, 9 }
 0x1cc   : > { %v1791_v18 = vpop.permute.xlu1 %1790  ;;  %v3206_v7 = vsel %vm5149_vm5, %v4721_v1, %v3205_v52  ;;  %v3215_v16 = vrot.slane %v4714_v4, 5 }
 0x1cd   : > { %1835 = vst.msk [vmem:[#allocation2 + $0x10] sm:$0xf] %vm1830_vm15, %v1791_v18  ;;  %v1628_v23 = vpop.permute.xlu0 %1627  ;;  %v1575_v18 = vshll.u32 %v4507_v9, 16  ;;  %v3213_v32 = vsel %vm5149_vm5, %v4722_v19, %v3212_v5  ;;  %v4511_v9 = vld [vmem:[%s5069_s22 + $0x74] sm:$0x1] }
 0x1ce   : > { %1669 = vst.msk [vmem:[#allocation2 + $0x1c] sm:$0xf] %vm1661_vm14, %v1628_v23  ;;  %2702 = vrot.lane.b32.xlu1 %v2671_v10, %s5013_s24  ;;  %v1569_v23 = vshll.u32 %v4506_v13, 16  ;;  %v3216_v26 = vsel %vm5149_vm5, %v3214_v15, %v3215_v16  ;;  %v4761_v16 = vld [vmem:[%s5069_s22 + $0xd0] sm:$0xf]  ;;  %v1609_v22 = vshll.u32 %v4511_v9, 16 }
 0x1cf   : > { %2700 = vrot.lane.b32.xlu0 %v2668_v11, %s5013_s24  ;;  %v6305_v28 = vrot.slane %v1575_v18, 5  ;;  %s6468_s24 = scalar_lea.vmem %s6677_s2, %s4832_s21 }
 0x1d0   : > { %v3607_v30 = vpop.permute.xlu1 %3606  ;;  %v1571_v36 = vrot.slane %v1569_v23, 5  ;;  %v4738_v23 = vld [vmem:[%s5069_s22 + $0xd0] sm:$0xf] }
 0x1d1   : > { %3648 = vst.msk [vmem:[#allocation2 + $0x58] sm:$0xf] %vm1661_vm14, %v3607_v30  ;;  %v1793_v37 = vpop.permute.xlu0 %1792  ;;  %v4758_v30 = vld [vmem:[%s5069_s22 + $0xc4] sm:$0xf]  ;;  %v1582_v41 = vor.u32 %v1581_v29, %v6305_v28 }
 0x1d2   : > { %1836 = vst.msk [vmem:[#allocation2 + $0x14] sm:$0xf] %vm1830_vm15, %v1793_v37  ;;  %2795 = vrot.lane.b32.xlu1 %v4664_v24, %s5014_s25  ;;  %v3560_v40 = vshrl.u32 %v4758_v30, 16  ;;  %v1572_v46 = vor.u32 %v1571_v36, %v1568_v35 }
 0x1d3   : > { %2793 = vrot.lane.b32.xlu0 %v4663_v31, %s5014_s25 }
 0x1d4   : > { %v3771_v44 = vpop.permute.xlu1 %3770  ;;  %v3562_v55 = vrot.slane %v3560_v40, 4  ;;  %v1573_v1 = vrot.slane %v1572_v46, 4 }
 0x1d5   : > { %3814 = vst.msk [vmem:[#allocation2 + $0x50] sm:$0xf] %vm1830_vm15, %v3771_v44  ;;  %v3609_v47 = vpop.permute.xlu0 %3608  ;;  %v4510_v44 = vld [vmem:[%s5069_s22 + $0x70] sm:$0xf] }
 0x1d6   : > { %3649 = vst.msk [vmem:[#allocation2 + $0x5c] sm:$0xf] %vm1661_vm14, %v3609_v47  ;;  %2799 = vrot.lane.b32.xlu1 %v4666_v38, %s5014_s25  ;;  %v4757_v38 = vld [vmem:[%s5069_s22 + $0xc0] sm:$0xf]  ;;  %v1599_v56 = vshll.u32 %v4510_v44, 16 }
 0x1d7   : > { %2797 = vrot.lane.b32.xlu0 %v4665_v39, %s5014_s25  ;;  %v3556_v39 = vshll.u32 %v4758_v30, 16  ;;  %v3547_v47 = vshrl.u32 %v4757_v38, 16 }
 0x1d8   : > { %v1795_v53 = vpop.permute.xlu1 %1794 }
 0x1d9   : > { %1837 = vst.msk [vmem:[#allocation2 + $0x18] sm:$0xf] %vm1830_vm15, %v1795_v53  ;;  %v3773_v57 = vpop.permute.xlu0 %3772  ;;  %v4976_v58 = vld [vmem:[#allocation2 + $0x10] sm:$0xff]   ;;  %v3549_v2 = vrot.slane %v3547_v47, 4  ;;  %v3576_v47 = vrot.slane %v3574_v33, 5 }
 0x1da   : > { %3815 = vst.msk [vmem:[#allocation2 + $0x54] sm:$0xf] %vm1830_vm15, %v3773_v57  ;;  %3075 = vrot.lane.b32.xlu1 %v3024_v48, %s5015_s26  ;;  %4897 = vmatprep.mubr.msk.bf16.mxu0 %vm1923_vm0, %v4976_v58  ;;  %v3550_v48 = vshll.u32 %v4757_v38, 16  ;;  %v4487_v53 = vld [vmem:[%s5069_s22 + $0x70] sm:$0xf]  ;;  %v1603_v57 = vshrl.u32 %v4510_v44, 16 }
 0x1db   : > { %3073 = vrot.lane.b32.xlu0 %v3014_v54, %s5015_s26  ;;  %v6325_v54 = vrot.slane %v3556_v39, 5  ;;  %v1583_v58 = vrot.slane %v1582_v41, 4  ;;  %v1611_v38 = vrot.slane %v1609_v22, 5 }
 0x1dc   : > { %v2521_v63 = vpop.permute.xlu1 %2520 }
 0x1dd   : > { %2560 = vst.msk [vmem:[#allocation2 + $0x60] sm:$0xf] %vm562_vm7, %v2521_v63  ;;  %v1797_v3 = vpop.permute.xlu0 %1796  ;;  %v3563_v4 = vor.u32 %v3562_v55, %v6325_v54  ;;  %v1588_v8 = vsel %vm5080_vm2, %v1583_v58, %v1587_v59  ;;  %v4542_v58 = vrot.slane %v4530_v49, 9 }
 0x1de   : > { %1838 = vst.msk [vmem:[#allocation2 + $0x1c] sm:$0xf] %vm1830_vm15, %v1797_v3  ;;  %3079 = vrot.lane.b32.xlu1 %v3048_v50, %s5015_s26  ;;  %v4759_v50 = vld [vmem:[%s5069_s22 + $0xc8] sm:$0x1]  ;;  %v3552_v3 = vrot.slane %v3550_v48, 5 }
 0x1df   : > { %3077 = vrot.lane.b32.xlu0 %v3038_v0, %s5015_s26  ;;  %v4486_v0 = vld [vmem:[%s5069_s22 + $0x6c] sm:$0xf]  ;;  %v3566_v5 = vshll.u32 %v4759_v50, 16  ;;  %v4782_v50 = vld [vmem:[%s5069_s22 + $0xc4] sm:$0xf] }
 0x1e0   : > { %v3775_v6 = vpop.permute.xlu1 %3774  ;;  %v3553_v15 = vor.u32 %v3552_v3, %v3549_v2 }
 0x1e1   : > { %3816 = vst.msk [vmem:[#allocation2 + $0x58] sm:$0xf] %vm1830_vm15, %v3775_v6  ;;  %v2523_v10 = vpop.permute.xlu0 %2522  ;;  %v4977_v11 = vld [vmem:[#allocation2 + $0x50] sm:$0xff]   ;;  %v6335_v6 = vrot.slane %v1599_v56, 5 }
 0x1e2   : > { %2561 = vst.msk [vmem:[#allocation2 + $0x64] sm:$0xf] %vm562_vm7, %v2523_v10  ;;  %3243 = vrot.lane.b32.xlu1 %v3209_v60, %s5016_s27  ;;  %4919 = vmatprep.mubr.msk.bf16.mxu1 %vm1923_vm0, %v4977_v11  ;;  %v1592_v10 = vrot.slane %v1590_v61, 4  ;;  %v1595_v11 = vrot.slane %v1593_v62, 5  ;;  %v3554_v30 = vrot.slane %v3553_v15, 4 }
 0x1e3   : > { %3241 = vrot.lane.b32.xlu0 %v3206_v7, %s5016_s27  ;;  %v1605_v7 = vrot.slane %v1603_v57, 4 }
 0x1e4   : > { %v2525_v12 = vpop.permute.xlu1 %2524  ;;  %v3559_v44 = vsel %vm5080_vm2, %v3554_v30, %v6325_v54 }
 0x1e5   : > { %2562 = vst.msk [vmem:[#allocation2 + $0x68] sm:$0xf] %vm562_vm7, %v2525_v12  ;;  %v3777_v24 = vpop.permute.xlu0 %3776  ;;  %v4978_v25 = vld [vmem:[#allocation2 + $0x18] sm:$0xff]   ;;  %v3564_v12 = vrot.slane %v3563_v4, 4  ;;  %v1606_v19 = vor.u32 %v1605_v7, %v6335_v6  ;;  %v4783_v4 = vld [vmem:[%s5069_s22 + $0xc8] sm:$0x1] }
 0x1e6   : > { %3817 = vst.msk [vmem:[#allocation2 + $0x5c] sm:$0xf] %vm1830_vm15, %v3777_v24  ;;  %1358 = vrot.lane.b32.xlu1 %v4485_v14, %s5017_s28  ;;  %4898 = vmatmul.mubr.msk.bf16.gmra.mxu0 %vm1923_vm0, %v4978_v25  ;;  %v1578_v14 = vsel %vm5080_vm2, %v1573_v1, %v6305_v28  ;;  %v4737_v24 = vld [vmem:[%s5069_s22 + $0xcc] sm:$0xf]  ;;  %v1596_v25 = vor.u32 %v1595_v11, %v1592_v10  ;;  %v3584_v28 = vshrl.u32 %v4761_v16, 16  ;;  %v3750_v1 = vrot.slane %v4782_v50, 5 }
 0x1e7   : > { %1356 = vrot.lane.b32.xlu0 %v4484_v21, %s5017_s28  ;;  %v3568_v21 = vrot.slane %v3566_v5, 5  ;;  %v4534_v5 = vld [vmem:[%s5069_s22 + $0x70] sm:$0xf]  ;;  %v4781_v7 = vld [vmem:[%s5069_s22 + $0xc0] sm:$0xe]  ;;  %v3753_v10 = vrot.slane %v4783_v4, 5 }
 0x1e8   : > { %v2689_v31 = vpop.permute.xlu1 %2688  ;;  %v1597_v39 = vrot.slane %v1596_v25, 4  ;;  %v3586_v41 = vrot.slane %v3584_v28, 4  ;;  %v3752_v9 = vrot.slane %v3750_v1, 4  ;;  %v1777_v11 = vrot.slane %v4534_v5, 5 }
 0x1e9   : > { %2728 = vst.msk [vmem:[#allocation2 + $0x60] sm:$0xf] %vm734_vm8, %v2689_v31  ;;  %v2527_v37 = vpop.permute.xlu0 %2526  ;;  %v4531_v31 = vld [vmem:[%s5069_s22 + $0x64] sm:$0xf]  ;;  %v3569_v36 = vsel %vm5080_vm2, %v3564_v12, %v3568_v21  ;;  %v4793_v15 = vrot.slane %v4781_v7, 9 }
 0x1ea   : > { %2563 = vst.msk [vmem:[#allocation2 + $0x6c] sm:$0xf] %vm562_vm7, %v2527_v37  ;;  %3247 = vrot.lane.b32.xlu1 %v3216_v26, %s5016_s27  ;;  %v3580_v26 = vshll.u32 %v4761_v16, 16  ;;  %v1607_v37 = vrot.slane %v1606_v19, 4  ;;  %v1770_v40 = vrot.slane %v4531_v31, 5  ;;  %v1602_v57 = vsel %vm5080_vm2, %v1597_v39, %v6335_v6 }
 0x1eb   : > { %3245 = vrot.lane.b32.xlu0 %v3213_v32, %s5016_s27  ;;  %v3571_v32 = vshrl.u32 %v4760_v20, 16  ;;  %v4535_v16 = vld [vmem:[%s5069_s22 + $0x74] sm:$0x1]  ;;  %v4533_v12 = vld [vmem:[%s5069_s22 + $0x6c] sm:$0xe]  ;;  %v3754_v21 = vsel %vm5149_vm5, %v3752_v9, %v3753_v10  ;;  %v1779_v27 = vrot.slane %v1777_v11, 4  ;;  %s254_s27 = scalar_lea.vmem %s6678_s3, %s6689_s15 }
 0x1ec   : > { %v2693_v17 = vpop.permute.xlu1 %2692  ;;  %v1771_v3 = vsel %vm5149_vm5, %v4542_v58, %v1770_v40  ;;  %v1780_v19 = vrot.slane %v4535_v16, 5  ;;  %v4543_v25 = vrot.slane %v4533_v12, 9 }
 0x1ed   : > { %2730 = vst.msk [vmem:[#allocation2 + $0x68] sm:$0xf] %vm734_vm8, %v2693_v17  ;;  %v2691_v51 = vpop.permute.xlu0 %2690  ;;  %v4979_v52 = vld [vmem:[#allocation2 + $0x58] sm:$0xff]   ;;  %v4532_v17 = vld [vmem:[%s5069_s22 + $0x68] sm:$0x1]  ;;  %v3573_v46 = vrot.slane %v3571_v32, 4 }
 0x1ee   : > { %2729 = vst.msk [vmem:[#allocation2 + $0x64] sm:$0xf] %vm734_vm8, %v2691_v51  ;;  %3340 = vrot.lane.b32.xlu1 %v4736_v42, %s5017_s28  ;;  %4920 = vmatmul.mubr.msk.bf16.gmra.mxu1 %vm1923_vm0, %v4979_v52  ;;  %v3582_v42 = vrot.slane %v3580_v26, 5  ;;  %v1612_v51 = vsel %vm5080_vm2, %v1607_v37, %v1611_v38  ;;  %v1772_v52 = vrot.slane %v1770_v40, 4  ;;  %v4786_v26 = vld [vmem:[%s5069_s22 + $0xd4] sm:$0x1]  ;;  %v1781_v30 = vsel %vm5149_vm5, %v1779_v27, %v1780_v19 }
 0x1ef   : > { %3338 = vrot.lane.b32.xlu0 %v4735_v45, %s5017_s28  ;;  %v4762_v45 = vld [vmem:[%s5069_s22 + $0xd4] sm:$0x1]  ;;  %v3577_v59 = vor.u32 %v3576_v47, %v3573_v46  ;;  %v3760_v32 = vrot.slane %v4786_v26, 5 }
 0x1f0   : > { %v2786_v63 = vpop.permute.xlu1 %2785  ;;  %v3587_v54 = vor.u32 %v3586_v41, %v3582_v42  ;;  %v3590_v55 = vshll.u32 %v4762_v45, 16 }
 0x1f1   : > { %2825 = vst.msk [vmem:[#allocation2 + $0x60] sm:$0xf] %vm832_vm9, %v2786_v63  ;;  %v2695_v60 = vpop.permute.xlu0 %2694 }
 0x1f2   : > { %2731 = vst.msk [vmem:[#allocation2 + $0x6c] sm:$0xf] %vm734_vm8, %v2695_v60  ;;  %1362 = vrot.lane.b32.xlu1 %v4487_v53, %s5017_s28  ;;  %v1773_v53 = vrot.slane %v4532_v17, 5  ;;  %v3588_v63 = vrot.slane %v3587_v54, 4  ;;  %v3578_v60 = vrot.slane %v3577_v59, 4 }
 0x1f3   : > { %1360 = vrot.lane.b32.xlu0 %v4486_v0, %s5017_s28  ;;  %v3592_v0 = vrot.slane %v3590_v55, 5 }
 0x1f4   : > { %v2790_v13 = vpop.permute.xlu1 %2789  ;;  %v1774_v62 = vsel %vm5149_vm5, %v1772_v52, %v1773_v53 }
 0x1f5   : > { %2827 = vst.msk [vmem:[#allocation2 + $0x68] sm:$0xf] %vm832_vm9, %v2790_v13  ;;  %v2788_v18 = vpop.permute.xlu0 %2787 }
 0x1f6   : > { %2826 = vst.msk [vmem:[#allocation2 + $0x64] sm:$0xf] %vm832_vm9, %v2788_v18  ;;  %1639 = vrot.lane.b32.xlu1 %v1588_v8, %s5018_s29  ;;  %v3593_v8 = vsel %vm5080_vm2, %v3588_v63, %v3592_v0  ;;  %v4785_v18 = vld [vmem:[%s5069_s22 + $0xd0] sm:$0xf] }
 0x1f7   : > { %1637 = vrot.lane.b32.xlu0 %v1578_v14, %s5018_s29  ;;  %v3583_v14 = vsel %vm5080_vm2, %v3578_v60, %v3582_v42  ;;  %v3757_v22 = vrot.slane %v4785_v18, 5  ;;  %vm2162_vm2 = vcmask 261120  }
 0x1f8   : > { %v3066_v29 = vpop.permute.xlu1 %3065 }
 0x1f9   : > { %3105 = vst.msk [vmem:[#allocation2 + $0x60] sm:$0xf] %vm1113_vm10, %v3066_v29  ;;  %v2792_v35 = vpop.permute.xlu0 %2791  ;;  %v4784_v29 = vld [vmem:[%s5069_s22 + $0xcc] sm:$0xe]  ;;  %v3759_v31 = vrot.slane %v3757_v22, 4 }
 0x1fa   : > { %2828 = vst.msk [vmem:[#allocation2 + $0x6c] sm:$0xf] %vm832_vm9, %v2792_v35  ;;  %3344 = vrot.lane.b32.xlu1 %v4738_v23, %s5017_s28  ;;  %v1778_v35 = vsel %vm5149_vm5, %v4543_v25, %v1777_v11 }
 0x1fb   : > { %3342 = vrot.lane.b32.xlu0 %v4737_v24, %s5017_s28  ;;  %v3751_v24 = vsel %vm5149_vm5, %v4793_v15, %v3750_v1  ;;  %v3761_v38 = vsel %vm5149_vm5, %v3759_v31, %v3760_v32 }
 0x1fc   : > { %v3070_v43 = vpop.permute.xlu1 %3069 }
 0x1fd   : > { %3107 = vst.msk [vmem:[#allocation2 + $0x68] sm:$0xf] %vm1113_vm10, %v3070_v43  ;;  %v3068_v48 = vpop.permute.xlu0 %3067 }
 0x1fe   : > { %3106 = vst.msk [vmem:[#allocation2 + $0x64] sm:$0xf] %vm1113_vm10, %v3068_v48  ;;  %3620 = vrot.lane.b32.xlu1 %v3569_v36, %s5018_s29  ;;  %v4794_v36 = vrot.slane %v4784_v29, 9 }
 0x1ff   : > { %3618 = vrot.lane.b32.xlu0 %v3559_v44, %s5018_s29 }
 0x200   : > { %v3234_v56 = vpop.permute.xlu1 %3233  ;;  %v3758_v40 = vsel %vm5149_vm5, %v4794_v36, %v3757_v22 }
 0x201   : > { %3273 = vst.msk [vmem:[#allocation2 + $0x60] sm:$0xf] %vm1282_vm11, %v3234_v56  ;;  %v3072_v61 = vpop.permute.xlu0 %3071 }
 0x202   : > { %3108 = vst.msk [vmem:[#allocation2 + $0x6c] sm:$0xf] %vm1113_vm10, %v3072_v61  ;;  %1643 = vrot.lane.b32.xlu1 %v1612_v51, %s5018_s29 }
 0x203   : > { %1641 = vrot.lane.b32.xlu0 %v1602_v57, %s5018_s29 }
 0x204   : > { %v3238_v2 = vpop.permute.xlu1 %3237 }
 0x205   : > { %3275 = vst.msk [vmem:[#allocation2 + $0x68] sm:$0xf] %vm1282_vm11, %v3238_v2  ;;  %v3236_v6 = vpop.permute.xlu0 %3235 }
 0x206   : > { %3274 = vst.msk [vmem:[#allocation2 + $0x64] sm:$0xf] %vm1282_vm11, %v3236_v6  ;;  %1808 = vrot.lane.b32.xlu1 %v1774_v62, %s5019_s6 }
 0x207   : > { %1806 = vrot.lane.b32.xlu0 %v1771_v3, %s5019_s6 }
 0x208   : > { %v3331_v13 = vpop.permute.xlu1 %3330 }
 0x209   : > { %3370 = vst.msk [vmem:[#allocation2 + $0x60] sm:$0xf] %vm1380_vm13, %v3331_v13  ;;  %v3240_v20 = vpop.permute.xlu0 %3239 }
 0x20a   : > { %3276 = vst.msk [vmem:[#allocation2 + $0x6c] sm:$0xf] %vm1282_vm11, %v3240_v20  ;;  %3624 = vrot.lane.b32.xlu1 %v3593_v8, %s5018_s29 }
 0x20b   : > { %3622 = vrot.lane.b32.xlu0 %v3583_v14, %s5018_s29 }
 0x20c   : > { %v1355_v23 = vpop.permute.xlu1 %1354 }
 0x20d   : > { %1392 = vst.msk [vmem:[#allocation2 + $0x2c] sm:$0xf] %vm1380_vm13, %v1355_v23  ;;  %v3333_v28 = vpop.permute.xlu0 %3332 }
 0x20e   : > { %3371 = vst.msk [vmem:[#allocation2 + $0x64] sm:$0xf] %vm1380_vm13, %v3333_v28  ;;  %3788 = vrot.lane.b32.xlu1 %v3754_v21, %s5019_s6 }
 0x20f   : > { %3786 = vrot.lane.b32.xlu0 %v3751_v24, %s5019_s6 }
 0x210   : > { %v1632_v33 = vpop.permute.xlu1 %1631 }
 0x211   : > { %1671 = vst.msk [vmem:[#allocation2 + $0x24] sm:$0xf] %vm1661_vm14, %v1632_v33  ;;  %v1630_v37 = vpop.permute.xlu0 %1629 }
 0x212   : > { %1670 = vst.msk [vmem:[#allocation2 + $0x20] sm:$0xf] %vm1661_vm14, %v1630_v37  ;;  %1812 = vrot.lane.b32.xlu1 %v1781_v30, %s5019_s6 }
 0x213   : > { %1810 = vrot.lane.b32.xlu0 %v1778_v35, %s5019_s6 }
 0x214   : > { %v3337_v39 = vpop.permute.xlu1 %3336 }
 0x215   : > { %3373 = vst.msk [vmem:[#allocation2 + $0x6c] sm:$0xf] %vm1380_vm13, %v3337_v39  ;;  %v3335_v42 = vpop.permute.xlu0 %3334 }
 0x216   : > { %3372 = vst.msk [vmem:[#allocation2 + $0x68] sm:$0xf] %vm1380_vm13, %v3335_v42  ;;  %3792 = vrot.lane.b32.xlu1 %v3761_v38, %s5019_s6 }
 0x217   : > { %3790 = vrot.lane.b32.xlu0 %v3758_v40, %s5019_s6 }
 0x218   : > { %v3613_v41 = vpop.permute.xlu1 %3612 }
 0x219   : > { %3651 = vst.msk [vmem:[#allocation2 + $0x64] sm:$0xf] %vm1661_vm14, %v3613_v41  ;;  %v3611_v43 = vpop.permute.xlu0 %3610 }
 0x21a   : > { %3650 = vst.msk [vmem:[#allocation2 + $0x60] sm:$0xf] %vm1661_vm14, %v3611_v43 }
 0x21c   : > { %v1636_v44 = vpop.permute.xlu1 %1635 }
 0x21d   : > { %1673 = vst.msk [vmem:[#allocation2 + $0x2c] sm:$0xf] %vm1661_vm14, %v1636_v44  ;;  %v1634_v34 = vpop.permute.xlu0 %1633 }
 0x21e   : > { %1672 = vst.msk [vmem:[#allocation2 + $0x28] sm:$0xf] %vm1661_vm14, %v1634_v34 }
 0x220   : > { %v1801_v17 = vpop.permute.xlu1 %1800 }
 0x221   : > { %1840 = vst.msk [vmem:[#allocation2 + $0x24] sm:$0xf] %vm1830_vm15, %v1801_v17  ;;  %v1799_v45 = vpop.permute.xlu0 %1798 }
 0x222   : > { %1839 = vst.msk [vmem:[#allocation2 + $0x20] sm:$0xf] %vm1830_vm15, %v1799_v45 }
 0x224   : > { %v3617_v46 = vpop.permute.xlu1 %3616 }
 0x225   : > { %3653 = vst.msk [vmem:[#allocation2 + $0x6c] sm:$0xf] %vm1661_vm14, %v3617_v46  ;;  %v3615_v47 = vpop.permute.xlu0 %3614 }
 0x226   : > { %3652 = vst.msk [vmem:[#allocation2 + $0x68] sm:$0xf] %vm1661_vm14, %v3615_v47 }
 0x228   : > { %v3781_v48 = vpop.permute.xlu1 %3780 }
 0x229   : > { %3819 = vst.msk [vmem:[#allocation2 + $0x64] sm:$0xf] %vm1830_vm15, %v3781_v48  ;;  %v3779_v49 = vpop.permute.xlu0 %3778  ;;  %v4980_v51 = vld [vmem:[#allocation2 + $0x20] sm:$0xff]  }
 0x22a   : > { %3818 = vst.msk [vmem:[#allocation2 + $0x60] sm:$0xf] %vm1830_vm15, %v3779_v49  ;;  %4901 = vmatprep.mubr.msk.bf16.mxu0 %vm1923_vm0, %v4980_v51 }
 0x22c   : > { %v1805_v52 = vpop.permute.xlu1 %1804 }
 0x22d   : > { %1842 = vst.msk [vmem:[#allocation2 + $0x2c] sm:$0xf] %vm1830_vm15, %v1805_v52  ;;  %v1803_v53 = vpop.permute.xlu0 %1802 }
 0x22e   : > { %1841 = vst.msk [vmem:[#allocation2 + $0x28] sm:$0xf] %vm1830_vm15, %v1803_v53 }
 0x230   : > { %v2531_v54 = vpop.permute.xlu1 %2530 }
 0x231   : > { %2565 = vst.msk [vmem:[#allocation2 + $0x74] sm:$0xf] %vm562_vm7, %v2531_v54  ;;  %v2529_v55 = vpop.permute.xlu0 %2528  ;;  %v4981_v56 = vld [vmem:[#allocation2 + $0x60] sm:$0xff]  }
 0x232   : > { %2564 = vst.msk [vmem:[#allocation2 + $0x70] sm:$0xf] %vm562_vm7, %v2529_v55  ;;  %4923 = vmatprep.mubr.msk.bf16.mxu1 %vm1923_vm0, %v4981_v56 }
 0x234   : > { %v3785_v57 = vpop.permute.xlu1 %3784 }
 0x235   : > { %3821 = vst.msk [vmem:[#allocation2 + $0x6c] sm:$0xf] %vm1830_vm15, %v3785_v57  ;;  %v3783_v58 = vpop.permute.xlu0 %3782  ;;  %v4982_v59 = vld [vmem:[#allocation2 + $0x28] sm:$0xff]  }
 0x236   : > { %3820 = vst.msk [vmem:[#allocation2 + $0x68] sm:$0xf] %vm1830_vm15, %v3783_v58  ;;  %4902 = vmatmul.mubr.msk.bf16.gmra.mxu0 %vm1923_vm0, %v4982_v59 }
 0x238   : > { %v2535_v50 = vpop.permute.xlu1 %2534 }
 0x239   : > { %2567 = vst.msk [vmem:[#allocation2 + $0x7c] sm:$0xf] %vm562_vm7, %v2535_v50  ;;  %v2533_v61 = vpop.permute.xlu0 %2532 }
 0x23a   : > { %2566 = vst.msk [vmem:[#allocation2 + $0x78] sm:$0xf] %vm562_vm7, %v2533_v61 }
 0x23c   : > { %v2699_v62 = vpop.permute.xlu1 %2698 }
 0x23d   : > { %2733 = vst.msk [vmem:[#allocation2 + $0x74] sm:$0xf] %vm734_vm8, %v2699_v62  ;;  %v2697_v63 = vpop.permute.xlu0 %2696  ;;  %v4983_v0 = vld [vmem:[#allocation2 + $0x68] sm:$0xff]  }
 0x23e   : > { %2732 = vst.msk [vmem:[#allocation2 + $0x70] sm:$0xf] %vm734_vm8, %v2697_v63  ;;  %4924 = vmatmul.mubr.msk.bf16.gmra.mxu1 %vm1923_vm0, %v4983_v0 }
 0x240   : > { %v2703_v1 = vpop.permute.xlu1 %2702 }
 0x241   : > { %2735 = vst.msk [vmem:[#allocation2 + $0x7c] sm:$0xf] %vm734_vm8, %v2703_v1  ;;  %v2701_v2 = vpop.permute.xlu0 %2700 }
 0x242   : > { %2734 = vst.msk [vmem:[#allocation2 + $0x78] sm:$0xf] %vm734_vm8, %v2701_v2 }
 0x244   : > { %v2796_v3 = vpop.permute.xlu1 %2795 }
 0x245   : > { %2830 = vst.msk [vmem:[#allocation2 + $0x74] sm:$0xf] %vm832_vm9, %v2796_v3  ;;  %v2794_v60 = vpop.permute.xlu0 %2793 }
 0x246   : > { %2829 = vst.msk [vmem:[#allocation2 + $0x70] sm:$0xf] %vm832_vm9, %v2794_v60 }
 0x248   : > { %v2800_v4 = vpop.permute.xlu1 %2799 }
 0x249   : > { %2832 = vst.msk [vmem:[#allocation2 + $0x7c] sm:$0xf] %vm832_vm9, %v2800_v4  ;;  %v2798_v5 = vpop.permute.xlu0 %2797 }
 0x24a   : > { %2831 = vst.msk [vmem:[#allocation2 + $0x78] sm:$0xf] %vm832_vm9, %v2798_v5 }
 0x24c   : > { %v3076_v6 = vpop.permute.xlu1 %3075 }
 0x24d   : > { %3110 = vst.msk [vmem:[#allocation2 + $0x74] sm:$0xf] %vm1113_vm10, %v3076_v6  ;;  %v3074_v7 = vpop.permute.xlu0 %3073 }
 0x24e   : > { %3109 = vst.msk [vmem:[#allocation2 + $0x70] sm:$0xf] %vm1113_vm10, %v3074_v7 }
 0x250   : > { %v3080_v8 = vpop.permute.xlu1 %3079 }
 0x251   : > { %3112 = vst.msk [vmem:[#allocation2 + $0x7c] sm:$0xf] %vm1113_vm10, %v3080_v8  ;;  %v3078_v9 = vpop.permute.xlu0 %3077 }
 0x252   : > { %3111 = vst.msk [vmem:[#allocation2 + $0x78] sm:$0xf] %vm1113_vm10, %v3078_v9 }
 0x254   : > { %v3244_v10 = vpop.permute.xlu1 %3243 }
 0x255   : > { %3278 = vst.msk [vmem:[#allocation2 + $0x74] sm:$0xf] %vm1282_vm11, %v3244_v10  ;;  %v3242_v11 = vpop.permute.xlu0 %3241 }
 0x256   : > { %3277 = vst.msk [vmem:[#allocation2 + $0x70] sm:$0xf] %vm1282_vm11, %v3242_v11  ;;  %v4895_v13 = vpop.f32.mrf.mxu0 }
 0x257   : > { %v2051_v14 = vmax.f32 %v4895_v13, 0.0 }
 0x258   : > { %v1359_v15 = vpop.permute.xlu1 %1358  ;;  %v1986_v18 = vpop.f32.mrf.mxu0 }
 0x259   : > { %1394 = vst.msk [vmem:[#allocation2 + $0x34] sm:$0xf] %vm1380_vm13, %v1359_v15  ;;  %v1357_v16 = vpop.permute.xlu0 %1356  ;;  %v4835_v20 = vpack.c.bf16 %v2051_v14, %v2051_v14  ;;  %v2049_v12 = vmax.f32 %v1986_v18, 0.0 }
 0x25a   : > { %1393 = vst.msk [vmem:[#allocation2 + $0x30] sm:$0xf] %vm1380_vm13, %v1357_v16  ;;  %v4896_v21 = vpop.f32.mrf.mxu0 }
 0x25b   : > { %2132 = vst.msk [vmem:[%s6468_s24 + $0x8] sm:$0xf] %vm2129_vm1, %v4835_v20  ;;  %v4833_v27 = vpack.c.bf16 %v2049_v12, %v2049_v12  ;;  %v2052_v19 = vmax.f32 %v4896_v21, 0.0 }
 0x25c   : > { %v3248_v22 = vpop.permute.xlu1 %3247  ;;  %v1989_v24 = vpop.f32.mrf.mxu0 }
 0x25d   : > { %3280 = vst.msk [vmem:[#allocation2 + $0x7c] sm:$0xf] %vm1282_vm11, %v3248_v22  ;;  %v3246_v23 = vpop.permute.xlu0 %3245  ;;  %v2066_v25 = vpack.c.bf16 %v2052_v19, %v2051_v14  ;;  %v4836_v26 = vpack.c.bf16 %v2052_v19, %v2052_v19  ;;  %v2050_v28 = vmax.f32 %v1989_v24, 0.0 }
 0x25e   : > { %2130 = vst.msk [vmem:[%s6468_s24] sm:$0xf] %vm2129_vm1, %v4833_v27  ;;  %v4917_v29 = vpop.f32.mrf.mxu1 }
 0x25f   : > { %3279 = vst.msk [vmem:[#allocation2 + $0x78] sm:$0xf] %vm1282_vm11, %v3246_v23  ;;  %v2148_v30 = vunpack.c.l.bf16 %v2066_v25  ;;  %v2065_v31 = vpack.c.bf16 %v2050_v28, %v2049_v12  ;;  %v4834_v32 = vpack.c.bf16 %v2050_v28, %v2050_v28  ;;  %v4028_v35 = vmax.f32 %v4917_v29, 0.0 }
 0x260   : > { %2133 = vst.msk [vmem:[%s6468_s24 + $0xc] sm:$0xf] %vm2129_vm1, %v4836_v26  ;;  %v3341_v33 = vpop.permute.xlu1 %3340  ;;  %v3963_v37 = vpop.f32.mrf.mxu1  ;;  %v2149_v38 = vunpack.c.h.bf16 %v2066_v25 }
 0x261   : > { %3375 = vst.msk [vmem:[#allocation2 + $0x74] sm:$0xf] %vm1380_vm13, %v3341_v33  ;;  %v3339_v36 = vpop.permute.xlu0 %3338  ;;  %v2146_v39 = vunpack.c.l.bf16 %v2065_v31  ;;  %v2147_v40 = vunpack.c.h.bf16 %v2065_v31  ;;  %v4851_v42 = vpack.c.bf16 %v4028_v35, %v4028_v35  ;;  %v4026_v41 = vmax.f32 %v3963_v37, 0.0 }
 0x262   : > { %2131 = vst.msk [vmem:[%s6468_s24 + $0x4] sm:$0xf] %vm2129_vm1, %v4834_v32  ;;  %v4918_v43 = vpop.f32.mrf.mxu1  ;;  %v2166_v44 = vsel %vm2162_vm2, %v2148_v30, 0.0  ;;  %v2203_v34 = vmul.f32 %v2148_v30, %v2148_v30  ;;  %v2204_v57 = vmul.f32 %v2149_v38, %v2149_v38  ;;  %v2168_v60 = vsel %vm2162_vm2, %v2149_v38, 0.0 }
 0x263   : > { %3374 = vst.msk [vmem:[#allocation2 + $0x70] sm:$0xf] %vm1380_vm13, %v3339_v36  ;;  %v4029_v17 = vmax.f32 %v4918_v43, 0.0  ;;  %v2163_v46 = vsel %vm2162_vm2, %v2146_v39, 0.0  ;;  %v2164_v47 = vsel %vm2162_vm2, %v2147_v40, 0.0  ;;  %v2201_v48 = vmul.f32 %v2146_v39, %v2146_v39 }
 0x264   : > { %v1363_v45 = vpop.permute.xlu1 %1362  ;;  %v2202_v49 = vmul.f32 %v2147_v40, %v2147_v40  ;;  %4108 = vst.msk [vmem:[%s6468_s24 + $0x48] sm:$0xf] %vm2129_vm1, %v4851_v42  ;;  %v3966_v52 = vpop.f32.mrf.mxu1  ;;  %v2165_v53 = vadd.f32 %v2164_v47, %v2163_v46  ;;  %v4849_v54 = vpack.c.bf16 %v4026_v41, %v4026_v41  ;;  %v2220_v0 = vsel %vm2162_vm2, %v2203_v34, 0.0 }
 0x265   : > { %1396 = vst.msk [vmem:[#allocation2 + $0x3c] sm:$0xf] %vm1380_vm13, %v1363_v45  ;;  %v1361_v51 = vpop.permute.xlu0 %1360  ;;  %v4043_v55 = vpack.c.bf16 %v4029_v17, %v4028_v35  ;;  %v4852_v56 = vpack.c.bf16 %v4029_v17, %v4029_v17  ;;  %v2217_v58 = vsel %vm2162_vm2, %v2201_v48, 0.0  ;;  %v4027_v50 = vmax.f32 %v3966_v52, 0.0 }
 0x266   : > { %1395 = vst.msk [vmem:[#allocation2 + $0x38] sm:$0xf] %vm1380_vm13, %v1361_v51  ;;  %v2218_v59 = vsel %vm2162_vm2, %v2202_v49, 0.0  ;;  %v2167_v61 = vadd.f32 %v2166_v44, %v2165_v53  ;;  %v2222_v6 = vsel %vm2162_vm2, %v2204_v57, 0.0 }
 0x267   : > { %v2219_v62 = vadd.f32 %v2218_v59, %v2217_v58  ;;  %4106 = vst.msk [vmem:[%s6468_s24 + $0x40] sm:$0xf] %vm2129_vm1, %v4849_v54  ;;  %4109 = vst.msk [vmem:[%s6468_s24 + $0x4c] sm:$0xf] %vm2129_vm1, %v4852_v56  ;;  %v4042_v1 = vpack.c.bf16 %v4027_v50, %v4026_v41  ;;  %v4850_v2 = vpack.c.bf16 %v4027_v50, %v4027_v50  ;;  %v4124_v5 = vunpack.c.l.bf16 %v4043_v55 }
 0x268   : > { %v1640_v63 = vpop.permute.xlu1 %1639  ;;  %v6504_v9 = vadd.f32 %v2168_v60, %v2167_v61  ;;  %v4125_v10 = vunpack.c.h.bf16 %v4043_v55 }
 0x269   : > { %1675 = vst.msk [vmem:[#allocation2 + $0x34] sm:$0xf] %vm1661_vm14, %v1640_v63  ;;  %v1638_v3 = vpop.permute.xlu0 %1637  ;;  %v2221_v4 = vadd.f32 %v2220_v0, %v2219_v62  ;;  %v4122_v7 = vunpack.c.l.bf16 %v4042_v1  ;;  %v4123_v8 = vunpack.c.h.bf16 %v4042_v1  ;;  %v4178_v20 = vmul.f32 %v4124_v5, %v4124_v5 }
 0x26a   : > { %1674 = vst.msk [vmem:[#allocation2 + $0x30] sm:$0xf] %vm1661_vm14, %v1638_v3  ;;  %v4141_v27 = vsel %vm2162_vm2, %v4124_v5, 0.0  ;;  %v4179_v22 = vmul.f32 %v4125_v10, %v4125_v10  ;;  %v4143_v26 = vsel %vm2162_vm2, %v4125_v10, 0.0 }
 0x26b   : > { %4107 = vst.msk [vmem:[%s6468_s24 + $0x44] sm:$0xf] %vm2129_vm1, %v4850_v2  ;;  %v6506_v13 = vadd.f32 %v2222_v6, %v2221_v4  ;;  %v4138_v14 = vsel %vm2162_vm2, %v4122_v7, 0.0  ;;  %v4139_v15 = vsel %vm2162_vm2, %v4123_v8, 0.0  ;;  %v4176_v16 = vmul.f32 %v4122_v7, %v4122_v7 }
 0x26c   : > { %v3345_v11 = vpop.permute.xlu1 %3344  ;;  %v4140_v12 = vadd.f32 %v4139_v15, %v4138_v14  ;;  %v4177_v21 = vmul.f32 %v4123_v8, %v4123_v8  ;;  %v4195_v30 = vsel %vm2162_vm2, %v4178_v20, 0.0  ;;  %v4197_v33 = vsel %vm2162_vm2, %v4179_v22, 0.0 }
 0x26d   : > { %3377 = vst.msk [vmem:[#allocation2 + $0x7c] sm:$0xf] %vm1380_vm13, %v3345_v11  ;;  %v3343_v18 = vpop.permute.xlu0 %3342  ;;  %v4192_v19 = vsel %vm2162_vm2, %v4176_v16, 0.0 }
 0x26e   : > { %3376 = vst.msk [vmem:[#allocation2 + $0x78] sm:$0xf] %vm1380_vm13, %v3343_v18  ;;  %v4142_v23 = vadd.f32 %v4141_v27, %v4140_v12  ;;  %v4193_v24 = vsel %vm2162_vm2, %v4177_v21, 0.0 }
 0x26f   : > { %v4194_v28 = vadd.f32 %v4193_v24, %v4192_v19 }
 0x270   : > { %v3621_v25 = vpop.permute.xlu1 %3620  ;;  %v6519_v31 = vadd.f32 %v4143_v26, %v4142_v23 }
 0x271   : > { %3655 = vst.msk [vmem:[#allocation2 + $0x74] sm:$0xf] %vm1661_vm14, %v3621_v25  ;;  %v3619_v29 = vpop.permute.xlu0 %3618  ;;  %v4196_v32 = vadd.f32 %v4195_v30, %v4194_v28 }
 0x272   : > { %3654 = vst.msk [vmem:[#allocation2 + $0x70] sm:$0xf] %vm1661_vm14, %v3619_v29 }
 0x273   : > { %v6523_v37 = vadd.f32 %v4197_v33, %v4196_v32 }
 0x274   : > { %v1644_v35 = vpop.permute.xlu1 %1643 }
 0x275   : > { %1677 = vst.msk [vmem:[#allocation2 + $0x3c] sm:$0xf] %vm1661_vm14, %v1644_v35  ;;  %v1642_v36 = vpop.permute.xlu0 %1641 }
 0x276   : > { %1676 = vst.msk [vmem:[#allocation2 + $0x38] sm:$0xf] %vm1661_vm14, %v1642_v36 }
 0x278   : > { %v1809_v38 = vpop.permute.xlu1 %1808 }
 0x279   : > { %1844 = vst.msk [vmem:[#allocation2 + $0x34] sm:$0xf] %vm1830_vm15, %v1809_v38  ;;  %v1807_v39 = vpop.permute.xlu0 %1806 }
 0x27a   : > { %1843 = vst.msk [vmem:[#allocation2 + $0x30] sm:$0xf] %vm1830_vm15, %v1807_v39 }
 0x27c   : > { %v3625_v40 = vpop.permute.xlu1 %3624 }
 0x27d   : > { %3657 = vst.msk [vmem:[#allocation2 + $0x7c] sm:$0xf] %vm1661_vm14, %v3625_v40  ;;  %v3623_v42 = vpop.permute.xlu0 %3622 }
 0x27e   : > { %3656 = vst.msk [vmem:[#allocation2 + $0x78] sm:$0xf] %vm1661_vm14, %v3623_v42 }
 0x280   : > { %v3789_v41 = vpop.permute.xlu1 %3788 }
 0x281   : > { %3823 = vst.msk [vmem:[#allocation2 + $0x74] sm:$0xf] %vm1830_vm15, %v3789_v41  ;;  %v3787_v43 = vpop.permute.xlu0 %3786  ;;  %v4984_v44 = vld [vmem:[#allocation2 + $0x30] sm:$0xff]  }
 0x282   : > { %3822 = vst.msk [vmem:[#allocation2 + $0x70] sm:$0xf] %vm1830_vm15, %v3787_v43  ;;  %4905 = vmatprep.mubr.msk.bf16.mxu0 %vm1923_vm0, %v4984_v44 }
 0x284   : > { %v1813_v34 = vpop.permute.xlu1 %1812 }
 0x285   : > { %1846 = vst.msk [vmem:[#allocation2 + $0x3c] sm:$0xf] %vm1830_vm15, %v1813_v34  ;;  %v1811_v17 = vpop.permute.xlu0 %1810 }
 0x286   : > { %1845 = vst.msk [vmem:[#allocation2 + $0x38] sm:$0xf] %vm1830_vm15, %v1811_v17 }
 0x288   : > { %v3793_v45 = vpop.permute.xlu1 %3792 }
 0x289   : > { %3825 = vst.msk [vmem:[#allocation2 + $0x7c] sm:$0xf] %vm1830_vm15, %v3793_v45  ;;  %v3791_v46 = vpop.permute.xlu0 %3790  ;;  %v4985_v47 = vld [vmem:[#allocation2 + $0x70] sm:$0xff]  }
 0x28a   : > { %3824 = vst.msk [vmem:[#allocation2 + $0x78] sm:$0xf] %vm1830_vm15, %v3791_v46  ;;  %4927 = vmatprep.mubr.msk.bf16.mxu1 %vm1923_vm0, %v4985_v47 }
 0x28d   : > { %v4986_v48 = vld [vmem:[#allocation2 + $0x38] sm:$0xff]  }
 0x28e   : > { %4906 = vmatmul.mubr.msk.bf16.gmra.mxu0 %vm1923_vm0, %v4986_v48 }
 0x291   : > { %v4987_v49 = vld [vmem:[#allocation2 + $0x78] sm:$0xff]  }
 0x292   : > { %4928 = vmatmul.mubr.msk.bf16.gmra.mxu1 %vm1923_vm0, %v4987_v49 }
 0x2a6   : > { %v4899_v51 = vpop.f32.mrf.mxu0 }
 0x2a7   : > { %v2055_v52 = vmax.f32 %v4899_v51, 0.0 }
 0x2a8   : > { %v2002_v53 = vpop.f32.mrf.mxu0 }
 0x2a9   : > { %v4839_v54 = vpack.c.bf16 %v2055_v52, %v2055_v52  ;;  %v2053_v55 = vmax.f32 %v2002_v53, 0.0 }
 0x2aa   : > { %v4900_v56 = vpop.f32.mrf.mxu0 }
 0x2ab   : > { %2136 = vst.msk [vmem:[%s6468_s24 + $0x18] sm:$0xf] %vm2129_vm1, %v4839_v54  ;;  %v4837_v57 = vpack.c.bf16 %v2053_v55, %v2053_v55  ;;  %v2056_v58 = vmax.f32 %v4900_v56, 0.0 }
 0x2ac   : > { %v2005_v59 = vpop.f32.mrf.mxu0 }
 0x2ad   : > { %2134 = vst.msk [vmem:[%s6468_s24 + $0x10] sm:$0xf] %vm2129_vm1, %v4837_v57  ;;  %v2068_v50 = vpack.c.bf16 %v2056_v58, %v2055_v52  ;;  %v4840_v61 = vpack.c.bf16 %v2056_v58, %v2056_v58  ;;  %v2054_v62 = vmax.f32 %v2005_v59, 0.0 }
 0x2ae   : > { %v4921_v63 = vpop.f32.mrf.mxu1 }
 0x2af   : > { %2137 = vst.msk [vmem:[%s6468_s24 + $0x1c] sm:$0xf] %vm2129_vm1, %v4840_v61  ;;  %v2067_v0 = vpack.c.bf16 %v2054_v62, %v2053_v55  ;;  %v4838_v1 = vpack.c.bf16 %v2054_v62, %v2054_v62  ;;  %v4032_v2 = vmax.f32 %v4921_v63, 0.0  ;;  %v2152_v60 = vunpack.c.l.bf16 %v2068_v50 }
 0x2b0   : > { %v3979_v3 = vpop.f32.mrf.mxu1  ;;  %v2153_v11 = vunpack.c.h.bf16 %v2068_v50 }
 0x2b1   : > { %2135 = vst.msk [vmem:[%s6468_s24 + $0x14] sm:$0xf] %vm2129_vm1, %v4838_v1  ;;  %v2150_v4 = vunpack.c.l.bf16 %v2067_v0  ;;  %v2151_v5 = vunpack.c.h.bf16 %v2067_v0  ;;  %v4855_v6 = vpack.c.bf16 %v4032_v2, %v4032_v2  ;;  %v4030_v7 = vmax.f32 %v3979_v3, 0.0 }
 0x2b2   : > { %v4922_v8 = vpop.f32.mrf.mxu1  ;;  %v2207_v19 = vmul.f32 %v2152_v60, %v2152_v60  ;;  %v2174_v25 = vsel %vm2162_vm2, %v2152_v60, 0.0  ;;  %v2176_v36 = vsel %vm2162_vm2, %v2153_v11, 0.0 }
 0x2b3   : > { %v4033_v10 = vmax.f32 %v4922_v8, 0.0  ;;  %v2170_v14 = vsel %vm2162_vm2, %v2150_v4, 0.0  ;;  %v2205_v15 = vmul.f32 %v2150_v4, %v2150_v4  ;;  %v2206_v16 = vmul.f32 %v2151_v5, %v2151_v5  ;;  %4112 = vst.msk [vmem:[%s6468_s24 + $0x58] sm:$0xf] %vm2129_vm1, %v4855_v6 }
 0x2b4   : > { %v3982_v18 = vpop.f32.mrf.mxu1  ;;  %v2171_v20 = vadd.f32 %v2170_v14, %v6504_v9  ;;  %v4853_v12 = vpack.c.bf16 %v4030_v7, %v4030_v7  ;;  %v2172_v22 = vsel %vm2162_vm2, %v2151_v5, 0.0  ;;  %v2208_v9 = vmul.f32 %v2153_v11, %v2153_v11 }
 0x2b5   : > { %v4045_v21 = vpack.c.bf16 %v4033_v10, %v4032_v2  ;;  %v4856_v27 = vpack.c.bf16 %v4033_v10, %v4033_v10  ;;  %v2224_v23 = vsel %vm2162_vm2, %v2205_v15, 0.0  ;;  %v4031_v24 = vmax.f32 %v3982_v18, 0.0 }
 0x2b6   : > { %v2173_v26 = vadd.f32 %v2172_v22, %v2171_v20  ;;  %v2225_v28 = vadd.f32 %v2224_v23, %v6506_v13  ;;  %4110 = vst.msk [vmem:[%s6468_s24 + $0x50] sm:$0xf] %vm2129_vm1, %v4853_v12  ;;  %v2226_v29 = vsel %vm2162_vm2, %v2206_v16, 0.0  ;;  %v2228_v38 = vsel %vm2162_vm2, %v2207_v19, 0.0 }
 0x2b7   : > { %4113 = vst.msk [vmem:[%s6468_s24 + $0x5c] sm:$0xf] %vm2129_vm1, %v4856_v27  ;;  %v4044_v30 = vpack.c.bf16 %v4031_v24, %v4030_v7  ;;  %v4854_v32 = vpack.c.bf16 %v4031_v24, %v4031_v24  ;;  %v4128_v42 = vunpack.c.l.bf16 %v4045_v21  ;;  %v2230_v43 = vsel %vm2162_vm2, %v2208_v9, 0.0 }
 0x2b8   : > { %v2175_v33 = vadd.f32 %v2174_v25, %v2173_v26  ;;  %v2227_v35 = vadd.f32 %v2226_v29, %v2225_v28  ;;  %v4129_v44 = vunpack.c.h.bf16 %v4045_v21 }
 0x2b9   : > { %4111 = vst.msk [vmem:[%s6468_s24 + $0x54] sm:$0xf] %vm2129_vm1, %v4854_v32  ;;  %v4126_v39 = vunpack.c.l.bf16 %v4044_v30  ;;  %v4127_v40 = vunpack.c.h.bf16 %v4044_v30  ;;  %v4182_v49 = vmul.f32 %v4128_v42, %v4128_v42  ;;  %v4149_v53 = vsel %vm2162_vm2, %v4128_v42, 0.0 }
 0x2ba   : > { %v2229_v13 = vadd.f32 %v2228_v38, %v2227_v35  ;;  %v2177_v41 = vadd.f32 %v2176_v36, %v2175_v33  ;;  %v4183_v55 = vmul.f32 %v4129_v44, %v4129_v44 }
 0x2bb   : > { %v4145_v34 = vsel %vm2162_vm2, %v4126_v39, 0.0  ;;  %v4180_v45 = vmul.f32 %v4126_v39, %v4126_v39  ;;  %v4181_v46 = vmul.f32 %v4127_v40, %v4127_v40  ;;  %v4147_v48 = vsel %vm2162_vm2, %v4127_v40, 0.0 }
 0x2bc   : > { %v4146_v17 = vadd.f32 %v4145_v34, %v6519_v31  ;;  %v2231_v47 = vadd.f32 %v2230_v43, %v2229_v13  ;;  %v4151_v31 = vsel %vm2162_vm2, %v4129_v44, 0.0  ;;  %v4203_v59 = vsel %vm2162_vm2, %v4182_v49, 0.0 }
 0x2bd   : > { %v4199_v52 = vsel %vm2162_vm2, %v4180_v45, 0.0  ;;  %v4201_v57 = vsel %vm2162_vm2, %v4181_v46, 0.0  ;;  %v4205_v62 = vsel %vm2162_vm2, %v4183_v55, 0.0 }
 0x2be   : > { %v4148_v51 = vadd.f32 %v4147_v48, %v4146_v17  ;;  %v4200_v54 = vadd.f32 %v4199_v52, %v6523_v37 }
 0x2c0   : > { %v4150_v56 = vadd.f32 %v4149_v53, %v4148_v51  ;;  %v4202_v58 = vadd.f32 %v4201_v57, %v4200_v54 }
 0x2c2   : > { %v6575_v50 = vadd.f32 %v4151_v31, %v4150_v56  ;;  %v4204_v61 = vadd.f32 %v4203_v59, %v4202_v58 }
 0x2c4   : > { %v6578_v63 = vadd.f32 %v4205_v62, %v4204_v61 }
 0x2f6   : > { %v4903_v37 = vpop.f32.mrf.mxu0 }
 0x2f7   : > { %v2059_v0 = vmax.f32 %v4903_v37, 0.0 }
 0x2f8   : > { %v2018_v1 = vpop.f32.mrf.mxu0 }
 0x2f9   : > { %v4843_v2 = vpack.c.bf16 %v2059_v0, %v2059_v0  ;;  %v2057_v3 = vmax.f32 %v2018_v1, 0.0 }
 0x2fa   : > { %v4904_v60 = vpop.f32.mrf.mxu0 }
 0x2fb   : > { %2140 = vst.msk [vmem:[%s6468_s24 + $0x28] sm:$0xf] %vm2129_vm1, %v4843_v2  ;;  %v4841_v4 = vpack.c.bf16 %v2057_v3, %v2057_v3  ;;  %v2060_v5 = vmax.f32 %v4904_v60, 0.0 }
 0x2fc   : > { %v2021_v6 = vpop.f32.mrf.mxu0 }
 0x2fd   : > { %2138 = vst.msk [vmem:[%s6468_s24 + $0x20] sm:$0xf] %vm2129_vm1, %v4841_v4  ;;  %v2070_v7 = vpack.c.bf16 %v2060_v5, %v2059_v0  ;;  %v4844_v8 = vpack.c.bf16 %v2060_v5, %v2060_v5  ;;  %v2058_v10 = vmax.f32 %v2021_v6, 0.0 }
 0x2fe   : > { %v4925_v11 = vpop.f32.mrf.mxu1 }
 0x2ff   : > { %2141 = vst.msk [vmem:[%s6468_s24 + $0x2c] sm:$0xf] %vm2129_vm1, %v4844_v8  ;;  %v2069_v14 = vpack.c.bf16 %v2058_v10, %v2057_v3  ;;  %v4842_v15 = vpack.c.bf16 %v2058_v10, %v2058_v10  ;;  %v4036_v16 = vmax.f32 %v4925_v11, 0.0  ;;  %v2156_v20 = vunpack.c.l.bf16 %v2070_v7 }
 0x300   : > { %v3995_v18 = vpop.f32.mrf.mxu1  ;;  %v2157_v24 = vunpack.c.h.bf16 %v2070_v7 }
 0x301   : > { %2139 = vst.msk [vmem:[%s6468_s24 + $0x24] sm:$0xf] %vm2129_vm1, %v4842_v15  ;;  %v2154_v12 = vunpack.c.l.bf16 %v2069_v14  ;;  %v2155_v21 = vunpack.c.h.bf16 %v2069_v14  ;;  %v4859_v27 = vpack.c.bf16 %v4036_v16, %v4036_v16  ;;  %v4034_v19 = vmax.f32 %v3995_v18, 0.0 }
 0x302   : > { %v4926_v22 = vpop.f32.mrf.mxu1  ;;  %v2211_v35 = vmul.f32 %v2156_v20, %v2156_v20  ;;  %v2182_v40 = vsel %vm2162_vm2, %v2156_v20, 0.0  ;;  %v2212_v43 = vmul.f32 %v2157_v24, %v2157_v24  ;;  %v2184_v46 = vsel %vm2162_vm2, %v2157_v24, 0.0 }
 0x303   : > { %v4037_v23 = vmax.f32 %v4926_v22, 0.0  ;;  %v2178_v25 = vsel %vm2162_vm2, %v2154_v12, 0.0  ;;  %v2209_v26 = vmul.f32 %v2154_v12, %v2154_v12  ;;  %v2210_v28 = vmul.f32 %v2155_v21, %v2155_v21  ;;  %4116 = vst.msk [vmem:[%s6468_s24 + $0x68] sm:$0xf] %vm2129_vm1, %v4859_v27 }
 0x304   : > { %v3998_v9 = vpop.f32.mrf.mxu1  ;;  %v2179_v29 = vadd.f32 %v2178_v25, %v2177_v41  ;;  %v4857_v30 = vpack.c.bf16 %v4034_v19, %v4034_v19  ;;  %v2180_v36 = vsel %vm2162_vm2, %v2155_v21, 0.0  ;;  %v2236_v48 = vsel %vm2162_vm2, %v2211_v35, 0.0 }
 0x305   : > { %v4047_v32 = vpack.c.bf16 %v4037_v23, %v4036_v16  ;;  %v4860_v33 = vpack.c.bf16 %v4037_v23, %v4037_v23  ;;  %v2232_v38 = vsel %vm2162_vm2, %v2209_v26, 0.0  ;;  %v4035_v39 = vmax.f32 %v3998_v9, 0.0 }
 0x306   : > { %v2181_v13 = vadd.f32 %v2180_v36, %v2179_v29  ;;  %v2233_v42 = vadd.f32 %v2232_v38, %v2231_v47  ;;  %4114 = vst.msk [vmem:[%s6468_s24 + $0x60] sm:$0xf] %vm2129_vm1, %v4857_v30  ;;  %v2234_v41 = vsel %vm2162_vm2, %v2210_v28, 0.0  ;;  %v2238_v54 = vsel %vm2162_vm2, %v2212_v43, 0.0 }
 0x307   : > { %4117 = vst.msk [vmem:[%s6468_s24 + $0x6c] sm:$0xf] %vm2129_vm1, %v4860_v33  ;;  %v4046_v44 = vpack.c.bf16 %v4035_v39, %v4034_v19  ;;  %v4858_v34 = vpack.c.bf16 %v4035_v39, %v4035_v39  ;;  %v4132_v52 = vunpack.c.l.bf16 %v4047_v32  ;;  %v4133_v55 = vunpack.c.h.bf16 %v4047_v32 }
 0x308   : > { %v2183_v17 = vadd.f32 %v2182_v40, %v2181_v13  ;;  %v2235_v45 = vadd.f32 %v2234_v41, %v2233_v42 }
 0x309   : > { %4115 = vst.msk [vmem:[%s6468_s24 + $0x64] sm:$0xf] %vm2129_vm1, %v4858_v34  ;;  %v4130_v49 = vunpack.c.l.bf16 %v4046_v44  ;;  %v4131_v51 = vunpack.c.h.bf16 %v4046_v44  ;;  %v4186_v62 = vmul.f32 %v4132_v52, %v4132_v52  ;;  %v4157_v1 = vsel %vm2162_vm2, %v4132_v52, 0.0 }
 0x30a   : > { %v2237_v47 = vadd.f32 %v2236_v48, %v2235_v45  ;;  %v6603_v53 = vadd.f32 %v2184_v46, %v2183_v17  ;;  %v4187_v3 = vmul.f32 %v4133_v55, %v4133_v55 }
 0x30b   : > { %v4153_v56 = vsel %vm2162_vm2, %v4130_v49, 0.0  ;;  %v4184_v31 = vmul.f32 %v4130_v49, %v4130_v49  ;;  %v4185_v58 = vmul.f32 %v4131_v51, %v4131_v51  ;;  %v4155_v61 = vsel %vm2162_vm2, %v4131_v51, 0.0 }
 0x30c   : > { %v4154_v57 = vadd.f32 %v4153_v56, %v6575_v50  ;;  %v6608_v59 = vadd.f32 %v2238_v54, %v2237_v47  ;;  %v4159_v50 = vsel %vm2162_vm2, %v4133_v55, 0.0  ;;  %v4211_v6 = vsel %vm2162_vm2, %v4186_v62, 0.0 }
 0x30d   : > { %v4207_v0 = vsel %vm2162_vm2, %v4184_v31, 0.0  ;;  %v4209_v4 = vsel %vm2162_vm2, %v4185_v58, 0.0  ;;  %v4213_v10 = vsel %vm2162_vm2, %v4187_v3, 0.0 }
 0x30e   : > { %v4156_v37 = vadd.f32 %v4155_v61, %v4154_v57  ;;  %v4208_v2 = vadd.f32 %v4207_v0, %v6578_v63 }
 0x310   : > { %v4158_v60 = vadd.f32 %v4157_v1, %v4156_v37  ;;  %v4210_v5 = vadd.f32 %v4209_v4, %v4208_v2 }
 0x312   : > { %v6617_v7 = vadd.f32 %v4159_v50, %v4158_v60  ;;  %v4212_v8 = vadd.f32 %v4211_v6, %v4210_v5 }
 0x314   : > { %v6620_v11 = vadd.f32 %v4213_v10, %v4212_v8 }
 0x34e   : > { %v4907_v14 = vpop.f32.mrf.mxu0 }
 0x34f   : > { %v2063_v63 = vmax.f32 %v4907_v14, 0.0 }
 0x350   : > { %v2034_v15 = vpop.f32.mrf.mxu0 }
 0x351   : > { %v4847_v16 = vpack.c.bf16 %v2063_v63, %v2063_v63  ;;  %v2061_v18 = vmax.f32 %v2034_v15, 0.0 }
 0x352   : > { %v4908_v20 = vpop.f32.mrf.mxu0  ;;  %v4929_v12 = vpop.f32.mrf.mxu1 }
 0x353   : > { %2144 = vst.msk [vmem:[%s6468_s24 + $0x38] sm:$0xf] %vm2129_vm1, %v4847_v16  ;;  %v4845_v21 = vpack.c.bf16 %v2061_v18, %v2061_v18  ;;  %v2064_v27 = vmax.f32 %v4908_v20, 0.0  ;;  %v4040_v19 = vmax.f32 %v4929_v12, 0.0 }
 0x354   : > { %v2037_v22 = vpop.f32.mrf.mxu0  ;;  %v4011_v23 = vpop.f32.mrf.mxu1 }
 0x355   : > { %2142 = vst.msk [vmem:[%s6468_s24 + $0x30] sm:$0xf] %vm2129_vm1, %v4845_v21  ;;  %v4848_v24 = vpack.c.bf16 %v2064_v27, %v2064_v27  ;;  %v4863_v25 = vpack.c.bf16 %v4040_v19, %v4040_v19  ;;  %v2062_v26 = vmax.f32 %v2037_v22, 0.0  ;;  %v2072_v28 = vpack.c.bf16 %v2064_v27, %v2063_v63 }
 0x356   : > { %v4038_v9 = vmax.f32 %v4011_v23, 0.0  ;;  %v4930_v29 = vpop.f32.mrf.mxu1 }
 0x357   : > { %2145 = vst.msk [vmem:[%s6468_s24 + $0x3c] sm:$0xf] %vm2129_vm1, %v4848_v24  ;;  %4120 = vst.msk [vmem:[%s6468_s24 + $0x78] sm:$0xf] %vm2129_vm1, %v4863_v25  ;;  %v2071_v30 = vpack.c.bf16 %v2062_v26, %v2061_v18  ;;  %v4846_v32 = vpack.c.bf16 %v2062_v26, %v2062_v26  ;;  %v4041_v35 = vmax.f32 %v4930_v29, 0.0  ;;  %v2160_v38 = vunpack.c.l.bf16 %v2072_v28 }
 0x358   : > { %v4861_v33 = vpack.c.bf16 %v4038_v9, %v4038_v9  ;;  %v4014_v36 = vpop.f32.mrf.mxu1  ;;  %v2161_v42 = vunpack.c.h.bf16 %v2072_v28 }
 0x359   : > { %2143 = vst.msk [vmem:[%s6468_s24 + $0x34] sm:$0xf] %vm2129_vm1, %v4846_v32  ;;  %v2158_v39 = vunpack.c.l.bf16 %v2071_v30  ;;  %v2159_v40 = vunpack.c.h.bf16 %v2071_v30  ;;  %v4864_v13 = vpack.c.bf16 %v4041_v35, %v4041_v35  ;;  %v4039_v43 = vmax.f32 %v4014_v36, 0.0 }
 0x35a   : > { %4118 = vst.msk [vmem:[%s6468_s24 + $0x70] sm:$0xf] %vm2129_vm1, %v4861_v33  ;;  %v4049_v17 = vpack.c.bf16 %v4041_v35, %v4040_v19  ;;  %v2215_v48 = vmul.f32 %v2160_v38, %v2160_v38  ;;  %v2190_v52 = vsel %vm2162_vm2, %v2160_v38, 0.0  ;;  %v2216_v54 = vmul.f32 %v2161_v42, %v2161_v42 }
 0x35b   : > { %v2186_v41 = vsel %vm2162_vm2, %v2158_v39, 0.0  ;;  %v2213_v44 = vmul.f32 %v2158_v39, %v2158_v39  ;;  %v2214_v34 = vmul.f32 %v2159_v40, %v2159_v40  ;;  %4121 = vst.msk [vmem:[%s6468_s24 + $0x7c] sm:$0xf] %vm2129_vm1, %v4864_v13  ;;  %v4048_v46 = vpack.c.bf16 %v4039_v43, %v4038_v9 }
 0x35c   : > { %v2187_v45 = vadd.f32 %v2186_v41, %v6603_v53  ;;  %v2188_v49 = vsel %vm2162_vm2, %v2159_v40, 0.0  ;;  %v4862_v47 = vpack.c.bf16 %v4039_v43, %v4039_v43  ;;  %v4136_v31 = vunpack.c.l.bf16 %v4049_v17 }
 0x35d   : > { %v2240_v51 = vsel %vm2162_vm2, %v2213_v44, 0.0  ;;  %v2242_v57 = vsel %vm2162_vm2, %v2214_v34, 0.0  ;;  %v4134_v58 = vunpack.c.l.bf16 %v4048_v46  ;;  %v4135_v53 = vunpack.c.h.bf16 %v4048_v46 }
 0x35e   : > { %v2189_v55 = vadd.f32 %v2188_v49, %v2187_v45  ;;  %v2241_v56 = vadd.f32 %v2240_v51, %v6608_v59  ;;  %4119 = vst.msk [vmem:[%s6468_s24 + $0x74] sm:$0xf] %vm2129_vm1, %v4862_v47  ;;  %v2192_v37 = vsel %vm2162_vm2, %v2161_v42, 0.0  ;;  %v2244_v0 = vsel %vm2162_vm2, %v2215_v48, 0.0 }
 0x35f   : > { %v4137_v1 = vunpack.c.h.bf16 %v4049_v17  ;;  %v4161_v2 = vsel %vm2162_vm2, %v4134_v58, 0.0  ;;  %v4188_v4 = vmul.f32 %v4134_v58, %v4134_v58  ;;  %v2246_v50 = vsel %vm2162_vm2, %v2216_v54, 0.0 }
 0x360   : > { %v2191_v61 = vadd.f32 %v2190_v52, %v2189_v55  ;;  %v2243_v62 = vadd.f32 %v2242_v57, %v2241_v56  ;;  %v4162_v59 = vadd.f32 %v4161_v2, %v6617_v7  ;;  %v4190_v5 = vmul.f32 %v4136_v31, %v4136_v31 }
 0x361   : > { %v4163_v6 = vsel %vm2162_vm2, %v4135_v53, 0.0  ;;  %v4189_v8 = vmul.f32 %v4135_v53, %v4135_v53  ;;  %v4215_v15 = vsel %vm2162_vm2, %v4188_v4, 0.0  ;;  %v4165_v16 = vsel %vm2162_vm2, %v4136_v31, 0.0 }
 0x362   : > { %v2193_v3 = vadd.f32 %v2192_v37, %v2191_v61  ;;  %v2245_v60 = vadd.f32 %v2244_v0, %v2243_v62  ;;  %v4164_v63 = vadd.f32 %v4163_v6, %v4162_v59  ;;  %v4191_v18 = vmul.f32 %v4137_v1, %v4137_v1 }
 0x363   : > { %v4216_v20 = vadd.f32 %v4215_v15, %v6620_v11  ;;  %v4217_v27 = vsel %vm2162_vm2, %v4189_v8, 0.0  ;;  %v4167_v19 = vsel %vm2162_vm2, %v4137_v1, 0.0  ;;  %v4219_v25 = vsel %vm2162_vm2, %v4190_v5, 0.0 }
 0x364   : > { %v2194_v10 = vrot.slane %v2193_v3, 4  ;;  %v2247_v14 = vadd.f32 %v2246_v50, %v2245_v60  ;;  %v4166_v7 = vadd.f32 %v4165_v16, %v4164_v63  ;;  %v4221_v9 = vsel %vm2162_vm2, %v4191_v18, 0.0 }
 0x365   : > { %v4218_v22 = vadd.f32 %v4217_v27, %v4216_v20 }
 0x366   : > { %v2195_v12 = vadd.f32 %v2194_v10, %v2193_v3  ;;  %v2248_v21 = vrot.slane %v2247_v14, 4  ;;  %v4168_v26 = vadd.f32 %v4167_v19, %v4166_v7 }
 0x367   : > { %v4220_v28 = vadd.f32 %v4219_v25, %v4218_v22 }
 0x368   : > { %v2196_v23 = vrot.slane %v2195_v12, 2  ;;  %v2249_v24 = vadd.f32 %v2248_v21, %v2247_v14  ;;  %v4169_v29 = vrot.slane %v4168_v26, 4 }
 0x369   : > { %v4222_v11 = vadd.f32 %v4221_v9, %v4220_v28 }
 0x36a   : > { %v2250_v30 = vrot.slane %v2249_v24, 2  ;;  %v2197_v32 = vadd.f32 %v2196_v23, %v2195_v12  ;;  %v4170_v33 = vadd.f32 %v4169_v29, %v4168_v26 }
 0x36b   : > { %v4223_v35 = vrot.slane %v4222_v11, 4 }
 0x36c   : > { %v4171_v36 = vrot.slane %v4170_v33, 2  ;;  %v2251_v38 = vadd.f32 %v2250_v30, %v2249_v24  ;;  %v2198_v40 = vrot.slane %v2197_v32, 1 }
 0x36d   : > { %v4224_v39 = vadd.f32 %v4223_v35, %v4222_v11 }
 0x36e   : > { %v4172_v13 = vadd.f32 %v4171_v36, %v4170_v33  ;;  %v2252_v41 = vrot.slane %v2251_v38, 1  ;;  %v2199_v34 = vadd.f32 %v2198_v40, %v2197_v32 }
 0x36f   : > { %v4225_v42 = vrot.slane %v4224_v39, 2 }
 0x370   : > { %v4173_v43 = vrot.slane %v4172_v13, 1  ;;  %v2253_v48 = vadd.f32 %v2252_v41, %v2251_v38 }
 0x371   : > { %v4226_v44 = vadd.f32 %v4225_v42, %v4224_v39 }
 0x372   : > { %v4174_v17 = vadd.f32 %v4173_v43, %v4172_v13 }
 0x373   : > { %v4227_v45 = vrot.slane %v4226_v44, 1 }
 0x374   : > { %v4175_v46 = vadd.f32 %v4174_v17, %v2199_v34 }
 0x375   : > { %v4228_v49 = vadd.f32 %v4227_v45, %v4226_v44 }
 0x376   : > { %4231 = vst.msk [vmem:[%s254_s27] sm:$0x1] %vm4230_vm3, %v4175_v46 }
 0x377   : > { %v4229_v51 = vadd.f32 %v4228_v49, %v2253_v48 }
 0x379   : > { %4232 = vst.msk [vmem:[%s260_s30] sm:$0x1] %vm4230_vm3, %v4229_v51 }
 0x37a PF: > { %s15_s17 = sadd.s32 1, %s5010_s17   ;;  %s6684_s15 = smov %s5006_s16 }
 0x37b   : > { %p12_p5 = scmp.ge.s32.totalorder %s15_s17, 4   ;;  %s6685_s16 = smov %s6687_s18 }
 0x37d   :  { %14 = sbr.rel (!%p12_p5) target bundleno = 2 (0x2), region = 87 }

</bundles_post_ra>
